<compile_context>
chip_gen: v7x
topology: tpu7x:2x2x1
jax: 0.10.0
libtpu: 0.0.40
codegen_flags: <defaults>
</compile_context>

<pallas_src>
import jax
import jax.numpy as jnp
from jax import lax
from jax.experimental import pallas as pl
from jax.experimental.pallas import tpu as pltpu

_BN_EPS = 1e-5


def _next_block_kernel(x_ref, w1_ref, b1_ref, w2_ref, b2_ref, wc_ref, bc_ref,
                       o_ref):
    """B images per grid step; all activations stay resident in VMEM/vregs."""
    B, H, W, cin = x_ref.shape
    cmid = w1_ref.shape[1]
    cout = wc_ref.shape[1]
    M = B * H * W

    xm = x_ref[...].reshape(M, cin)                 # bf16, merge-major reshape

    # ---- conv1 (1x1, BN folded into weight) + ReLU: one MXU matmul ----------
    h1 = jnp.dot(xm, w1_ref[...], preferred_element_type=jnp.float32)
    h1 = jnp.maximum(h1 + b1_ref[...], 0.0)         # (M, cmid)  f32
    h1b = h1.astype(jnp.bfloat16)                   # all copy traffic below bf16

    # ---- conv2 (3x3 grouped, BN folded) as a single im2col matmul -----------
    # Zero-pad once (in bf16), slice the 9 static taps, concatenate along
    # channels, then one K = 9*cmid matmul (fills the MXU instead of 9 K=cmid
    # matmuls + 18 shift copies).
    h1hw = h1b.reshape(B, H, W, cmid)
    zrow = jnp.zeros((B, 1, W, cmid), jnp.bfloat16)
    h1p = jnp.concatenate([zrow, h1hw, zrow], axis=1)        # (B, H+2, W, cmid)
    zcol = jnp.zeros((B, H + 2, 1, cmid), jnp.bfloat16)
    h1p = jnp.concatenate([zcol, h1p, zcol], axis=2)         # (B, H+2, W+2, cmid)
    taps = [h1p[:, ky:ky + H, kx:kx + W, :].reshape(M, cmid)
            for ky in range(3) for kx in range(3)]
    im2col = jnp.concatenate(taps, axis=1)                   # (M, 9*cmid) bf16
    h2 = jnp.dot(im2col, w2_ref[...], preferred_element_type=jnp.float32)
    h2 = jnp.maximum(h2 + b2_ref[...], 0.0)                  # (M, cmid)  f32

    # ---- conv3 + bn3 fused with the downsample residual (1x1 conv + bn) -----
    # [h2 | x] @ [[w3f], [wdf]] == conv3(h2) + downsample(x); the residual add
    # happens inside MXU accumulation. Bias + final ReLU in f32.
    cat = jnp.concatenate([h2.astype(jnp.bfloat16), xm], axis=1)   # (M, cmid+cin)
    out = jnp.dot(cat, wc_ref[...], preferred_element_type=jnp.float32)
    out = jnp.maximum(out + bc_ref[...], 0.0)                # (M, cout)  f32

    o_ref[...] = out.reshape(B, H, W, cout)


def _fold_bn(gamma, beta, mean, var):
    scale = gamma / jnp.sqrt(var + _BN_EPS)
    bias = beta - mean * scale
    return scale, bias


def _images_per_step(n_images):
    """v7x has two TensorCores per chip: keep one image per grid step so the
    'parallel' grid axis maps onto both cores. Single-TC v5e/v6e: fold the
    whole batch into M (removes ~0.35us/step overhead, doubles MXU M-fill)."""
    try:
        kind = jax.devices()[0].device_kind.lower()
    except Exception:
        kind = ""
    if (("v7" in kind) or ("7x" in kind)) and n_images > 1:
        return 1
    return n_images


def next_block_c(x_nchw, params):
    """NeXtBlockC forward (inference-mode BN, stride=1). NCHW in / NCHW out."""
    w1, w2, w3, wd = params["w1"], params["w2"], params["w3"], params["wd"]
    s1, b1 = _fold_bn(*params["bn1"])
    s2, b2 = _fold_bn(*params["bn2"])
    s3, b3 = _fold_bn(*params["bn3"])
    sd, bd = _fold_bn(*params["bnd"])

    # Fold the per-output-channel BN scales into the matmul weights (free,
    # wrapper-side) and cast the weights to bf16 for the MXU.
    w1f = (w1 * s1[None, :]).astype(jnp.bfloat16)             # (cin, cmid)
    w2f = (w2 * s2[None, :]).astype(jnp.bfloat16)             # (9*cmid, cmid)
    wcat = jnp.concatenate([w3 * s3[None, :],                 # (cmid+cin, cout)
                            wd * sd[None, :]], axis=0).astype(jnp.bfloat16)
    b1f = b1[None, :].astype(jnp.float32)                     # (1, cmid)
    b2f = b2[None, :].astype(jnp.float32)                     # (1, cmid)
    bcat = (b3 + bd)[None, :].astype(jnp.float32)             # (1, cout)

    # NCHW -> NHWC and cast to bf16 at the XLA boundary (halves input DMA,
    # removes two in-kernel casts; matmul accumulation stays f32).
    x = jnp.transpose(x_nchw, (0, 2, 3, 1)).astype(jnp.bfloat16)
    N, H, W, cin = x.shape
    cmid = w1f.shape[1]
    cout = wcat.shape[1]

    B = _images_per_step(N)
    assert N % B == 0
    grid = (N // B,)

    def full_spec(a):
        n = a.ndim
        return pl.BlockSpec(a.shape, lambda b: (0,) * n)

    flops = int(2 * N * H * W *
                (cin * cmid + 9 * cmid * cmid + (cmid + cin) * cout))
    bytes_accessed = int(
        x.size * 2 + N * H * W * cout * 4
        + (w1f.size + w2f.size + wcat.size) * 2
        + (b1f.size + b2f.size + bcat.size) * 4)

    out = pl.pallas_call(
        _next_block_kernel,
        out_shape=jax.ShapeDtypeStruct((N, H, W, cout), jnp.float32),
        grid=grid,
        in_specs=[
            pl.BlockSpec((B, H, W, cin), lambda b: (b, 0, 0, 0)),
            full_spec(w1f), full_spec(b1f),
            full_spec(w2f), full_spec(b2f),
            full_spec(wcat), full_spec(bcat),
        ],
        out_specs=pl.BlockSpec((B, H, W, cout), lambda b: (b, 0, 0, 0)),
        # "parallel": per-image axis maps onto v7x's two TensorCores; on
        # single-core chips B == N so there is a single grid step anyway.
        compiler_params=pltpu.CompilerParams(
            dimension_semantics=("parallel",)),
        cost_estimate=pl.CostEstimate(flops=flops, transcendentals=0,
                                      bytes_accessed=bytes_accessed),
    )(x, w1f, b1f, w2f, b2f, wcat, bcat)

    return jnp.transpose(out, (0, 3, 1, 2))                   # NHWC -> NCHW


def make_params(key, cin, cout, C, D):
    """Synthetic NeXtBlockC parameters. BN uses non-trivial (inference-mode)
    running stats / affine params so the BN-folding path is actually tested."""
    cmid = C * D
    ks = jax.random.split(key, 8)

    # kaiming_normal(a=0, mode='fan_out')
    w1 = jax.random.normal(ks[0], (cin, cmid), jnp.float32) * jnp.sqrt(2.0 / cmid)
    wg = jax.random.normal(ks[1], (C, 3, 3, D, D), jnp.float32) * jnp.sqrt(
        2.0 / (9 * D))
    # Grouped 3x3 weight expanded block-diagonally to a dense HWIO kernel,
    # stored in im2col layout: row = (ky*3 + kx)*cmid + cin_idx, col = cout_idx.
    w2d = jnp.zeros((3, 3, cmid, cmid), jnp.float32)
    for g in range(C):
        w2d = w2d.at[:, :, g * D:(g + 1) * D, g * D:(g + 1) * D].set(wg[g])
    w2 = w2d.reshape(9 * cmid, cmid)
    w3 = jax.random.normal(ks[2], (cmid, cout), jnp.float32) * jnp.sqrt(2.0 / cout)
    wd = jax.random.normal(ks[3], (cin, cout), jnp.float32) * jnp.sqrt(2.0 / cout)

    def bn(k, c):
        kg, kb, km, kv = jax.random.split(k, 4)
        gamma = 1.0 + 0.2 * jax.random.normal(kg, (c,), jnp.float32)
        beta = 0.1 * jax.random.normal(kb, (c,), jnp.float32)
        mean = 0.1 * jax.random.normal(km, (c,), jnp.float32)
        var = 1.0 + 0.2 * jax.random.uniform(kv, (c,), jnp.float32)
        return gamma, beta, mean, var

    return {
        "w1": w1, "w2": w2, "w3": w3, "wd": wd,
        "bn1": bn(ks[4], cmid), "bn2": bn(ks[5], cmid),
        "bn3": bn(ks[6], cout), "bnd": bn(ks[7], cout),
    }


def reference(x_nchw, params):
    """Pure-JAX f32 reference implementing the module's forward directly."""
    w1, w2, w3, wd = params["w1"], params["w2"], params["w3"], params["wd"]
    cmid = w1.shape[1]
    hp = lax.Precision.HIGHEST

    def bn(h, stats):
        gamma, beta, mean, var = stats
        return (h - mean) / jnp.sqrt(var + _BN_EPS) * gamma + beta

    x = jnp.transpose(x_nchw, (0, 2, 3, 1)).astype(jnp.float32)   # NHWC
    h = jnp.einsum("nhwc,cd->nhwd", x, w1, precision=hp)
    h = jnp.maximum(bn(h, params["bn1"]), 0.0)
    h = lax.conv_general_dilated(
        h, w2.reshape(3, 3, cmid, cmid), window_strides=(1, 1), padding="SAME",
        dimension_numbers=("NHWC", "HWIO", "NHWC"), precision=hp)
    h = jnp.maximum(bn(h, params["bn2"]), 0.0)
    h = bn(jnp.einsum("nhwc,cd->nhwd", h, w3, precision=hp), params["bn3"])
    res = bn(jnp.einsum("nhwc,cd->nhwd", x, wd, precision=hp), params["bnd"])
    out = jnp.maximum(h + res, 0.0)
    return jnp.transpose(out, (0, 3, 1, 2))


if __name__ == "__main__":
    key = jax.random.PRNGKey(0)
    kx, kp = jax.random.split(key)

    # NeXtBlockC(cin=32, cout=64) defaults: cmid=None -> C=4, D=cout//8=8,
    # stride=1, downsample auto-created since cin != cout.
    N, cin, H, W = 2, 32, 16, 16
    cout = 64
    C, D = 4, cout // 8

    x = jax.random.normal(kx, (N, cin, H, W), jnp.float32)
    params = make_params(kp, cin, cout, C, D)

    out = jax.block_until_ready(next_block_c(x, params))
    ref = reference(x, params)

    assert out.shape == (N, cout, H, W), out.shape
    max_err = float(jnp.max(jnp.abs(out - ref)))
    scale = float(jnp.maximum(1.0, jnp.max(jnp.abs(ref))))
    # Tolerance sized for bf16 matmul operands with f32 accumulation; any
    # structural bug (tap order, weight layout, fusion) shows up as O(1) error.
    assert max_err <= 2.5e-2 * scale, (max_err, scale)

    print("KERNEL_OK")
</pallas_src>

<mosaic_0001>
module attributes {stable_mosaic.version = 11 : i64} {
  func.func @_next_block_kernel(%arg0: i32, %arg1: memref<2x16x16x32xbf16, #tpu.memory_space<vmem>>, %arg2: memref<32x32xbf16, #tpu.memory_space<vmem>>, %arg3: memref<1x32xf32, #tpu.memory_space<vmem>>, %arg4: memref<288x32xbf16, #tpu.memory_space<vmem>>, %arg5: memref<1x32xf32, #tpu.memory_space<vmem>>, %arg6: memref<64x64xbf16, #tpu.memory_space<vmem>>, %arg7: memref<1x64xf32, #tpu.memory_space<vmem>>, %arg8: memref<2x16x16x64xf32, #tpu.memory_space<vmem>>) attributes {dimension_semantics = [#tpu.dimension_semantics<parallel>], iteration_bounds = array<i64: 1>, scalar_prefetch = 0 : i64, scratch_operands = 0 : i64, tpu.core_type = #tpu.core_type<tc>, window_params = [{transform_indices = @transform_0, window_bounds = array<i64: 2, 16, 16, 32>}, {pipeline_mode = #tpu.pipeline_mode<synchronous>, transform_indices = @transform_1, window_bounds = array<i64: 32, 32>}, {pipeline_mode = #tpu.pipeline_mode<synchronous>, transform_indices = @transform_2, window_bounds = array<i64: 1, 32>}, {pipeline_mode = #tpu.pipeline_mode<synchronous>, transform_indices = @transform_3, window_bounds = array<i64: 288, 32>}, {pipeline_mode = #tpu.pipeline_mode<synchronous>, transform_indices = @transform_4, window_bounds = array<i64: 1, 32>}, {pipeline_mode = #tpu.pipeline_mode<synchronous>, transform_indices = @transform_5, window_bounds = array<i64: 64, 64>}, {pipeline_mode = #tpu.pipeline_mode<synchronous>, transform_indices = @transform_6, window_bounds = array<i64: 1, 64>}, {transform_indices = @transform_7, window_bounds = array<i64: 2, 16, 16, 64>}]} {
    %c0 = arith.constant 0 : index
    %c0_0 = arith.constant 0 : index
    %c0_1 = arith.constant 0 : index
    %c0_2 = arith.constant 0 : index
    %0 = vector.load %arg1[%c0, %c0_0, %c0_1, %c0_2] : memref<2x16x16x32xbf16, #tpu.memory_space<vmem>>, vector<2x16x16x32xbf16>
    %1 = vector.shape_cast %0 : vector<2x16x16x32xbf16> to vector<512x32xbf16>
    %c0_3 = arith.constant 0 : index
    %c0_4 = arith.constant 0 : index
    %2 = vector.load %arg2[%c0_3, %c0_4] : memref<32x32xbf16, #tpu.memory_space<vmem>>, vector<32x32xbf16>
    %cst = arith.constant dense<0.000000e+00> : vector<512x32xf32>
    %3 = tpu.matmul %1, %2, %cst {dimension_numbers = #tpu.dot_dimension_numbers<[1], [0], [0], [1], [0, 0, 1, 1], [], []>} : vector<512x32xbf16>, vector<32x32xbf16>, vector<512x32xf32> -> vector<512x32xf32>
    %c0_5 = arith.constant 0 : index
    %c0_6 = arith.constant 0 : index
    %4 = vector.load %arg3[%c0_5, %c0_6] : memref<1x32xf32, #tpu.memory_space<vmem>>, vector<1x32xf32>
    %5 = vector.broadcast %4 : vector<1x32xf32> to vector<512x32xf32>
    %6 = arith.addf %3, %5 : vector<512x32xf32>
    %cst_7 = arith.constant 0.000000e+00 : f32
    %7 = vector.broadcast %cst_7 : f32 to vector<512x32xf32>
    %8 = arith.maximumf %6, %7 : vector<512x32xf32>
    %9 = arith.truncf %8 : vector<512x32xf32> to vector<512x32xbf16>
    %10 = vector.shape_cast %9 : vector<512x32xbf16> to vector<2x16x16x32xbf16>
    %cst_8 = arith.constant 0.000000e+00 : bf16
    %11 = vector.broadcast %cst_8 : bf16 to vector<2x1x16x32xbf16>
    %12 = tpu.concatenate %11, %10, %11 in 1 : vector<2x1x16x32xbf16>, vector<2x16x16x32xbf16>, vector<2x1x16x32xbf16> -> vector<2x18x16x32xbf16>
    %cst_9 = arith.constant 0.000000e+00 : bf16
    %13 = vector.broadcast %cst_9 : bf16 to vector<2x18x1x32xbf16>
    %14 = tpu.concatenate %13, %12, %13 in 2 : vector<2x18x1x32xbf16>, vector<2x18x16x32xbf16>, vector<2x18x1x32xbf16> -> vector<2x18x18x32xbf16>
    %15 = vector.extract_strided_slice %14 {offsets = [0, 0, 0, 0], sizes = [2, 16, 16, 32], strides = [1, 1, 1, 1]} : vector<2x18x18x32xbf16> to vector<2x16x16x32xbf16>
    %16 = vector.shape_cast %15 : vector<2x16x16x32xbf16> to vector<512x32xbf16>
    %17 = vector.extract_strided_slice %14 {offsets = [0, 0, 1, 0], sizes = [2, 16, 16, 32], strides = [1, 1, 1, 1]} : vector<2x18x18x32xbf16> to vector<2x16x16x32xbf16>
    %18 = vector.shape_cast %17 : vector<2x16x16x32xbf16> to vector<512x32xbf16>
    %19 = vector.extract_strided_slice %14 {offsets = [0, 0, 2, 0], sizes = [2, 16, 16, 32], strides = [1, 1, 1, 1]} : vector<2x18x18x32xbf16> to vector<2x16x16x32xbf16>
    %20 = vector.shape_cast %19 : vector<2x16x16x32xbf16> to vector<512x32xbf16>
    %21 = vector.extract_strided_slice %14 {offsets = [0, 1, 0, 0], sizes = [2, 16, 16, 32], strides = [1, 1, 1, 1]} : vector<2x18x18x32xbf16> to vector<2x16x16x32xbf16>
    %22 = vector.shape_cast %21 : vector<2x16x16x32xbf16> to vector<512x32xbf16>
    %23 = vector.extract_strided_slice %14 {offsets = [0, 1, 1, 0], sizes = [2, 16, 16, 32], strides = [1, 1, 1, 1]} : vector<2x18x18x32xbf16> to vector<2x16x16x32xbf16>
    %24 = vector.shape_cast %23 : vector<2x16x16x32xbf16> to vector<512x32xbf16>
    %25 = vector.extract_strided_slice %14 {offsets = [0, 1, 2, 0], sizes = [2, 16, 16, 32], strides = [1, 1, 1, 1]} : vector<2x18x18x32xbf16> to vector<2x16x16x32xbf16>
    %26 = vector.shape_cast %25 : vector<2x16x16x32xbf16> to vector<512x32xbf16>
    %27 = vector.extract_strided_slice %14 {offsets = [0, 2, 0, 0], sizes = [2, 16, 16, 32], strides = [1, 1, 1, 1]} : vector<2x18x18x32xbf16> to vector<2x16x16x32xbf16>
    %28 = vector.shape_cast %27 : vector<2x16x16x32xbf16> to vector<512x32xbf16>
    %29 = vector.extract_strided_slice %14 {offsets = [0, 2, 1, 0], sizes = [2, 16, 16, 32], strides = [1, 1, 1, 1]} : vector<2x18x18x32xbf16> to vector<2x16x16x32xbf16>
    %30 = vector.shape_cast %29 : vector<2x16x16x32xbf16> to vector<512x32xbf16>
    %31 = vector.extract_strided_slice %14 {offsets = [0, 2, 2, 0], sizes = [2, 16, 16, 32], strides = [1, 1, 1, 1]} : vector<2x18x18x32xbf16> to vector<2x16x16x32xbf16>
    %32 = vector.shape_cast %31 : vector<2x16x16x32xbf16> to vector<512x32xbf16>
    %33 = tpu.concatenate %16, %18, %20, %22, %24, %26, %28, %30, %32 in 1 : vector<512x32xbf16>, vector<512x32xbf16>, vector<512x32xbf16>, vector<512x32xbf16>, vector<512x32xbf16>, vector<512x32xbf16>, vector<512x32xbf16>, vector<512x32xbf16>, vector<512x32xbf16> -> vector<512x288xbf16>
    %c0_10 = arith.constant 0 : index
    %c0_11 = arith.constant 0 : index
    %34 = vector.load %arg4[%c0_10, %c0_11] : memref<288x32xbf16, #tpu.memory_space<vmem>>, vector<288x32xbf16>
    %cst_12 = arith.constant dense<0.000000e+00> : vector<512x32xf32>
    %35 = tpu.matmul %33, %34, %cst_12 {dimension_numbers = #tpu.dot_dimension_numbers<[1], [0], [0], [1], [0, 0, 1, 1], [], []>} : vector<512x288xbf16>, vector<288x32xbf16>, vector<512x32xf32> -> vector<512x32xf32>
    %c0_13 = arith.constant 0 : index
    %c0_14 = arith.constant 0 : index
    %36 = vector.load %arg5[%c0_13, %c0_14] : memref<1x32xf32, #tpu.memory_space<vmem>>, vector<1x32xf32>
    %37 = vector.broadcast %36 : vector<1x32xf32> to vector<512x32xf32>
    %38 = arith.addf %35, %37 : vector<512x32xf32>
    %cst_15 = arith.constant 0.000000e+00 : f32
    %39 = vector.broadcast %cst_15 : f32 to vector<512x32xf32>
    %40 = arith.maximumf %38, %39 : vector<512x32xf32>
    %41 = arith.truncf %40 : vector<512x32xf32> to vector<512x32xbf16>
    %42 = tpu.concatenate %41, %1 in 1 : vector<512x32xbf16>, vector<512x32xbf16> -> vector<512x64xbf16>
    %c0_16 = arith.constant 0 : index
    %c0_17 = arith.constant 0 : index
    %43 = vector.load %arg6[%c0_16, %c0_17] : memref<64x64xbf16, #tpu.memory_space<vmem>>, vector<64x64xbf16>
    %cst_18 = arith.constant dense<0.000000e+00> : vector<512x64xf32>
    %44 = tpu.matmul %42, %43, %cst_18 {dimension_numbers = #tpu.dot_dimension_numbers<[1], [0], [0], [1], [0, 0, 1, 1], [], []>} : vector<512x64xbf16>, vector<64x64xbf16>, vector<512x64xf32> -> vector<512x64xf32>
    %c0_19 = arith.constant 0 : index
    %c0_20 = arith.constant 0 : index
    %45 = vector.load %arg7[%c0_19, %c0_20] : memref<1x64xf32, #tpu.memory_space<vmem>>, vector<1x64xf32>
    %46 = vector.broadcast %45 : vector<1x64xf32> to vector<512x64xf32>
    %47 = arith.addf %44, %46 : vector<512x64xf32>
    %cst_21 = arith.constant 0.000000e+00 : f32
    %48 = vector.broadcast %cst_21 : f32 to vector<512x64xf32>
    %49 = arith.maximumf %47, %48 : vector<512x64xf32>
    %50 = vector.shape_cast %49 : vector<512x64xf32> to vector<2x16x16x64xf32>
    %c0_22 = arith.constant 0 : index
    %c0_23 = arith.constant 0 : index
    %c0_24 = arith.constant 0 : index
    %c0_25 = arith.constant 0 : index
    %51 = vector.load %arg8[%c0_22, %c0_23, %c0_24, %c0_25] : memref<2x16x16x64xf32, #tpu.memory_space<vmem>>, vector<2x16x16x64xf32>
    tpu.vector_store %arg8[%c0_22, %c0_23, %c0_24, %c0_25], %50 {strides = array<i32>} : memref<2x16x16x64xf32, #tpu.memory_space<vmem>>, vector<2x16x16x64xf32>,
    return
  }
  func.func @transform_0(%arg0: i32) -> (i32, i32, i32, i32) {
    %c0_i32 = arith.constant 0 : i32
    %c0_i32_0 = arith.constant 0 : i32
    %c0_i32_1 = arith.constant 0 : i32
    %c0_i32_2 = arith.constant 0 : i32
    return %arg0, %c0_i32, %c0_i32_0, %c0_i32_1 : i32, i32, i32, i32
  }
  func.func @transform_1(%arg0: i32) -> (i32, i32) {
    %c0_i32 = arith.constant 0 : i32
    %c0_i32_0 = arith.constant 0 : i32
    %c0_i32_1 = arith.constant 0 : i32
    return %c0_i32, %c0_i32_0 : i32, i32
  }
  func.func @transform_2(%arg0: i32) -> (i32, i32) {
    %c0_i32 = arith.constant 0 : i32
    %c0_i32_0 = arith.constant 0 : i32
    %c0_i32_1 = arith.constant 0 : i32
    return %c0_i32, %c0_i32_0 : i32, i32
  }
  func.func @transform_3(%arg0: i32) -> (i32, i32) {
    %c0_i32 = arith.constant 0 : i32
    %c0_i32_0 = arith.constant 0 : i32
    %c0_i32_1 = arith.constant 0 : i32
    return %c0_i32, %c0_i32_0 : i32, i32
  }
  func.func @transform_4(%arg0: i32) -> (i32, i32) {
    %c0_i32 = arith.constant 0 : i32
    %c0_i32_0 = arith.constant 0 : i32
    %c0_i32_1 = arith.constant 0 : i32
    return %c0_i32, %c0_i32_0 : i32, i32
  }
  func.func @transform_5(%arg0: i32) -> (i32, i32) {
    %c0_i32 = arith.constant 0 : i32
    %c0_i32_0 = arith.constant 0 : i32
    %c0_i32_1 = arith.constant 0 : i32
    return %c0_i32, %c0_i32_0 : i32, i32
  }
  func.func @transform_6(%arg0: i32) -> (i32, i32) {
    %c0_i32 = arith.constant 0 : i32
    %c0_i32_0 = arith.constant 0 : i32
    %c0_i32_1 = arith.constant 0 : i32
    return %c0_i32, %c0_i32_0 : i32, i32
  }
  func.func @transform_7(%arg0: i32) -> (i32, i32, i32, i32) {
    %c0_i32 = arith.constant 0 : i32
    %c0_i32_0 = arith.constant 0 : i32
    %c0_i32_1 = arith.constant 0 : i32
    %c0_i32_2 = arith.constant 0 : i32
    return %arg0, %c0_i32, %c0_i32_0, %c0_i32_1 : i32, i32, i32, i32
  }
}

</mosaic_0001>

<bundles_post_ra>
// kernel: tpu_custom_call.1
= control target key start
LH: loop header
LB: loop body
LE: loop exit
PB: predicated region body
PF: predicated region fallthrough
CT: control target
= control target key end

     0   :  { %12 = vsyncpa [#allocation3], 0  ;;  %s7219_s0 = inlined_call_operand.hbm [shape: bf16[2,16,16,32], index: 0, kind: input, shape index: {}]   ;;  %s7220_s1 = inlined_call_operand.vmem [shape: bf16[32,32], index: 1, kind: input, shape index: {}]   ;;  %s7221_s2 = inlined_call_operand.vmem [shape: f32[1,32], index: 2, kind: input, shape index: {}]   ;;  %s7222_s3 = inlined_call_operand.vmem [shape: bf16[288,32], index: 3, kind: input, shape index: {}]   ;;  %s7223_s4 = inlined_call_operand.vmem [shape: f32[1,32], index: 4, kind: input, shape index: {}]   ;;  %s7224_s5 = inlined_call_operand.vmem [shape: bf16[64,64], index: 5, kind: input, shape index: {}]   ;;  %s7225_s6 = inlined_call_operand.vmem [shape: f32[1,64], index: 6, kind: input, shape index: {}]   ;;  %s7226_s7 = inlined_call_operand.hbm [shape: f32[2,16,16,64], index: 7, kind: output, shape index: {}]  }
   0x1   :  { %13 = vsyncpa [#allocation4], 0  ;;  %s4785_s24 = smov [#allocation2]   ;;  %s4737_s28 = scalar_lea.hbm %s7219_s0, 4096 }
   0x2   :  { %s19_s25 = sshll.u32 %s4785_s24, 4  ;;  %p4738_p0 = scmp.ne.s32.totalorder %s7219_s0, %s4737_s28  ;;  %s20_s25 = int_to_ptr.vmem [resolvable:$true] %s19_s25 }
   0x3   :  { %p4741_p1 = scmp.lt.u32.totalorder %s4737_s28, %s7219_s0 }
   0x5   :  { %p4743_p2 = pnand %p4741_p1, %p4738_p0 }
   0x7   :  { %4746 = shalt.err (!%p4743_p2)
}
   0x8   :  { %s4747_s10 = scalar_lea.vmem %s20_s25, 4096  ;;  %p4752_p4 = scmp.lt.s32.totalorder %s20_s25, %s20_s25 }
   0x9   :  { %p4748_p3 = scmp.ne.s32.totalorder %s20_s25, %s4747_s10  ;;  %p4753_p5 = scmp.lt.s32.totalorder %s4747_s10, %s4747_s10 }
   0xb   :  { %p4754_p6 = por %p4753_p5, %p4752_p4 }
   0xd   :  { %p4755_p7 = pnand %p4754_p6, %p4748_p3 }
   0xf   :  { %4758 = shalt.err (!%p4755_p7)
}
  0x10   :  { %s4786_s11 = smov 64   ;;  %s4787_s12 = smov 4  }
  0x11   :  { %25 = dma.hbm_to_vmem [thread:$0]  %s7219_s0, 4096, %s20_s25, [#allocation3], %s4786_s11, %s4786_s11, %s4787_s12  }
  0x12   :  { %4781 = dma.done.wait [#allocation3], 4096  }
  0x13   :  { %4782 = vsyncadd [#allocation3], 4294963200  ;;  %v4647_v0 = vld [vmem:[%s7220_s1] sm:$0xff]   ;;  %v4648_v1 = vld [vmem:[%s7220_s1 + $0x8] sm:$0xff]   ;;  %vm289_vm0 = vcmask 261120   ;;  %vm1068_vm1 = vcmask 1040384  }
  0x14   :  { %4426 = vmatprep.subr.bf16.mxu0 %v4647_v0  ;;  %4634 = vmatprep.subr.bf16.mxu1 %v4647_v0  ;;  %v4649_v2 = vld [vmem:[#allocation2] sm:$0xff]   ;;  %v4650_v4 = vld [vmem:[#allocation2 + $0x8] sm:$0xff]   ;;  %v4653_v6 = vld [vmem:[#allocation2 + $0x10] sm:$0xff]   ;;  %vm1069_vm2 = vsmask.f32 256  ;;  %v4788_v24 = vmov 0  }
  0x15   :  { %4427 = vmatpush3.bf16.msra.mxu0 %v4647_v0  ;;  %4636 = vmatpush3.bf16.msra.mxu1 %v4647_v0  ;;  %v4651_v3 = vld [vmem:[#allocation2 + $0x80] sm:$0xff]   ;;  %v4652_v5 = vld [vmem:[#allocation2 + $0x88] sm:$0xff]   ;;  %v4659_v7 = vld [vmem:[#allocation2 + $0x90] sm:$0xff]   ;;  %v774_v25 = vrot.slane %v4788_v24, 7  ;;  %vm1137_vm4 = vsmask.f32 7424 }
  0x16   :  { %4428 = vmatprep.subr.bf16.mxu0 %v4648_v1  ;;  %4635 = vmatprep.subr.bf16.mxu1 %v4648_v1  ;;  %v4654_v8 = vld [vmem:[#allocation2 + $0x18] sm:$0xff]   ;;  %v4655_v10 = vld [vmem:[#allocation2 + $0x20] sm:$0xff]   ;;  %v4656_v11 = vld [vmem:[#allocation2 + $0x28] sm:$0xff]   ;;  %vm1572_vm5 = vcmask 1046528   ;;  %s4789_s0 = smov 32   ;;  %s4790_s1 = smov 96  }
  0x17   :  { %4430 = vmatprep.mubr.msk.bf16.mxu0 %vm289_vm0, %v4649_v2  ;;  %4462 = vmatprep.mubr.msk.bf16.mxu1 %vm289_vm0, %v4651_v3  ;;  %v4660_v9 = vld [vmem:[#allocation2 + $0x98] sm:$0xff]   ;;  %v4657_v12 = vld [vmem:[#allocation2 + $0x30] sm:$0xff]   ;;  %v4669_v13 = vld [vmem:[#allocation2 + $0xa0] sm:$0xff]   ;;  %vm2138_vm6 = vcmask 523264   ;;  %vm2201_vm7 = vcmask 785408  }
  0x18   :  { %v4670_v14 = vld [vmem:[#allocation2 + $0xa8] sm:$0xff]   ;;  %v4658_v15 = vld [vmem:[#allocation2 + $0x38] sm:$0xff]   ;;  %v4661_v16 = vld [vmem:[#allocation2 + $0x40] sm:$0xff]  }
  0x19   :  { %4429 = vmatpush3.bf16.msra.mxu0 %v4648_v1  ;;  %4637 = vmatpush3.bf16.msra.mxu1 %v4648_v1  ;;  %v4662_v17 = vld [vmem:[#allocation2 + $0x48] sm:$0xff]   ;;  %v4663_v18 = vld [vmem:[#allocation2 + $0x50] sm:$0xff]   ;;  %v4664_v19 = vld [vmem:[#allocation2 + $0x58] sm:$0xff]  }
  0x1a   :  { %v4665_v20 = vld [vmem:[#allocation2 + $0x60] sm:$0xff]   ;;  %v4666_v21 = vld [vmem:[#allocation2 + $0x68] sm:$0xff]   ;;  %v4667_v22 = vld [vmem:[#allocation2 + $0x70] sm:$0xff]   ;;  %2796 = vmatprep.subr.bf16.mxu1 %v4788_v24 }
  0x1b   :  { %v4668_v23 = vld [vmem:[#allocation2 + $0x78] sm:$0xff]   ;;  %vm4878_vm3 = vmand %vm1068_vm1, %vm1069_vm2  ;;  %v4671_v39 = vld [vmem:[%s7222_s3 + $0x80] sm:$0xff]  }
  0x1c   :  { %4431 = vmatmul.mubr.msk.bf16.vlgmr.msra.gmra.mrb[0].mxu0 %vm289_vm0, %v4650_v4  ;;  %4463 = vmatmul.mubr.msk.bf16.vlgmr.msra.gmra.mrb[0].mxu1 %vm289_vm0, %v4652_v5  ;;  %v4884_v27 = vsel %vm4878_vm3, 0, %v774_v25  ;;  %v1104_v29 = vsel %vm4878_vm3, %v774_v25, 0  ;;  %v4672_v40 = vld [vmem:[#allocation2 + $0xb0] sm:$0xff]   ;;  %v4673_v41 = vld [vmem:[#allocation2 + $0xb8] sm:$0xff]   ;;  %v4674_v42 = vld [vmem:[%s7222_s3 + $0x88] sm:$0xff]  }
  0x1d   :  { %4434 = vmatprep.mubr.msk.bf16.mxu0 %vm289_vm0, %v4653_v6  ;;  %4466 = vmatprep.mubr.msk.bf16.mxu1 %vm289_vm0, %v4659_v7  ;;  %v1141_v28 = vshll.u32 %v4884_v27, 16  ;;  %v1139_v30 = vshrl.u32 %v4884_v27, 16  ;;  %v1146_v32 = vshll.u32 %v1104_v29, 16  ;;  %v1573_v35 = vrot.slane %v4884_v27, 1  ;;  %v4675_v43 = vld [vmem:[#allocation2 + $0xc0] sm:$0xff]   ;;  %v4676_v44 = vld [vmem:[#allocation2 + $0xc8] sm:$0xff]  }
  0x1e   :  { %1982 = vrot.lane.b32.xlu0 %v4884_v27, %s4786_s11  ;;  %v1574_v36 = vrot.slane %v1104_v29, 1  ;;  %4494 = vmatprep.subr.bf16.mxu0 %v4671_v39  ;;  %v4677_v45 = vld [vmem:[#allocation2 + $0xd0] sm:$0xff]   ;;  %v4678_v46 = vld [vmem:[#allocation2 + $0xd8] sm:$0xff]   ;;  %v4679_v47 = vld [vmem:[%s7222_s3] sm:$0xff]  }
  0x1f   :  { %v1143_v31 = vrot.slane %v1141_v28, 1  ;;  %v1148_v34 = vrot.slane %v1146_v32, 1  ;;  %4495 = vmatpush3.bf16.msra.mxu0 %v4671_v39  ;;  %2797 = vmatpush1.bf16.msra.mxu1 %v4679_v47  ;;  %v4680_v48 = vld [vmem:[%s7222_s3 + $0x8] sm:$0xff]   ;;  %v4681_v49 = vld [vmem:[#allocation2 + $0xe0] sm:$0xff]   ;;  %v4683_v51 = vld [vmem:[%s7222_s3 + $0x10] sm:$0xff]  }
  0x20   :  { %v4896_v38 = vsel %vm1572_vm5, %v1573_v35, %v1574_v36  ;;  %4496 = vmatprep.subr.bf16.mxu0 %v4674_v42  ;;  %2798 = vmatprep.subr.bf16.mxu1 %v4788_v24  ;;  %v4682_v50 = vld [vmem:[#allocation2 + $0xe8] sm:$0xff]   ;;  %v4684_v52 = vld [vmem:[%s7222_s3 + $0x18] sm:$0xff]   ;;  %v4685_v53 = vld [vmem:[%s7222_s3 + $0x20] sm:$0xff]  }
  0x21   :  { %v1144_v33 = vor.u32 %v1143_v31, %v1139_v30  ;;  %1762 = vrot.lane.b32.xlu1 %v4896_v38, %s4786_s11  ;;  %v4686_v54 = vld [vmem:[%s7222_s3 + $0x28] sm:$0xff]   ;;  %v4687_v55 = vld [vmem:[%s7222_s3 + $0x30] sm:$0xff]   ;;  %v4945_v56 = vld [vmem:[%s7221_s2] ss:$0 sm:$0xff] }
  0x22   :  { %v4688_v63 = vld [vmem:[%s7222_s3 + $0x38] sm:$0xff]   ;;  %v4689_v0 = vld [vmem:[#allocation2 + $0xf0] sm:$0xff]  }
  0x23   :  { %v1149_v37 = vsel %vm1137_vm4, %v1144_v33, %v1148_v34  ;;  %4497 = vmatpush3.bf16.msra.mxu0 %v4674_v42  ;;  %2799 = vmatpush1.bf16.msra.mxu1 %v4680_v48 }
  0x24   :  { %4435 = vmatmul.mubr.msk.bf16.gmra.mrb[4].mxu0 %vm289_vm0, %v4654_v8  ;;  %4467 = vmatmul.mubr.msk.bf16.gmra.mrb[4].mxu1 %vm289_vm0, %v4660_v9 }
  0x25   :  { %4438 = vmatprep.mubr.msk.bf16.mxu0 %vm289_vm0, %v4655_v10  ;;  %4470 = vmatprep.mubr.msk.bf16.mxu1 %vm289_vm0, %v4669_v13 }
  0x26   :  { %1700 = vrot.lane.b32.xlu0 %v1149_v37, %s4789_s0  ;;  %2800 = vmatprep.subr.bf16.mxu1 %v4788_v24 }
  0x27   :  { %2801 = vmatpush1.bf16.msra.mxu1 %v4683_v51 }
  0x28   :  { %2802 = vmatprep.subr.bf16.mxu1 %v4788_v24 }
  0x2a   :  { %2044 = vrot.lane.b32.xlu0 %v1149_v37, %s4790_s1 }
  0x2b   :  { %2803 = vmatpush1.bf16.msra.mxu1 %v4684_v52 }
  0x2c   :  { %4439 = vmatmul.mubr.msk.bf16.gmra.mrb[8].mxu0 %vm289_vm0, %v4656_v11  ;;  %4471 = vmatmul.mubr.msk.bf16.gmra.mrb[8].mxu1 %vm289_vm0, %v4670_v14 }
  0x2d   :  { %4442 = vmatprep.mubr.msk.bf16.mxu0 %vm289_vm0, %v4657_v12  ;;  %4474 = vmatprep.mubr.msk.bf16.mxu1 %vm289_vm0, %v4672_v40 }
  0x2e   :  { %2804 = vmatprep.subr.bf16.mxu1 %v4788_v24 }
  0x2f   :  { %2805 = vmatpush1.bf16.msra.mxu1 %v4685_v53 }
  0x30   :  { %2806 = vmatprep.subr.bf16.mxu1 %v4788_v24 }
  0x33   :  { %2807 = vmatpush1.bf16.msra.mxu1 %v4686_v54 }
  0x34   :  { %4443 = vmatmul.mubr.msk.bf16.gmra.mrb[12].mxu0 %vm289_vm0, %v4658_v15  ;;  %4475 = vmatmul.mubr.msk.bf16.gmra.mrb[12].mxu1 %vm289_vm0, %v4673_v41 }
  0x35   :  { %4446 = vmatprep.mubr.msk.bf16.mxu0 %vm289_vm0, %v4661_v16  ;;  %4478 = vmatprep.mubr.msk.bf16.mxu1 %vm289_vm0, %v4675_v43  ;;  %v4690_v16 = vld [vmem:[#allocation2 + $0xf8] sm:$0xff]  }
  0x36   :  { %2808 = vmatprep.subr.bf16.mxu1 %v4788_v24 }
  0x37   :  { %2809 = vmatpush1.bf16.msra.mxu1 %v4687_v55 }
  0x38   :  { %2810 = vmatprep.subr.bf16.mxu1 %v4788_v24 }
  0x3b   :  { %2811 = vmatpush1.bf16.msra.mxu1 %v4688_v63 }
  0x3c   :  { %4447 = vmatmul.mubr.msk.bf16.gmra.mrb[16].mxu0 %vm289_vm0, %v4662_v17  ;;  %4479 = vmatmul.mubr.msk.bf16.gmra.mrb[16].mxu1 %vm289_vm0, %v4676_v44  ;;  %v4691_v17 = vld [vmem:[%s7222_s3 + $0x40] sm:$0xff]  }
  0x3d   :  { %4450 = vmatprep.mubr.msk.bf16.mxu0 %vm289_vm0, %v4663_v18  ;;  %4482 = vmatprep.mubr.msk.bf16.mxu1 %vm289_vm0, %v4677_v45 }
  0x3e   :  { %2812 = vmatprep.subr.bf16.mxu1 %v4788_v24 }
  0x3f   :  { %2813 = vmatpush1.bf16.msra.mxu1 %v4691_v17 }
  0x40   :  { %2814 = vmatprep.subr.bf16.mxu1 %v4788_v24 }
  0x44   :  { %4451 = vmatmul.mubr.msk.bf16.gmra.mrb[20].mxu0 %vm289_vm0, %v4664_v19  ;;  %4483 = vmatmul.mubr.msk.bf16.gmra.mrb[20].mxu1 %vm289_vm0, %v4678_v46 }
  0x45   :  { %4454 = vmatprep.mubr.msk.bf16.mxu0 %vm289_vm0, %v4665_v20  ;;  %4486 = vmatprep.mubr.msk.bf16.mxu1 %vm289_vm0, %v4681_v49  ;;  %v4692_v49 = vld [vmem:[%s7222_s3 + $0x48] sm:$0xff]  }
  0x46   :  { %2815 = vmatpush1.bf16.msra.mxu1 %v4692_v49 }
  0x47   :  { %2816 = vmatprep.subr.bf16.mxu1 %v4788_v24 }
  0x4c   :  { %4455 = vmatmul.mubr.msk.bf16.gmra.mrb[24].mxu0 %vm289_vm0, %v4666_v21  ;;  %4487 = vmatmul.mubr.msk.bf16.gmra.mrb[24].mxu1 %vm289_vm0, %v4682_v50 }
  0x4d   :  { %4458 = vmatprep.mubr.msk.bf16.mxu0 %vm289_vm0, %v4667_v22  ;;  %4490 = vmatprep.mubr.msk.bf16.mxu1 %vm289_vm0, %v4689_v0 }
  0x54   :  { %4459 = vmatmul.mubr.msk.bf16.gmra.mrb[28].mxu0 %vm289_vm0, %v4668_v23  ;;  %4491 = vmatmul.mubr.msk.bf16.gmra.mrb[28].mxu1 %vm289_vm0, %v4690_v16 }
  0xef   :  { %v4432_v57 = vpop.f32.mrb[0].mxu0  ;;  %v4464_v58 = vpop.f32.mrb[0].mxu1 }
  0xf0   :  { %v429_v59 = vadd.f32 %v4432_v57, %v4945_v56  ;;  %v420_v60 = vpop.f32.mrb[1].mxu0  ;;  %v557_v61 = vadd.f32 %v4464_v58, %v4945_v56  ;;  %v548_v62 = vpop.f32.mrb[1].mxu1 }
  0xf1   :  { %v421_v1 = vadd.f32 %v4945_v56, %v420_v60  ;;  %v4433_v2 = vpop.f32.mrb[2].mxu0  ;;  %v549_v3 = vadd.f32 %v4945_v56, %v548_v62  ;;  %v4465_v4 = vpop.f32.mrb[2].mxu1 }
  0xf2   :  { %v709_v5 = vmax.f32 %v557_v61, 0.0  ;;  %v432_v6 = vadd.f32 %v4433_v2, %v4945_v56  ;;  %v423_v7 = vpop.f32.mrb[3].mxu0  ;;  %v560_v8 = vadd.f32 %v4465_v4, %v4945_v56  ;;  %v551_v9 = vpop.f32.mrb[3].mxu1  ;;  %v677_v13 = vmax.f32 %v429_v59, 0.0  ;;  %v4693_v59 = vld [vmem:[%s7222_s3 + $0x50] sm:$0xff]  }
  0xf3   :  { %v707_v10 = vmax.f32 %v549_v3, 0.0  ;;  %v424_v11 = vadd.f32 %v4945_v56, %v423_v7  ;;  %v552_v12 = vadd.f32 %v4945_v56, %v551_v9  ;;  %v675_v18 = vmax.f32 %v421_v1, 0.0  ;;  %2817 = vmatpush1.bf16.msra.mxu1 %v4693_v59 }
  0xf4   :  { %v678_v14 = vmax.f32 %v432_v6, 0.0  ;;  %v710_v15 = vmax.f32 %v560_v8, 0.0  ;;  %2818 = vmatprep.subr.bf16.mxu1 %v4788_v24 }
  0xf5   :  { %v676_v19 = vmax.f32 %v424_v11, 0.0  ;;  %v708_v20 = vmax.f32 %v552_v12, 0.0 }
  0xf6   :  { %v740_v21 = vpack.c.bf16 %v678_v14, %v677_v13  ;;  %v756_v22 = vpack.c.bf16 %v710_v15, %v709_v5  ;;  %v4694_v15 = vld [vmem:[%s7222_s3 + $0x58] sm:$0xff]  }
  0xf7   :  { %v739_v23 = vpack.c.bf16 %v676_v19, %v675_v18  ;;  %v755_v25 = vpack.c.bf16 %v708_v20, %v707_v10  ;;  %v4436_v28 = vpop.f32.mrb[4].mxu0  ;;  %v4965_v29 = vpop.f32.mrb[4].mxu1  ;;  %2819 = vmatpush1.bf16.msra.mxu1 %v4694_v15 }
  0xf8   :  { %v786_v30 = vshrl.u32 %v740_v21, 16  ;;  %v789_v31 = vshll.u32 %v740_v21, 16  ;;  %v898_v32 = vshrl.u32 %v756_v22, 16  ;;  %v901_v33 = vshll.u32 %v756_v22, 16  ;;  %v436_v34 = vpop.f32.mrb[5].mxu0  ;;  %v4967_v35 = vpop.f32.mrb[5].mxu1  ;;  %2820 = vmatprep.subr.bf16.mxu1 %v4788_v24 }
  0xf9   :  { %v779_v36 = vshrl.u32 %v739_v23, 16  ;;  %v782_v37 = vshll.u32 %v739_v23, 16  ;;  %v891_v39 = vshrl.u32 %v755_v25, 16  ;;  %v894_v40 = vshll.u32 %v755_v25, 16  ;;  %v4437_v41 = vpop.f32.mrb[6].mxu0  ;;  %v4970_v42 = vpop.f32.mrb[6].mxu1 }
  0xfa   :  { %v788_v43 = vrot.slane %v786_v30, 7  ;;  %v900_v44 = vrot.slane %v898_v32, 7  ;;  %v445_v45 = vadd.f32 %v4436_v28, %v4945_v56  ;;  %v437_v46 = vadd.f32 %v4945_v56, %v436_v34  ;;  %v439_v47 = vpop.f32.mrb[7].mxu0  ;;  %v4974_v48 = vpop.f32.mrb[7].mxu1 }
  0xfb   :  { %v781_v50 = vrot.slane %v779_v36, 7  ;;  %v4979_v51 = vrot.slane %v891_v39, 7  ;;  %v448_v52 = vadd.f32 %v4437_v41, %v4945_v56  ;;  %v440_v53 = vadd.f32 %v4945_v56, %v439_v47  ;;  %v4695_v41 = vld [vmem:[%s7222_s3 + $0x60] sm:$0xff]  }
  0xfc   :  { %v791_v54 = vor.u32 %v789_v31, %v788_v43  ;;  %v903_v55 = vor.u32 %v901_v33, %v900_v44  ;;  %v681_v57 = vmax.f32 %v445_v45, 0.0  ;;  %v679_v58 = vmax.f32 %v437_v46, 0.0  ;;  %2821 = vmatpush1.bf16.msra.mxu1 %v4695_v41 }
  0xfd   :  { %v784_v60 = vor.u32 %v782_v37, %v781_v50  ;;  %v682_v61 = vmax.f32 %v448_v52, 0.0  ;;  %v680_v62 = vmax.f32 %v440_v53, 0.0  ;;  %v896_v0 = vor.u32 %v894_v40, %v4979_v51  ;;  %2822 = vmatprep.subr.bf16.mxu1 %v4788_v24 }
  0xfe   :  { %v4989_v63 = vsel %vm4878_vm3, 0, %v903_v55  ;;  %v4994_v1 = vsel %vm4878_vm3, 0, %v791_v54  ;;  %v4998_v2 = vsel %vm4878_vm3, %v788_v43, 0  ;;  %v5008_v7 = vsel %vm4878_vm3, %v900_v44, 0 }
  0xff   :  { %7299 = vst [vmem:[#allocation8_spill] sm:$0xff] %v4989_v63  ;;  %7300 = vst [vmem:[#allocation9_spill] sm:$0xff] %v4994_v1  ;;  %v5002_v3 = vsel %vm4878_vm3, 0, %v784_v60  ;;  %v742_v4 = vpack.c.bf16 %v682_v61, %v681_v57  ;;  %v741_v5 = vpack.c.bf16 %v680_v62, %v679_v58  ;;  %1952 = vrot.lane.b32.xlu1 %v4994_v1, %s4786_s11  ;;  %v4440_v6 = vpop.f32.mrb[8].mxu0  ;;  %v5010_v8 = vpop.f32.mrb[8].mxu1  ;;  %v1579_v11 = vrot.slane %v4994_v1, 1 }
 0x100   :  { %7301 = vst [vmem:[#allocation10_spill] sm:$0xff] %v5002_v3  ;;  %v461_v9 = vadd.f32 %v4440_v6, %v4945_v56  ;;  %v452_v10 = vpop.f32.mrb[9].mxu0  ;;  %v1580_v12 = vrot.slane %v4998_v2, 1  ;;  %v1624_v13 = vrot.slane %v4989_v63, 1  ;;  %v5016_v14 = vpop.f32.mrb[9].mxu1  ;;  %v1625_v36 = vrot.slane %v5008_v7, 1 }
 0x101   :  { %v800_v16 = vshrl.u32 %v742_v4, 16  ;;  %v803_v17 = vshll.u32 %v742_v4, 16  ;;  %v793_v18 = vshrl.u32 %v741_v5, 16  ;;  %v796_v19 = vshll.u32 %v741_v5, 16  ;;  %v4441_v20 = vpop.f32.mrb[10].mxu0  ;;  %v5021_v21 = vpop.f32.mrb[10].mxu1 }
 0x102   :  { %v685_v22 = vmax.f32 %v461_v9, 0.0  ;;  %v453_v23 = vadd.f32 %v4945_v56, %v452_v10  ;;  %v464_v25 = vadd.f32 %v4441_v20, %v4945_v56  ;;  %v5027_v28 = vsel %vm1572_vm5, %v1579_v11, %v1580_v12  ;;  %v455_v30 = vpop.f32.mrb[11].mxu0  ;;  %v5029_v31 = vpop.f32.mrb[11].mxu1  ;;  %v4696_v11 = vld [vmem:[%s7222_s3 + $0x68] sm:$0xff]  }
 0x103   :  { %v802_v32 = vrot.slane %v800_v16, 7  ;;  %v795_v33 = vrot.slane %v793_v18, 7  ;;  %1890 = vrot.lane.b32.xlu0 %v5027_v28, %s4789_s0  ;;  %v456_v34 = vadd.f32 %v4945_v56, %v455_v30  ;;  %4498 = vmatprep.mubr.msk.bf16.mxu0 %vm289_vm0, %v5027_v28  ;;  %v5041_v40 = vsel %vm4878_vm3, %v781_v50, 0 }
 0x104   :  { %v683_v37 = vmax.f32 %v453_v23, 0.0  ;;  %v686_v39 = vmax.f32 %v464_v25, 0.0  ;;  %1826 = vrot.lane.b32.xlu1 %v4994_v1, %s4790_s1  ;;  %v5048_v43 = vsel %vm4878_vm3, 0, %v896_v0  ;;  %v5056_v50 = vsel %vm1572_vm5, %v1624_v13, %v1625_v36  ;;  %2823 = vmatpush1.bf16.msra.mxu1 %v4696_v11 }
 0x105   :  { %7302 = vst [vmem:[#allocation11_spill] sm:$0xff] %v5048_v43  ;;  %v805_v44 = vor.u32 %v803_v17, %v802_v32  ;;  %v798_v45 = vor.u32 %v796_v19, %v795_v33  ;;  %v5052_v46 = vsel %vm4878_vm3, %v795_v33, 0  ;;  %v684_v49 = vmax.f32 %v456_v34, 0.0  ;;  %2824 = vmatprep.subr.bf16.mxu1 %v4788_v24 }
 0x106   :  { %v744_v47 = vpack.c.bf16 %v686_v39, %v685_v22  ;;  %v1576_v52 = vrot.slane %v5002_v3, 1  ;;  %v5061_v53 = vsel %vm4878_vm3, %v802_v32, 0  ;;  %v1583_v55 = vrot.slane %v5052_v46, 1 }
 0x107   :  { %v5065_v54 = vsel %vm4878_vm3, 0, %v798_v45  ;;  %1922 = vrot.lane.b32.xlu0 %v5056_v50, %s4789_s0  ;;  %v4444_v57 = vpop.f32.mrb[12].mxu0  ;;  %v1577_v58 = vrot.slane %v5041_v40, 1  ;;  %v743_v61 = vpack.c.bf16 %v684_v49, %v683_v37  ;;  %v5076_v4 = vsel %vm4878_vm3, 0, %v805_v44  ;;  %v4697_v37 = vld [vmem:[%s7222_s3 + $0x70] sm:$0xff]  }
 0x108   :  { %v814_v59 = vshrl.u32 %v744_v47, 16  ;;  %v817_v60 = vshll.u32 %v744_v47, 16  ;;  %1984 = vrot.lane.b32.xlu1 %v4989_v63, %s4786_s11  ;;  %v477_v62 = vadd.f32 %v4444_v57, %v4945_v56  ;;  %v468_v0 = vpop.f32.mrb[13].mxu0  ;;  %7303 = vst [vmem:[#allocation12_spill] sm:$0xff] %v5076_v4  ;;  %v573_v9 = vadd.f32 %v4965_v29, %v4945_v56  ;;  %2825 = vmatpush1.bf16.msra.mxu1 %v4697_v37 }
 0x109   :  { %v469_v5 = vadd.f32 %v4945_v56, %v468_v0  ;;  %v4445_v6 = vpop.f32.mrb[14].mxu0  ;;  %v1582_v10 = vrot.slane %v5065_v54, 1  ;;  %v807_v13 = vshrl.u32 %v743_v61, 16  ;;  %v5087_v17 = vsel %vm1572_vm5, %v1576_v52, %v1577_v58  ;;  %2826 = vmatprep.subr.bf16.mxu1 %v4788_v24 }
 0x10a   :  { %v816_v12 = vrot.slane %v814_v59, 7  ;;  %v689_v15 = vmax.f32 %v477_v62, 0.0  ;;  %v471_v16 = vpop.f32.mrb[15].mxu0  ;;  %v480_v19 = vadd.f32 %v4445_v6, %v4945_v56  ;;  %v810_v25 = vshll.u32 %v743_v61, 16  ;;  %v4698_v6 = vld [vmem:[%s7222_s3 + $0x78] sm:$0xff]  }
 0x10b   :  { %v687_v18 = vmax.f32 %v469_v5, 0.0  ;;  %v472_v29 = vadd.f32 %v4945_v56, %v471_v16  ;;  %1888 = vrot.lane.b32.xlu0 %v5087_v17, %s4789_s0  ;;  %v5094_v20 = vsel %vm1572_vm5, %v1582_v10, %v1583_v55  ;;  %v809_v23 = vrot.slane %v807_v13, 7 }
 0x10c   :  { %v819_v22 = vor.u32 %v817_v60, %v816_v12  ;;  %1858 = vrot.lane.b32.xlu1 %v4989_v63, %s4790_s1  ;;  %4499 = vmatmul.mubr.msk.bf16.vlgmr.msra.gmra.mrb[32].mxu0 %vm289_vm0, %v5094_v20  ;;  %v565_v30 = vadd.f32 %v4945_v56, %v4967_v35  ;;  %v690_v32 = vmax.f32 %v480_v19, 0.0  ;;  %v576_v34 = vadd.f32 %v4970_v42, %v4945_v56 }
 0x10d   :  { %v688_v33 = vmax.f32 %v472_v29, 0.0  ;;  %v568_v36 = vadd.f32 %v4945_v56, %v4974_v48  ;;  %v5115_v35 = vsel %vm4878_vm3, %v816_v12, 0  ;;  %v713_v41 = vmax.f32 %v573_v9, 0.0  ;;  %2827 = vmatpush1.bf16.msra.mxu1 %v4698_v6 }
 0x10e   :  { %v5111_v39 = vsel %vm4878_vm3, 0, %v819_v22  ;;  %v711_v44 = vmax.f32 %v565_v30, 0.0  ;;  %v746_v42 = vpack.c.bf16 %v690_v32, %v689_v15  ;;  %v714_v48 = vmax.f32 %v576_v34, 0.0 }
 0x10f   :  { %v745_v45 = vpack.c.bf16 %v688_v33, %v687_v18  ;;  %v712_v47 = vmax.f32 %v568_v36, 0.0  ;;  %v4448_v49 = vpop.f32.mrb[16].mxu0  ;;  %v812_v52 = vor.u32 %v810_v25, %v809_v23  ;;  %v5120_v55 = vsel %vm4878_vm3, %v809_v23, 0 }
 0x110   :  { %v5125_v57 = vsel %vm4878_vm3, %v4979_v51, 0  ;;  %v493_v58 = vadd.f32 %v4448_v49, %v4945_v56  ;;  %1824 = vrot.lane.b32.xlu1 %v5002_v3, %s4790_s1  ;;  %v484_v59 = vpop.f32.mrb[17].mxu0  ;;  %v828_v60 = vshrl.u32 %v746_v42, 16  ;;  %v831_v61 = vshll.u32 %v746_v42, 16 }
 0x111   :  { %v821_v62 = vshrl.u32 %v745_v45, 16  ;;  %v824_v0 = vshll.u32 %v745_v45, 16  ;;  %v4449_v5 = vpop.f32.mrb[18].mxu0  ;;  %v5133_v9 = vpack.c.bf16 %v714_v48, %v713_v41  ;;  %v5135_v51 = vpack.c.bf16 %v712_v47, %v711_v44 }
 0x112   :  { %v1621_v10 = vrot.slane %v5048_v43, 1  ;;  %v1622_v11 = vrot.slane %v5125_v57, 1  ;;  %v487_v12 = vpop.f32.mrb[19].mxu0  ;;  %v830_v13 = vrot.slane %v828_v60, 7  ;;  %v485_v16 = vadd.f32 %v4945_v56, %v484_v59 }
 0x113   :  { %v823_v15 = vrot.slane %v821_v62, 7  ;;  %v496_v18 = vadd.f32 %v4449_v5, %v4945_v56  ;;  %v5144_v19 = vsel %vm4878_vm3, 0, %v812_v52  ;;  %v912_v29 = vshrl.u32 %v5133_v9, 16 }
 0x114   :  { %v905_v22 = vshrl.u32 %v5135_v51, 16  ;;  %v693_v23 = vmax.f32 %v493_v58, 0.0  ;;  %1856 = vrot.lane.b32.xlu1 %v5048_v43, %s4790_s1  ;;  %v833_v25 = vor.u32 %v831_v61, %v830_v13  ;;  %v915_v30 = vshll.u32 %v5133_v9, 16 }
 0x115   :  { %v826_v24 = vor.u32 %v824_v0, %v823_v15  ;;  %v908_v32 = vshll.u32 %v5135_v51, 16  ;;  %v5154_v33 = vsel %vm4878_vm3, %v830_v13, 0  ;;  %v5158_v34 = vsel %vm4878_vm3, %v823_v15, 0 }
 0x116   :  { %v5160_v36 = vrot.slane %v912_v29, 7  ;;  %v5163_v37 = vsel %vm1572_vm5, %v1621_v10, %v1622_v11  ;;  %v5165_v41 = vrot.slane %v905_v22, 7  ;;  %v691_v44 = vmax.f32 %v485_v16, 0.0 }
 0x117   :  { %1920 = vrot.lane.b32.xlu0 %v5163_v37, %s4789_s0  ;;  %v694_v42 = vmax.f32 %v496_v18, 0.0  ;;  %v488_v45 = vadd.f32 %v4945_v56, %v487_v12  ;;  %v4452_v48 = vpop.f32.mrb[20].mxu0  ;;  %v5172_v47 = vsel %vm4878_vm3, 0, %v833_v25  ;;  %v5176_v49 = vsel %vm4878_vm3, 0, %v826_v24 }
 0x118   :  { %7304 = vst [vmem:[#allocation13_spill] sm:$0xff] %v5172_v47  ;;  %7305 = vst [vmem:[#allocation14_spill] sm:$0xff] %v5176_v49  ;;  %v1585_v52 = vrot.slane %v5076_v4, 1  ;;  %v1586_v58 = vrot.slane %v5061_v53, 1  ;;  %1766 = vrot.lane.b32.xlu1 %v5027_v28, %s4786_s11  ;;  %v500_v59 = vpop.f32.mrb[21].mxu0  ;;  %v1163_v62 = vshrl.u32 %v4994_v1, 16 }
 0x119   :  { %v748_v60 = vpack.c.bf16 %v694_v42, %v693_v23  ;;  %v692_v61 = vmax.f32 %v488_v45, 0.0  ;;  %v1165_v0 = vshll.u32 %v4994_v1, 16  ;;  %v4453_v5 = vpop.f32.mrb[22].mxu0  ;;  %v1170_v9 = vshll.u32 %v4998_v2, 16 }
 0x11a   :  { %v5185_v6 = vsel %vm1572_vm5, %v1585_v52, %v1586_v58  ;;  %v1588_v51 = vrot.slane %v5144_v19, 1  ;;  %v1589_v10 = vrot.slane %v5120_v55, 1  ;;  %v503_v11 = vpop.f32.mrb[23].mxu0  ;;  %v1343_v29 = vshrl.u32 %v4989_v63, 16 }
 0x11b   :  { %v842_v12 = vshrl.u32 %v748_v60, 16  ;;  %v845_v28 = vshll.u32 %v748_v60, 16  ;;  %v747_v13 = vpack.c.bf16 %v692_v61, %v691_v44  ;;  %4502 = vmatprep.mubr.msk.bf16.mxu0 %vm289_vm0, %v5185_v6  ;;  %v1167_v15 = vrot.slane %v1165_v0, 1 }
 0x11c   :  { %v1172_v16 = vrot.slane %v1170_v9, 1  ;;  %v5193_v18 = vsel %vm1572_vm5, %v1588_v51, %v1589_v10  ;;  %v1345_v2 = vshll.u32 %v4989_v63, 16  ;;  %1796 = vrot.lane.b32.xlu1 %v5056_v50, %s4786_s11  ;;  %v1350_v42 = vshll.u32 %v5008_v7, 16 }
 0x11d   :  { %v844_v22 = vrot.slane %v842_v12, 7  ;;  %v835_v23 = vshrl.u32 %v747_v13, 16  ;;  %v838_v25 = vshll.u32 %v747_v13, 16  ;;  %v1168_v24 = vor.u32 %v1167_v15, %v1163_v62  ;;  %4503 = vmatmul.mubr.msk.bf16.gmra.mrb[36].mxu0 %vm289_vm0, %v5193_v18 }
 0x11e   :  { %v1347_v44 = vrot.slane %v1345_v2, 1  ;;  %v509_v45 = vadd.f32 %v4452_v48, %v4945_v56  ;;  %v501_v52 = vadd.f32 %v4945_v56, %v500_v59  ;;  %v5205_v58 = vor.u32 %v915_v30, %v5160_v36 }
 0x11f   :  { %v5208_v60 = vor.u32 %v908_v32, %v5165_v41  ;;  %v837_v61 = vrot.slane %v835_v23, 7  ;;  %v5211_v0 = vsel %vm1137_vm4, %v1168_v24, %v1172_v16  ;;  %v4456_v62 = vpop.f32.mrb[24].mxu0  ;;  %v847_v9 = vor.u32 %v845_v28, %v844_v22 }
 0x120   :  { %7306 = vst [vmem:[#allocation15_spill] sm:$0xff] %v5211_v0  ;;  %v5215_v51 = vsel %vm4878_vm3, %v844_v22, 0  ;;  %2014 = vrot.lane.b32.xlu0 %v5211_v0, %s4790_s1  ;;  %v1348_v7 = vor.u32 %v1347_v44, %v1343_v29  ;;  %v1352_v48 = vrot.slane %v1350_v42, 1  ;;  %1764 = vrot.lane.b32.xlu1 %v5087_v17, %s4786_s11  ;;  %v516_v30 = vpop.f32.mrb[25].mxu0  ;;  %v697_v59 = vmax.f32 %v509_v45, 0.0 }
 0x121   :  { %v840_v32 = vor.u32 %v838_v25, %v837_v61  ;;  %v695_v10 = vmax.f32 %v501_v52, 0.0  ;;  %v512_v12 = vadd.f32 %v4453_v5, %v4945_v56  ;;  %v4457_v13 = vpop.f32.mrb[26].mxu0  ;;  %v5224_v28 = vsel %vm4878_vm3, %v837_v61, 0 }
 0x122   :  { %v504_v15 = vadd.f32 %v4945_v56, %v503_v11  ;;  %v1591_v16 = vrot.slane %v5111_v39, 1  ;;  %v1592_v29 = vrot.slane %v5115_v35, 1  ;;  %v519_v2 = vpop.f32.mrb[27].mxu0  ;;  %v5230_v17 = vsel %vm1137_vm4, %v1348_v7, %v1352_v48 }
 0x123   :  { %7307 = vst [vmem:[#allocation16_spill] sm:$0xff] %v5230_v17  ;;  %v698_v22 = vmax.f32 %v512_v12, 0.0  ;;  %v1594_v23 = vrot.slane %v5176_v49, 1  ;;  %v1595_v5 = vrot.slane %v5158_v34, 1  ;;  %v5236_v25 = vsel %vm4878_vm3, 0, %v840_v32 }
 0x124   :  { %7308 = vst [vmem:[#allocation17_spill] sm:$0xff] %v5236_v25  ;;  %2046 = vrot.lane.b32.xlu0 %v5230_v17, %s4790_s1  ;;  %v696_v11 = vmax.f32 %v504_v15, 0.0  ;;  %v5241_v24 = vsel %vm1572_vm5, %v1591_v16, %v1592_v29  ;;  %v525_v44 = vadd.f32 %v4456_v62, %v4945_v56  ;;  %1794 = vrot.lane.b32.xlu1 %v5163_v37, %s4786_s11  ;;  %v1597_v37 = vrot.slane %v5172_v47, 1 }
 0x125   :  { %v750_v42 = vpack.c.bf16 %v698_v22, %v697_v59  ;;  %4506 = vmatprep.mubr.msk.bf16.mxu0 %vm289_vm0, %v5241_v24  ;;  %v5249_v45 = vsel %vm1572_vm5, %v1594_v23, %v1595_v5  ;;  %v517_v52 = vadd.f32 %v4945_v56, %v516_v30  ;;  %v528_v61 = vadd.f32 %v4457_v13, %v4945_v56 }
 0x126   :  { %v749_v7 = vpack.c.bf16 %v696_v11, %v695_v10  ;;  %4507 = vmatmul.mubr.msk.bf16.gmra.mrb[40].mxu0 %vm289_vm0, %v5249_v45  ;;  %v701_v48 = vmax.f32 %v525_v44, 0.0  ;;  %v520_v62 = vadd.f32 %v4945_v56, %v519_v2  ;;  %v1598_v10 = vrot.slane %v5154_v33, 1 }
 0x127   :  { %v856_v32 = vshrl.u32 %v750_v42, 16  ;;  %v859_v59 = vshll.u32 %v750_v42, 16  ;;  %v699_v12 = vmax.f32 %v517_v52, 0.0  ;;  %v702_v15 = vmax.f32 %v528_v61, 0.0  ;;  %v4460_v16 = vpop.f32.mrb[28].mxu0 }
 0x128   :  { %v849_v29 = vshrl.u32 %v749_v7, 16  ;;  %v852_v22 = vshll.u32 %v749_v7, 16  ;;  %1956 = vrot.lane.b32.xlu0 %v5076_v4, %s4786_s11  ;;  %v700_v30 = vmax.f32 %v520_v62, 0.0  ;;  %1704 = vrot.lane.b32.xlu1 %v5211_v0, %s4789_s0  ;;  %v532_v13 = vpop.f32.mrb[29].mxu0  ;;  %v1600_v5 = vrot.slane %v5236_v25, 1 }
 0x129   :  { %v858_v2 = vrot.slane %v856_v32, 7  ;;  %v752_v23 = vpack.c.bf16 %v702_v15, %v701_v48  ;;  %v1601_v11 = vrot.slane %v5224_v28, 1  ;;  %v4461_v44 = vpop.f32.mrb[30].mxu0  ;;  %v5266_v42 = vsel %vm4878_vm3, 0, %v847_v9 }
 0x12a   :  { %7309 = vst [vmem:[#allocation18_spill] sm:$0xff] %v5266_v42  ;;  %v851_v52 = vrot.slane %v849_v29, 7  ;;  %v751_v61 = vpack.c.bf16 %v700_v30, %v699_v12  ;;  %v5269_v7 = vsel %vm1572_vm5, %v1597_v37, %v1598_v10  ;;  %v535_v62 = vpop.f32.mrb[31].mxu0  ;;  %v5274_v48 = vsel %vm4878_vm3, 0, %v5205_v58 }
 0x12b   :  { %v861_v63 = vor.u32 %v859_v59, %v858_v2  ;;  %v870_v32 = vshrl.u32 %v752_v23, 16  ;;  %4510 = vmatprep.mubr.msk.bf16.mxu0 %vm289_vm0, %v5269_v7  ;;  %v5281_v9 = vsel %vm4878_vm3, 0, %v5208_v60  ;;  %v873_v37 = vshll.u32 %v752_v23, 16 }
 0x12c   :  { %7310 = vst [vmem:[#allocation19_spill] sm:$0xff] %v5281_v9  ;;  %v854_v12 = vor.u32 %v852_v22, %v851_v52  ;;  %1988 = vrot.lane.b32.xlu0 %v5274_v48, %s4786_s11  ;;  %v863_v59 = vshrl.u32 %v751_v61, 16  ;;  %v866_v15 = vshll.u32 %v751_v61, 16  ;;  %1734 = vrot.lane.b32.xlu1 %v5230_v17, %s4789_s0  ;;  %v5289_v58 = vsel %vm4878_vm3, %v858_v2, 0 }
 0x12d   :  { %7311 = vst [vmem:[#allocation20_spill] sm:$0xff] %v5289_v58  ;;  %v872_v29 = vrot.slane %v870_v32, 7  ;;  %v5292_v30 = vsel %vm1572_vm5, %v1600_v5, %v1601_v11  ;;  %v541_v60 = vadd.f32 %v4460_v16, %v4945_v56  ;;  %v5297_v22 = vsel %vm4878_vm3, %v851_v52, 0 }
 0x12e   :  { %7312 = vst [vmem:[#allocation21_spill] sm:$0xff] %v5297_v22  ;;  %v865_v10 = vrot.slane %v863_v59, 7  ;;  %4511 = vmatmul.mubr.msk.bf16.gmra.mrb[44].mxu0 %vm289_vm0, %v5292_v30  ;;  %v533_v23 = vadd.f32 %v4945_v56, %v532_v13  ;;  %v544_v61 = vadd.f32 %v4461_v44, %v4945_v56  ;;  %v5305_v2 = vsel %vm4878_vm3, 0, %v861_v63 }
 0x12f   :  { %7313 = vst [vmem:[#allocation22_spill] sm:$0xff] %v5305_v2  ;;  %v5309_v5 = vsel %vm4878_vm3, 0, %v854_v12  ;;  %v705_v16 = vmax.f32 %v541_v60, 0.0  ;;  %v536_v11 = vadd.f32 %v4945_v56, %v535_v62  ;;  %v875_v52 = vor.u32 %v873_v37, %v872_v29 }
 0x130   :  { %7314 = vst [vmem:[#allocation23_spill] sm:$0xff] %v5309_v5  ;;  %v868_v32 = vor.u32 %v866_v15, %v865_v10  ;;  %1954 = vrot.lane.b32.xlu0 %v5065_v54, %s4786_s11  ;;  %v703_v59 = vmax.f32 %v533_v23, 0.0  ;;  %v706_v13 = vmax.f32 %v544_v61, 0.0  ;;  %v5316_v44 = vsel %vm4878_vm3, %v872_v29, 0 }
 0x131   :  { %v704_v63 = vmax.f32 %v536_v11, 0.0  ;;  %v1603_v17 = vrot.slane %v5266_v42, 1  ;;  %v1604_v12 = vrot.slane %v5215_v51, 1  ;;  %v1606_v37 = vrot.slane %v5309_v5, 1 }
 0x132   :  { %v5322_v60 = vsel %vm4878_vm3, 0, %v868_v32  ;;  %v754_v62 = vpack.c.bf16 %v706_v13, %v705_v16  ;;  %v1607_v15 = vrot.slane %v5297_v22, 1  ;;  %v5332_v29 = vsel %vm4878_vm3, %v5160_v36, 0 }
 0x133   :  { %7315 = vst [vmem:[#allocation24_spill] sm:$0xff] %v5322_v60  ;;  %v753_v23 = vpack.c.bf16 %v704_v63, %v703_v59  ;;  %v5327_v61 = vsel %vm1572_vm5, %v1603_v17, %v1604_v12  ;;  %v1630_v11 = vrot.slane %v5274_v48, 1  ;;  %v1631_v17 = vrot.slane %v5332_v29, 1 }
 0x134   :  { %1986 = vrot.lane.b32.xlu0 %v5281_v9, %s4786_s11  ;;  %v884_v32 = vshrl.u32 %v754_v62, 16  ;;  %v887_v16 = vshll.u32 %v754_v62, 16  ;;  %4514 = vmatprep.mubr.msk.bf16.mxu0 %vm289_vm0, %v5327_v61  ;;  %v5340_v59 = vsel %vm1572_vm5, %v1606_v37, %v1607_v15  ;;  %v5345_v13 = vsel %vm4878_vm3, %v865_v10, 0 }
 0x135   :  { %7316 = vst [vmem:[#allocation25_spill] sm:$0xff] %v5340_v59  ;;  %7317 = vst [vmem:[#allocation26_spill] sm:$0xff] %v5345_v13  ;;  %v877_v36 = vshrl.u32 %v753_v23, 16  ;;  %v880_v63 = vshll.u32 %v753_v23, 16  ;;  %v1153_v12 = vshll.u32 %v5002_v3, 16  ;;  %v1151_v62 = vshrl.u32 %v5002_v3, 16 }
 0x136   :  { %v886_v1 = vrot.slane %v884_v32, 7  ;;  %4515 = vmatmul.mubr.msk.bf16.gmra.mrb[48].mxu0 %vm289_vm0, %v5340_v59  ;;  %v1158_v0 = vshll.u32 %v5041_v40, 16  ;;  %v1609_v37 = vrot.slane %v5305_v2, 1  ;;  %v1610_v5 = vrot.slane %v5289_v58, 1 }
 0x137   :  { %v879_v15 = vrot.slane %v877_v36, 7  ;;  %v1155_v22 = vrot.slane %v1153_v12, 1  ;;  %v1612_v10 = vrot.slane %v5322_v60, 1  ;;  %v5357_v23 = vsel %vm4878_vm3, 0, %v875_v52 }
 0x138   :  { %7318 = vst [vmem:[#allocation27_spill] sm:$0xff] %v5357_v23  ;;  %v889_v32 = vor.u32 %v887_v16, %v886_v1  ;;  %1894 = vrot.lane.b32.xlu0 %v5185_v6, %s4789_s0  ;;  %v5362_v3 = vsel %vm1572_vm5, %v1630_v11, %v1631_v17  ;;  %v1613_v40 = vrot.slane %v5345_v13, 1  ;;  %v1160_v12 = vrot.slane %v1158_v0, 1 }
 0x139   :  { %v882_v59 = vor.u32 %v880_v63, %v879_v15  ;;  %v1156_v36 = vor.u32 %v1155_v22, %v1151_v62  ;;  %v5366_v58 = vsel %vm1572_vm5, %v1609_v37, %v1610_v5  ;;  %v5370_v60 = vsel %vm4878_vm3, %v879_v15, 0 }
 0x13a   :  { %7319 = vst [vmem:[#allocation28_spill] sm:$0xff] %v5370_v60  ;;  %4518 = vmatprep.mubr.msk.bf16.mxu0 %vm289_vm0, %v5366_v58  ;;  %v5375_v52 = vsel %vm1572_vm5, %v1612_v10, %v1613_v40  ;;  %v5380_v11 = vsel %vm4878_vm3, %v5165_v41, 0  ;;  %v1627_v0 = vrot.slane %v5281_v9, 1  ;;  %v1331_v17 = vshrl.u32 %v5048_v43, 16 }
 0x13b   :  { %7320 = vst [vmem:[#allocation29_spill] sm:$0xff] %v5375_v52  ;;  %v5385_v22 = vsel %vm4878_vm3, 0, %v882_v59  ;;  %v5388_v5 = vsel %vm1137_vm4, %v1156_v36, %v1160_v12  ;;  %v1628_v16 = vrot.slane %v5380_v11, 1  ;;  %v1333_v41 = vshll.u32 %v5048_v43, 16 }
 0x13c   :  { %7321 = vst [vmem:[#allocation30_spill] sm:$0xff] %v5385_v22  ;;  %1926 = vrot.lane.b32.xlu0 %v5362_v3, %s4789_s0  ;;  %1702 = vrot.lane.b32.xlu1 %v5388_v5, %s4789_s0  ;;  %v1338_v63 = vshll.u32 %v5125_v57, 16  ;;  %v1615_v59 = vrot.slane %v5357_v23, 1  ;;  %v1616_v62 = vrot.slane %v5316_v44, 1  ;;  %v5402_v37 = vsel %vm4878_vm3, %v886_v1, 0 }
 0x13d   :  { %v1187_v15 = vshrl.u32 %v5076_v4, 16  ;;  %v1189_v10 = vshll.u32 %v5076_v4, 16  ;;  %v1194_v40 = vshll.u32 %v5061_v53, 16  ;;  %v5409_v36 = vsel %vm4878_vm3, 0, %v889_v32 }
 0x13e   :  { %4519 = vmatmul.mubr.msk.bf16.gmra.mrb[52].mxu0 %vm289_vm0, %v5375_v52  ;;  %v1335_v57 = vrot.slane %v1333_v41, 1  ;;  %v5414_v12 = vsel %vm1572_vm5, %v1615_v59, %v1616_v62  ;;  %v1618_v1 = vrot.slane %v5385_v22, 1  ;;  %v1340_v43 = vrot.slane %v1338_v63, 1 }
 0x13f   :  { %7322 = vst [vmem:[#allocation31_spill] sm:$0xff] %v5414_v12  ;;  %4522 = vmatprep.mubr.msk.bf16.mxu0 %vm289_vm0, %v5414_v12  ;;  %v1191_v13 = vrot.slane %v1189_v10, 1  ;;  %v1619_v53 = vrot.slane %v5370_v60, 1  ;;  %v589_v32 = vadd.f32 %v5010_v8, %v4945_v56  ;;  %v5427_v41 = vsel %vm1572_vm5, %v1627_v0, %v1628_v16 }
 0x140   :  { %1892 = vrot.lane.b32.xlu0 %v5094_v20, %s4789_s0  ;;  %1830 = vrot.lane.b32.xlu1 %v5076_v4, %s4790_s1  ;;  %v1336_v59 = vor.u32 %v1335_v57, %v1331_v17  ;;  %v1196_v63 = vrot.slane %v1194_v40, 1  ;;  %v1369_v62 = vshll.u32 %v5274_v48, 16  ;;  %v1367_v10 = vshrl.u32 %v5274_v48, 16 }
 0x141   :  { %v1192_v22 = vor.u32 %v1191_v13, %v1187_v15  ;;  %v1374_v60 = vshll.u32 %v5332_v29, 16  ;;  %v581_v8 = vadd.f32 %v4945_v56, %v5016_v14  ;;  %v5435_v52 = vsel %vm1572_vm5, %v1618_v1, %v1619_v53 }
 0x142   :  { %v717_v12 = vmax.f32 %v589_v32, 0.0  ;;  %v1371_v4 = vrot.slane %v1369_v62, 1  ;;  %v592_v0 = vadd.f32 %v5021_v21, %v4945_v56  ;;  %v5440_v16 = vsel %vm1137_vm4, %v1336_v59, %v1340_v43 }
 0x143   :  { %7323 = vst [vmem:[#allocation32_spill] sm:$0xff] %v5440_v16  ;;  %v715_v17 = vmax.f32 %v581_v8, 0.0  ;;  %v584_v13 = vadd.f32 %v4945_v56, %v5029_v31  ;;  %v1694_v29 = vrot.slane %v5409_v36, 1  ;;  %v1695_v15 = vrot.slane %v5402_v37, 1 }
 0x144   :  { %1924 = vrot.lane.b32.xlu0 %v5427_v41, %s4789_s0  ;;  %1732 = vrot.lane.b32.xlu1 %v5440_v16, %s4789_s0  ;;  %v718_v14 = vmax.f32 %v592_v0, 0.0  ;;  %v1376_v40 = vrot.slane %v1374_v60, 1  ;;  %v1177_v43 = vshll.u32 %v5065_v54, 16  ;;  %v5452_v57 = vsel %vm1137_vm4, %v1192_v22, %v1196_v63 }
 0x145   :  { %v716_v21 = vmax.f32 %v584_v13, 0.0  ;;  %v1372_v56 = vor.u32 %v1371_v4, %v1367_v10  ;;  %v5457_v1 = vsel %vm1572_vm5, %v1694_v29, %v1695_v15  ;;  %v1175_v60 = vshrl.u32 %v5065_v54, 16 }
 0x146   :  { %4523 = vmatmul.mubr.msk.bf16.gmra.mrb[56].mxu0 %vm289_vm0, %v5435_v52  ;;  %v760_v31 = vpack.c.bf16 %v718_v14, %v717_v12  ;;  %v1179_v32 = vrot.slane %v1177_v43, 1  ;;  %v1182_v59 = vshll.u32 %v5052_v46, 16  ;;  %v1357_v10 = vshll.u32 %v5281_v9, 16 }
 0x147   :  { %v759_v53 = vpack.c.bf16 %v716_v21, %v715_v17  ;;  %4526 = vmatprep.mubr.msk.bf16.mxu0 %vm289_vm0, %v5457_v1  ;;  %v5468_v22 = vsel %vm1137_vm4, %v1372_v56, %v1376_v40  ;;  %v1355_v0 = vshrl.u32 %v5281_v9, 16  ;;  %v1362_v17 = vshll.u32 %v5380_v11, 16 }
 0x148   :  { %2018 = vrot.lane.b32.xlu0 %v5452_v57, %s4790_s1  ;;  %1828 = vrot.lane.b32.xlu1 %v5065_v54, %s4790_s1  ;;  %v926_v12 = vshrl.u32 %v760_v31, 16  ;;  %v1180_v63 = vor.u32 %v1179_v32, %v1175_v60  ;;  %v1184_v62 = vrot.slane %v1182_v59, 1  ;;  %v929_v29 = vshll.u32 %v760_v31, 16 }
 0x149   :  { %v919_v4 = vshrl.u32 %v759_v53, 16  ;;  %v922_v8 = vshll.u32 %v759_v53, 16  ;;  %v1359_v15 = vrot.slane %v1357_v10, 1  ;;  %v1364_v56 = vrot.slane %v1362_v17, 1  ;;  %v4476_v17 = vpop.f32.mrb[12].mxu1 }
 0x14a   :  { %v928_v13 = vrot.slane %v926_v12, 7  ;;  %v5480_v14 = vsel %vm1137_vm4, %v1180_v63, %v1184_v62  ;;  %v1218_v63 = vshll.u32 %v5115_v35, 16  ;;  %v1211_v62 = vshrl.u32 %v5111_v39, 16  ;;  %v5551_v35 = vpop.permute.xlu0 %1982 }
 0x14b   :  { %v921_v46 = vrot.slane %v919_v4, 7  ;;  %v1360_v43 = vor.u32 %v1359_v15, %v1355_v0  ;;  %v1199_v0 = vshrl.u32 %v5144_v19, 16  ;;  %v1206_v15 = vshll.u32 %v5120_v55, 16  ;;  %7325 = vst [vmem:[#allocation34_spill] sm:$0xff] %v5551_v35 }
 0x14c   :  { %2050 = vrot.lane.b32.xlu0 %v5468_v22, %s4790_s1  ;;  %1860 = vrot.lane.b32.xlu1 %v5281_v9, %s4790_s1  ;;  %v931_v21 = vor.u32 %v929_v29, %v928_v13  ;;  %v1225_v9 = vshll.u32 %v5176_v49, 16 }
 0x14d   :  { %v924_v40 = vor.u32 %v922_v8, %v921_v46  ;;  %v5490_v11 = vsel %vm4878_vm3, %v921_v46, 0  ;;  %v5511_v53 = vsel %vm1137_vm4, %v1360_v43, %v1364_v56  ;;  %v1201_v46 = vshll.u32 %v5144_v19, 16  ;;  %v596_v43 = vpop.f32.mrb[13].mxu1 }
 0x14e   :  { %4527 = vmatmul.mubr.msk.bf16.gmra.mrb[60].mxu0 %vm289_vm0, %v4896_v38  ;;  %v5508_v31 = vsel %vm4878_vm3, 0, %v931_v21  ;;  %7324 = vst [vmem:[#allocation33_spill] sm:$0xff] %v5511_v53  ;;  %v1634_v60 = vrot.slane %v5490_v11, 1  ;;  %v1220_v8 = vrot.slane %v1218_v63, 1  ;;  %v5568_v63 = vpop.permute.xlu1 %1762 }
 0x14f   :  { %4530 = vmatprep.mubr.msk.bf16.mxu0 %vm289_vm0, %v5056_v50  ;;  %v5498_v50 = vsel %vm4878_vm3, 0, %v924_v40  ;;  %v1636_v32 = vrot.slane %v5508_v31, 1  ;;  %v1203_v29 = vrot.slane %v1201_v46, 1  ;;  %v5556_v40 = vld [vmem:[%s7221_s2] ss:$0 sm:$0xff] }
 0x150   :  { %2016 = vrot.lane.b32.xlu0 %v5480_v14, %s4790_s1  ;;  %1770 = vrot.lane.b32.xlu1 %v5185_v6, %s4786_s11  ;;  %v5502_v6 = vsel %vm4878_vm3, %v928_v13, 0  ;;  %v605_v21 = vadd.f32 %v5556_v40, %v4476_v17  ;;  %v597_v56 = vadd.f32 %v5556_v40, %v596_v43 }
 0x151   :  { %v1637_v59 = vrot.slane %v5502_v6, 1 }
 0x152   :  { %v721_v55 = vmax.f32 %v605_v21, 0.0  ;;  %v5575_v21 = vpop.permute.xlu0 %1700 }
 0x153   :  { %v5531_v12 = vsel %vm1572_vm5, %v1636_v32, %v1637_v59  ;;  %v1204_v59 = vor.u32 %v1203_v29, %v1199_v0 }
 0x154   :  { %1960 = vrot.lane.b32.xlu0 %v5111_v39, %s4786_s11  ;;  %1768 = vrot.lane.b32.xlu1 %v5094_v20, %s4786_s11  ;;  %v1633_v20 = vrot.slane %v5498_v50, 1 }
 0x156   :  { %4531 = vmatmul.mubr.msk.bf16.gmra.mrb[64].mxu0 %vm289_vm0, %v5427_v41  ;;  %v5524_v4 = vsel %vm1572_vm5, %v1633_v20, %v1634_v60  ;;  %v4477_v20 = vpop.f32.mrb[14].mxu1 }
 0x157   :  { %4534 = vmatprep.mubr.msk.bf16.mxu0 %vm289_vm0, %v5362_v3  ;;  %v608_v60 = vadd.f32 %v5556_v40, %v4477_v20 }
 0x158   :  { %2048 = vrot.lane.b32.xlu0 %v5511_v53, %s4790_s1  ;;  %1798 = vrot.lane.b32.xlu1 %v5427_v41, %s4786_s11  ;;  %v1213_v41 = vshll.u32 %v5111_v39, 16 }
 0x159   :  { %v722_v46 = vmax.f32 %v608_v60, 0.0  ;;  %v5586_v60 = vpop.permute.xlu0 %2044 }
 0x15a   :  { %v1215_v10 = vrot.slane %v1213_v41, 1  ;;  %v1208_v41 = vrot.slane %v1206_v15, 1  ;;  %7326 = vst [vmem:[#allocation35_spill] sm:$0xff] %v5586_v60 }
 0x15b   :  { %v762_v43 = vpack.c.bf16 %v722_v46, %v721_v55 }
 0x15c   :  { %1958 = vrot.lane.b32.xlu0 %v5144_v19, %s4786_s11  ;;  %1708 = vrot.lane.b32.xlu1 %v5452_v57, %s4789_s0  ;;  %v1216_v13 = vor.u32 %v1215_v10, %v1211_v62  ;;  %v599_v62 = vpop.f32.mrb[15].mxu1  ;;  %v719_v10 = vmax.f32 %v597_v56, 0.0  ;;  %v5578_v0 = vsel %vm1137_vm4, %v1204_v59, %v1208_v41 }
 0x15d   :  { %v600_v17 = vadd.f32 %v5556_v40, %v599_v62  ;;  %v940_v15 = vshrl.u32 %v762_v43, 16  ;;  %v943_v41 = vshll.u32 %v762_v43, 16 }
 0x15e   :  { %4535 = vmatmul.mubr.msk.bf16.gmra.mrb[68].mxu0 %vm289_vm0, %v5524_v4  ;;  %v5566_v32 = vsel %vm1137_vm4, %v1216_v13, %v1220_v8 }
 0x15f   :  { %4538 = vmatprep.mubr.msk.bf16.mxu0 %vm289_vm0, %v5531_v12  ;;  %v720_v8 = vmax.f32 %v600_v17, 0.0  ;;  %v942_v59 = vrot.slane %v940_v15, 7 }
 0x160   :  { %1990 = vrot.lane.b32.xlu0 %v5498_v50, %s4786_s11  ;;  %1706 = vrot.lane.b32.xlu1 %v5480_v14, %s4789_s0 }
 0x161   :  { %v761_v13 = vpack.c.bf16 %v720_v8, %v719_v10  ;;  %v1237_v10 = vshll.u32 %v5172_v47, 16  ;;  %v945_v43 = vor.u32 %v943_v41, %v942_v59  ;;  %v1235_v8 = vshrl.u32 %v5172_v47, 16 }
 0x163   :  { %v933_v56 = vshrl.u32 %v761_v13, 16  ;;  %v936_v20 = vshll.u32 %v761_v13, 16 }
 0x164   :  { %1898 = vrot.lane.b32.xlu0 %v5241_v24, %s4789_s0  ;;  %1834 = vrot.lane.b32.xlu1 %v5111_v39, %s4790_s1 }
 0x165   :  { %v935_v55 = vrot.slane %v933_v56, 7 }
 0x167   :  { %v5597_v46 = vsel %vm4878_vm3, %v935_v55, 0 }
 0x168   :  { %1896 = vrot.lane.b32.xlu0 %v5193_v18, %s4789_s0  ;;  %1736 = vrot.lane.b32.xlu1 %v5511_v53, %s4789_s0  ;;  %v1640_v56 = vrot.slane %v5597_v46, 1 }
 0x16c   :  { %2022 = vrot.lane.b32.xlu0 %v5566_v32, %s4790_s1  ;;  %1832 = vrot.lane.b32.xlu1 %v5144_v19, %s4790_s1 }
 0x170   :  { %2020 = vrot.lane.b32.xlu0 %v5578_v0, %s4790_s1  ;;  %1774 = vrot.lane.b32.xlu1 %v5241_v24, %s4786_s11  ;;  %v938_v24 = vor.u32 %v936_v20, %v935_v55  ;;  %v1239_v20 = vrot.slane %v1237_v10, 1  ;;  %v1242_v55 = vshll.u32 %v5154_v33, 16  ;;  %v5629_v10 = vsel %vm4878_vm3, 0, %v945_v43 }
 0x171   :  { %v5584_v29 = vpop.permute.xlu1 %1952  ;;  %v1223_v33 = vshrl.u32 %v5176_v49, 16  ;;  %v1642_v53 = vrot.slane %v5629_v10, 1 }
 0x172   :  { %v1240_v16 = vor.u32 %v1239_v20, %v1235_v8  ;;  %v1244_v60 = vrot.slane %v1242_v55, 1 }
 0x174   :  { %1964 = vrot.lane.b32.xlu0 %v5172_v47, %s4786_s11  ;;  %1772 = vrot.lane.b32.xlu1 %v5193_v18, %s4786_s11  ;;  %v5605_v18 = vsel %vm4878_vm3, 0, %v938_v24  ;;  %v5618_v24 = vsel %vm4878_vm3, %v942_v59, 0  ;;  %v5651_v8 = vsel %vm1137_vm4, %v1240_v16, %v1244_v60 }
 0x175   :  { %v5607_v17 = vpop.permute.xlu0 %1890  ;;  %v1639_v15 = vrot.slane %v5605_v18, 1 }
 0x176   :  { %v5592_v62 = vpop.permute.xlu1 %1826 }
 0x177   :  { %v5625_v41 = vsel %vm1572_vm5, %v1639_v15, %v1640_v56  ;;  %v1227_v15 = vrot.slane %v1225_v9, 1  ;;  %v1230_v56 = vshll.u32 %v5158_v34, 16  ;;  %v4480_v34 = vpop.f32.mrb[16].mxu1 }
 0x178   :  { %1962 = vrot.lane.b32.xlu0 %v5176_v49, %s4786_s11  ;;  %1712 = vrot.lane.b32.xlu1 %v5566_v32, %s4789_s0  ;;  %7328 = vst [vmem:[#allocation37_spill] sm:$0xff] %v5625_v41 }
 0x179   :  { %4539 = vmatmul.mubr.msk.bf16.gmra.mrb[72].mxu0 %vm289_vm0, %v5625_v41  ;;  %v5638_v35 = vpop.permute.xlu0 %1922  ;;  %v1228_v20 = vor.u32 %v1227_v15, %v1223_v33  ;;  %v1232_v9 = vrot.slane %v1230_v56, 1 }
 0x17a   :  { %v5610_v13 = vpop.permute.xlu1 %1984  ;;  %7330 = vst [vmem:[#allocation39_spill] sm:$0xff] %v5638_v35 }
 0x17b   :  { %7327 = vst [vmem:[#allocation36_spill] sm:$0xff] %v5610_v13  ;;  %v1643_v13 = vrot.slane %v5618_v24, 1  ;;  %v5662_v16 = vsel %vm1137_vm4, %v1228_v20, %v1232_v9 }
 0x17c   :  { %1902 = vrot.lane.b32.xlu0 %v5269_v7, %s4789_s0  ;;  %1710 = vrot.lane.b32.xlu1 %v5578_v0, %s4789_s0 }
 0x17d   :  { %v5646_v43 = vsel %vm1572_vm5, %v1642_v53, %v1643_v13  ;;  %v1889_v55 = vpop.permute.xlu0 %1888  ;;  %v621_v53 = vadd.f32 %v5556_v40, %v4480_v34  ;;  %v612_v13 = vpop.f32.mrb[17].mxu1 }
 0x17e   :  { %v5634_v59 = vpop.permute.xlu1 %1858  ;;  %7331 = vst [vmem:[#allocation40_spill] sm:$0xff] %v5646_v43  ;;  %4542 = vmatprep.mubr.msk.bf16.mxu0 %vm289_vm0, %v5646_v43  ;;  %v4481_v43 = vpop.f32.mrb[18].mxu1 }
 0x17f   :  { %7329 = vst [vmem:[#allocation38_spill] sm:$0xff] %v5634_v59  ;;  %v725_v60 = vmax.f32 %v621_v53, 0.0  ;;  %v624_v33 = vadd.f32 %v5556_v40, %v4481_v43  ;;  %v615_v15 = vpop.f32.mrb[19].mxu1  ;;  %v1261_v53 = vshll.u32 %v5266_v42, 16 }
 0x180   :  { %1900 = vrot.lane.b32.xlu0 %v5249_v45, %s4789_s0  ;;  %1838 = vrot.lane.b32.xlu1 %v5172_v47, %s4790_s1  ;;  %v613_v47 = vadd.f32 %v5556_v40, %v612_v13  ;;  %v616_v34 = vadd.f32 %v5556_v40, %v615_v15 }
 0x182   :  { %v1825_v59 = vpop.permute.xlu1 %1824  ;;  %v723_v56 = vmax.f32 %v613_v47, 0.0  ;;  %v724_v13 = vmax.f32 %v616_v34, 0.0  ;;  %v2077_v47 = vsel %vm289_vm0, %v4884_v27, %v5575_v21  ;;  %v1263_v34 = vrot.slane %v1261_v53, 1 }
 0x184   :  { %2026 = vrot.lane.b32.xlu0 %v5651_v8, %s4790_s1  ;;  %1836 = vrot.lane.b32.xlu1 %v5176_v49, %s4790_s1  ;;  %v763_v20 = vpack.c.bf16 %v724_v13, %v723_v56  ;;  %v1266_v56 = vshll.u32 %v5215_v51, 16 }
 0x186   :  { %v5658_v35 = vpop.permute.xlu1 %1856 }
 0x187   :  { %7332 = vst [vmem:[#allocation41_spill] sm:$0xff] %v5658_v35  ;;  %v726_v35 = vmax.f32 %v624_v33, 0.0  ;;  %v947_v33 = vshrl.u32 %v763_v20, 16 }
 0x188   :  { %2024 = vrot.lane.b32.xlu0 %v5662_v16, %s4790_s1  ;;  %1778 = vrot.lane.b32.xlu1 %v5269_v7, %s4786_s11 }
 0x189   :  { %v764_v41 = vpack.c.bf16 %v726_v35, %v725_v60  ;;  %v5676_v43 = vpop.permute.xlu0 %1920  ;;  %v950_v35 = vshll.u32 %v763_v20, 16  ;;  %v2300_v60 = vsel %vm289_vm0, %v5388_v5, %v1889_v55  ;;  %v949_v21 = vrot.slane %v947_v33, 7 }
 0x18a   :  { %v5670_v49 = vpop.permute.xlu1 %1766  ;;  %7333 = vst [vmem:[#allocation42_spill] sm:$0xff] %v5676_v43 }
 0x18b   :  { %v954_v7 = vshrl.u32 %v764_v41, 16  ;;  %v957_v9 = vshll.u32 %v764_v41, 16  ;;  %v1259_v41 = vshrl.u32 %v5266_v42, 16  ;;  %v952_v13 = vor.u32 %v950_v35, %v949_v21 }
 0x18c   :  { %1968 = vrot.lane.b32.xlu0 %v5266_v42, %s4786_s11  ;;  %1776 = vrot.lane.b32.xlu1 %v5249_v45, %s4786_s11  ;;  %v5686_v45 = vsel %vm2138_vm6, %v2077_v47, %v5568_v63  ;;  %v2395_v63 = vsel %vm2138_vm6, %v2300_v60, %v5584_v29  ;;  %v5700_v20 = vsel %vm4878_vm3, %v949_v21, 0  ;;  %v1254_v21 = vshll.u32 %v5224_v28, 16  ;;  %v4484_v28 = vpop.f32.mrb[20].mxu1 }
 0x18d   :  { %v956_v15 = vrot.slane %v954_v7, 7  ;;  %7334 = vst [vmem:[#allocation43_spill] sm:$0xff] %v5686_v45  ;;  %7336 = vst [vmem:[#allocation45_spill] sm:$0xff] %v5700_v20  ;;  %v1249_v7 = vshll.u32 %v5236_v25, 16  ;;  %v1646_v51 = vrot.slane %v5700_v20, 1  ;;  %v5715_v29 = vsel %vm4878_vm3, 0, %v952_v13 }
 0x18e   :  { %v5692_v27 = vpop.permute.xlu1 %1796  ;;  %v1645_v35 = vrot.slane %v5715_v29, 1  ;;  %v1264_v13 = vor.u32 %v1263_v34, %v1259_v41  ;;  %v1314_v20 = vshll.u32 %v5316_v44, 16 }
 0x18f   :  { %7335 = vst [vmem:[#allocation44_spill] sm:$0xff] %v5692_v27  ;;  %v959_v5 = vor.u32 %v957_v9, %v956_v15  ;;  %v5706_v33 = vsel %vm4878_vm3, %v956_v15, 0  ;;  %v2203_v9 = vsel %vm2201_vm7, %v5686_v45, %v1825_v59  ;;  %v1247_v15 = vshrl.u32 %v5236_v25, 16 }
 0x190   :  { %1966 = vrot.lane.b32.xlu0 %v5236_v25, %s4786_s11  ;;  %1716 = vrot.lane.b32.xlu1 %v5651_v8, %s4789_s0  ;;  %7337 = vst [vmem:[#allocation46_spill] sm:$0xff] %v5706_v33 }
 0x191   :  { %v5721_v53 = vsel %vm4878_vm3, 0, %v959_v5  ;;  %v5733_v5 = vsel %vm1572_vm5, %v1645_v35, %v1646_v51  ;;  %v1256_v51 = vrot.slane %v1254_v21, 1  ;;  %v628_v35 = vpop.f32.mrb[21].mxu1 }
 0x192   :  { %v2015_v55 = vpop.permute.xlu0 %2014  ;;  %7338 = vst [vmem:[#allocation47_spill] sm:$0xff] %v5721_v53  ;;  %v5726_v59 = vpop.permute.xlu1 %1764  ;;  %7340 = vst [vmem:[#allocation49_spill] sm:$0xff] %v5733_v5  ;;  %4543 = vmatmul.mubr.msk.bf16.gmra.mrb[76].mxu0 %vm289_vm0, %v5733_v5 }
 0x193   :  { %v2458_v47 = vsel %vm2201_vm7, %v2395_v63, %v2015_v55  ;;  %v1648_v55 = vrot.slane %v5721_v53, 1  ;;  %v1649_v63 = vrot.slane %v5706_v33, 1  ;;  %v4485_v45 = vpop.f32.mrb[22].mxu1 }
 0x194   :  { %1906 = vrot.lane.b32.xlu0 %v5327_v61, %s4789_s0  ;;  %2828 = vmatprep.mubr.bf16.mxu1 %v2458_v47  ;;  %v1268_v47 = vrot.slane %v1266_v56, 1  ;;  %v637_v56 = vadd.f32 %v5556_v40, %v4484_v28  ;;  %v640_v28 = vadd.f32 %v5556_v40, %v4485_v45  ;;  %v631_v43 = vpop.f32.mrb[23].mxu1 }
 0x195   :  { %1714 = vrot.lane.b32.xlu1 %v5662_v16, %s4789_s0  ;;  %2829 = vmatmul.mubr.bf16.vlgmr.msra.gmra.mrb[32].mxu1 %v2203_v9  ;;  %v1251_v9 = vrot.slane %v1249_v7, 1  ;;  %v5740_v27 = vsel %vm1572_vm5, %v1648_v55, %v1649_v63  ;;  %v629_v63 = vadd.f32 %v5556_v40, %v628_v35  ;;  %v632_v21 = vadd.f32 %v5556_v40, %v631_v43 }
 0x196   :  { %v5724_v60 = vpop.permute.xlu0 %2046  ;;  %7341 = vst [vmem:[#allocation50_spill] sm:$0xff] %v5740_v27  ;;  %4546 = vmatprep.mubr.msk.bf16.mxu0 %vm289_vm0, %v5740_v27  ;;  %v5750_v34 = vsel %vm1137_vm4, %v1264_v13, %v1268_v47  ;;  %v5754_v55 = vpop.permute.xlu1 %1794 }
 0x197   :  { %7339 = vst [vmem:[#allocation48_spill] sm:$0xff] %v5724_v60  ;;  %7342 = vst [vmem:[#allocation51_spill] sm:$0xff] %v5750_v34  ;;  %v1252_v7 = vor.u32 %v1251_v9, %v1247_v15  ;;  %v729_v60 = vmax.f32 %v637_v56, 0.0  ;;  %v727_v15 = vmax.f32 %v629_v63, 0.0  ;;  %v730_v9 = vmax.f32 %v640_v28, 0.0 }
 0x198   :  { %1904 = vrot.lane.b32.xlu0 %v5292_v30, %s4789_s0  ;;  %7343 = vst [vmem:[#allocation52_spill] sm:$0xff] %v5754_v55  ;;  %v728_v35 = vmax.f32 %v632_v21, 0.0 }
 0x199   :  { %1842 = vrot.lane.b32.xlu1 %v5266_v42, %s4790_s1  ;;  %v5764_v47 = vsel %vm1137_vm4, %v1252_v7, %v1256_v51  ;;  %v766_v56 = vpack.c.bf16 %v730_v9, %v729_v60  ;;  %v7347_v9 = vld [vmem:[#allocation23_spill] sm:$0xff] }
 0x19a   :  { %v5746_v41 = vpop.permute.xlu0 %1956  ;;  %7345 = vst [vmem:[#allocation54_spill] sm:$0xff] %v5764_v47  ;;  %v5772_v45 = vpop.permute.xlu1 %1704 }
 0x19b   :  { %v968_v63 = vshrl.u32 %v766_v56, 16  ;;  %v971_v28 = vshll.u32 %v766_v56, 16  ;;  %v1283_v56 = vshrl.u32 %v5305_v2, 16 }
 0x19c   :  { %2030 = vrot.lane.b32.xlu0 %v5750_v34, %s4790_s1 }
 0x19d   :  { %1840 = vrot.lane.b32.xlu1 %v5236_v25, %s4790_s1  ;;  %v970_v51 = vrot.slane %v968_v63, 7 }
 0x19e   :  { %v5760_v13 = vpop.permute.xlu0 %1988 }
 0x19f   :  { %7344 = vst [vmem:[#allocation53_spill] sm:$0xff] %v5760_v13  ;;  %v765_v13 = vpack.c.bf16 %v728_v35, %v727_v15  ;;  %v5783_v15 = vpop.permute.xlu1 %1734 }
 0x1a0   :  { %2028 = vrot.lane.b32.xlu0 %v5764_v47, %s4790_s1  ;;  %7348 = vst [vmem:[#allocation56_spill] sm:$0xff] %v5783_v15 }
 0x1a1   :  { %1782 = vrot.lane.b32.xlu1 %v5327_v61, %s4786_s11  ;;  %v961_v43 = vshrl.u32 %v765_v13, 16  ;;  %v964_v7 = vshll.u32 %v765_v13, 16  ;;  %v1285_v61 = vshll.u32 %v5305_v2, 16 }
 0x1a2   :  { %v5770_v55 = vpop.permute.xlu0 %1954 }
 0x1a3   :  { %v963_v60 = vrot.slane %v961_v43, 7  ;;  %v1287_v63 = vrot.slane %v1285_v61, 1  ;;  %v7350_v43 = vld [vmem:[#allocation20_spill] sm:$0xff] }
 0x1a4   :  { %1972 = vrot.lane.b32.xlu0 %v5305_v2, %s4786_s11 }
 0x1a5   :  { %1780 = vrot.lane.b32.xlu1 %v5292_v30, %s4786_s11  ;;  %v966_v35 = vor.u32 %v964_v7, %v963_v60  ;;  %v5787_v42 = vsel %vm4878_vm3, %v963_v60, 0  ;;  %v973_v30 = vor.u32 %v971_v28, %v970_v51  ;;  %v1273_v7 = vshll.u32 %v7347_v9, 16 }
 0x1a6   :  { %v5778_v21 = vpop.permute.xlu0 %1986  ;;  %7349 = vst [vmem:[#allocation57_spill] sm:$0xff] %v5787_v42  ;;  %v5802_v60 = vsel %vm4878_vm3, %v970_v51, 0  ;;  %v1652_v28 = vrot.slane %v5787_v42, 1  ;;  %v1288_v25 = vor.u32 %v1287_v63, %v1283_v56 }
 0x1a7   :  { %7346 = vst [vmem:[#allocation55_spill] sm:$0xff] %v5778_v21  ;;  %v1290_v21 = vshll.u32 %v7350_v43, 16  ;;  %v5797_v27 = vsel %vm4878_vm3, 0, %v966_v35  ;;  %7352 = vst [vmem:[#allocation58_spill] sm:$0xff] %v5802_v60  ;;  %v5812_v61 = vsel %vm4878_vm3, 0, %v973_v30  ;;  %v1275_v33 = vrot.slane %v1273_v7, 1 }
 0x1a8   :  { %1970 = vrot.lane.b32.xlu0 %v7347_v9, %s4786_s11  ;;  %7351 = vst [vmem:[#allocation20_spill] sm:$0xff] %v5797_v27  ;;  %v1651_v15 = vrot.slane %v5797_v27, 1  ;;  %7353 = vst [vmem:[#allocation59_spill] sm:$0xff] %v5812_v61  ;;  %v1654_v42 = vrot.slane %v5812_v61, 1  ;;  %v1655_v27 = vrot.slane %v5802_v60, 1  ;;  %v7356_v30 = vld [vmem:[#allocation21_spill] sm:$0xff] }
 0x1a9   :  { %1720 = vrot.lane.b32.xlu1 %v5750_v34, %s4789_s0  ;;  %v1271_v34 = vshrl.u32 %v7347_v9, 16  ;;  %v1292_v5 = vrot.slane %v1290_v21, 1  ;;  %v1278_v53 = vshll.u32 %v7356_v30, 16 }
 0x1aa   :  { %v5791_v13 = vpop.permute.xlu0 %1894  ;;  %v5815_v35 = vsel %vm1572_vm5, %v1651_v15, %v1652_v28  ;;  %v7357_v15 = vld [vmem:[#allocation25_spill] sm:$0xff]  ;;  %v5828_v28 = vsel %vm1572_vm5, %v1654_v42, %v1655_v27 }
 0x1ab   :  { %7354 = vst [vmem:[#allocation60_spill] sm:$0xff] %v5815_v35  ;;  %4547 = vmatmul.mubr.msk.bf16.gmra.mrb[80].mxu0 %vm289_vm0, %v5815_v35  ;;  %7358 = vst [vmem:[#allocation21_spill] sm:$0xff] %v5828_v28  ;;  %v5838_v56 = vsel %vm1137_vm4, %v1288_v25, %v1292_v5  ;;  %v1276_v63 = vor.u32 %v1275_v33, %v1271_v34  ;;  %v1280_v7 = vrot.slane %v1278_v53, 1 }
 0x1ac   :  { %1910 = vrot.lane.b32.xlu0 %v5366_v58, %s4789_s0  ;;  %4550 = vmatprep.mubr.msk.bf16.mxu0 %vm289_vm0, %v5828_v28 }
 0x1ad   :  { %1718 = vrot.lane.b32.xlu1 %v5764_v47, %s4789_s0  ;;  %v5852_v5 = vsel %vm1137_vm4, %v1276_v63, %v1280_v7 }
 0x1ae   :  { %v5817_v43 = vpop.permute.xlu0 %1926  ;;  %v1703_v51 = vpop.permute.xlu1 %1702 }
 0x1af   :  { %7355 = vst [vmem:[#allocation61_spill] sm:$0xff] %v5817_v43  ;;  %v4488_v43 = vpop.f32.mrb[24].mxu1 }
 0x1b0   :  { %1908 = vrot.lane.b32.xlu0 %v7357_v15, %s4789_s0  ;;  %v653_v21 = vadd.f32 %v5556_v40, %v4488_v43  ;;  %v644_v30 = vpop.f32.mrb[25].mxu1 }
 0x1b1   :  { %1846 = vrot.lane.b32.xlu1 %v5305_v2, %s4790_s1  ;;  %v645_v42 = vadd.f32 %v5556_v40, %v644_v30  ;;  %v4489_v27 = vpop.f32.mrb[26].mxu1 }
 0x1b2   :  { %v1893_v35 = vpop.permute.xlu0 %1892  ;;  %v5834_v60 = vpop.permute.xlu1 %1830  ;;  %v733_v2 = vmax.f32 %v653_v21, 0.0  ;;  %v656_v28 = vadd.f32 %v5556_v40, %v4489_v27 }
 0x1b3   :  { %v647_v61 = vpop.f32.mrb[27].mxu1  ;;  %v731_v33 = vmax.f32 %v645_v42, 0.0  ;;  %v7361_v42 = vld [vmem:[#allocation10_spill] sm:$0xff] }
 0x1b4   :  { %2034 = vrot.lane.b32.xlu0 %v5838_v56, %s4790_s1  ;;  %v648_v53 = vadd.f32 %v5556_v40, %v647_v61  ;;  %v734_v34 = vmax.f32 %v656_v28, 0.0 }
 0x1b5   :  { %1844 = vrot.lane.b32.xlu1 %v7347_v9, %s4790_s1 }
 0x1b6   :  { %v5846_v43 = vpop.permute.xlu0 %1924  ;;  %v5848_v25 = vpop.permute.xlu1 %1732  ;;  %v732_v30 = vmax.f32 %v648_v53, 0.0  ;;  %v768_v21 = vpack.c.bf16 %v734_v34, %v733_v2  ;;  %v2079_v53 = vsel %vm289_vm0, %v7361_v42, %v1703_v51  ;;  %v7365_v51 = vld [vmem:[#allocation15_spill] sm:$0xff]  ;;  %v2306_v42 = vsel %vm289_vm0, %v5480_v14, %v1893_v35 }
 0x1b7   :  { %7359 = vst [vmem:[#allocation25_spill] sm:$0xff] %v5846_v43  ;;  %7360 = vst [vmem:[#allocation62_spill] sm:$0xff] %v5848_v25 }
 0x1b8   :  { %2032 = vrot.lane.b32.xlu0 %v5852_v5, %s4790_s1  ;;  %v767_v43 = vpack.c.bf16 %v732_v30, %v731_v33  ;;  %v982_v25 = vshrl.u32 %v768_v21, 16  ;;  %v985_v7 = vshll.u32 %v768_v21, 16  ;;  %v1309_v33 = vshll.u32 %v5357_v23, 16  ;;  %v7364_v30 = vld [vmem:[#allocation24_spill] sm:$0xff] }
 0x1b9   :  { %1786 = vrot.lane.b32.xlu1 %v5366_v58, %s4786_s11  ;;  %v2303_v21 = vsel %vm289_vm0, %v7365_v51, %v5607_v17  ;;  %v1297_v47 = vshll.u32 %v7364_v30, 16 }
 0x1ba   :  { %v2019_v27 = vpop.permute.xlu0 %2018  ;;  %v5858_v9 = vpop.permute.xlu1 %1828  ;;  %v975_v61 = vshrl.u32 %v767_v43, 16  ;;  %v978_v63 = vshll.u32 %v767_v43, 16  ;;  %v984_v28 = vrot.slane %v982_v25, 7  ;;  %v1307_v43 = vshrl.u32 %v5357_v23, 16 }
 0x1bb   :  { %v2397_v44 = vsel %vm2138_vm6, %v2303_v21, %v5770_v55 }
 0x1bc   :  { %1976 = vrot.lane.b32.xlu0 %v5357_v23, %s4786_s11  ;;  %v977_v34 = vrot.slane %v975_v61, 7  ;;  %v2142_v61 = vsel %vm2138_vm6, %v2079_v53, %v5726_v59  ;;  %v5900_v35 = vsel %vm4878_vm3, %v984_v28, 0 }
 0x1bd   :  { %1784 = vrot.lane.b32.xlu1 %v7357_v15, %s4786_s11  ;;  %v2206_v53 = vsel %vm2201_vm7, %v2142_v61, %v5592_v62 }
 0x1be   :  { %v5866_v58 = vpop.permute.xlu0 %2050  ;;  %v5868_v2 = vpop.permute.xlu1 %1860  ;;  %v980_v15 = vor.u32 %v978_v63, %v977_v34  ;;  %v5877_v25 = vsel %vm4878_vm3, %v977_v34, 0 }
 0x1bf   :  { %7362 = vst [vmem:[#allocation10_spill] sm:$0xff] %v5866_v58  ;;  %7363 = vst [vmem:[#allocation63_spill] sm:$0xff] %v5868_v2  ;;  %v987_v2 = vor.u32 %v985_v7, %v984_v28  ;;  %v1311_v58 = vrot.slane %v1309_v33, 1  ;;  %v1658_v55 = vrot.slane %v5877_v25, 1  ;;  %v7366_v7 = vld [vmem:[#allocation31_spill] sm:$0xff]  ;;  %v2399_v33 = vsel %vm2138_vm6, %v2306_v42, %v5746_v41 }
 0x1c0   :  { %1974 = vrot.lane.b32.xlu0 %v7364_v30, %s4786_s11  ;;  %v5895_v17 = vsel %vm4878_vm3, 0, %v980_v15  ;;  %v2464_v28 = vsel %vm2201_vm7, %v2399_v33, %v2019_v27  ;;  %v1295_v41 = vshrl.u32 %v7364_v30, 16  ;;  %v1661_v27 = vrot.slane %v5900_v35, 1 }
 0x1c1   :  { %1724 = vrot.lane.b32.xlu1 %v5838_v56, %s4789_s0  ;;  %v1657_v59 = vrot.slane %v5895_v17, 1  ;;  %v5915_v15 = vsel %vm4878_vm3, 0, %v987_v2  ;;  %v1312_v61 = vor.u32 %v1311_v58, %v1307_v43  ;;  %v1316_v2 = vrot.slane %v1314_v20, 1  ;;  %v4492_v20 = vpop.f32.mrb[28].mxu1 }
 0x1c2   :  { %v2017_v63 = vpop.permute.xlu0 %2016  ;;  %v5890_v34 = vpop.permute.xlu1 %1770  ;;  %v1660_v42 = vrot.slane %v5915_v15, 1  ;;  %v669_v43 = vadd.f32 %v5556_v40, %v4492_v20 }
 0x1c3   :  { %v2461_v14 = vsel %vm2201_vm7, %v2397_v44, %v2017_v63  ;;  %v5918_v51 = vsel %vm1572_vm5, %v1657_v59, %v1658_v55  ;;  %v1299_v44 = vrot.slane %v1297_v47, 1  ;;  %v7368_v63 = vld [vmem:[#allocation26_spill] sm:$0xff]  ;;  %v7369_v59 = vld [vmem:[#allocation9_spill] sm:$0xff] }
 0x1c4   :  { %1914 = vrot.lane.b32.xlu0 %v7366_v7, %s4789_s0  ;;  %2836 = vmatprep.mubr.bf16.mxu1 %v2461_v14  ;;  %7367 = vst [vmem:[#allocation15_spill] sm:$0xff] %v5918_v51  ;;  %v1302_v14 = vshll.u32 %v7368_v63, 16  ;;  %v2081_v55 = vsel %vm289_vm0, %v7369_v59, %v5772_v45  ;;  %v5936_v33 = vsel %vm1572_vm5, %v1660_v42, %v1661_v27  ;;  %v660_v63 = vpop.f32.mrb[29].mxu1 }
 0x1c5   :  { %1722 = vrot.lane.b32.xlu1 %v5852_v5, %s4789_s0  ;;  %2837 = vmatmul.mubr.bf16.gmra.mrb[36].mxu1 %v2206_v53  ;;  %v7370_v53 = vld [vmem:[#allocation29_spill] sm:$0xff]  ;;  %7371 = vst [vmem:[#allocation31_spill] sm:$0xff] %v5936_v33  ;;  %v5948_v45 = vsel %vm1137_vm4, %v1312_v61, %v1316_v2  ;;  %v1300_v42 = vor.u32 %v1299_v44, %v1295_v41  ;;  %v737_v61 = vmax.f32 %v669_v43, 0.0 }
 0x1c6   :  { %v5920_v21 = vpop.permute.xlu0 %1960  ;;  %2844 = vmatprep.mubr.bf16.mxu1 %v2464_v28  ;;  %v5922_v62 = vpop.permute.xlu1 %1768  ;;  %4551 = vmatmul.mubr.msk.bf16.gmra.mrb[84].mxu0 %vm289_vm0, %v5918_v51  ;;  %7374 = vst [vmem:[#allocation29_spill] sm:$0xff] %v5948_v45  ;;  %v2144_v28 = vsel %vm2138_vm6, %v2081_v55, %v5670_v49  ;;  %v1304_v27 = vrot.slane %v1302_v14, 1  ;;  %v7380_v51 = vld [vmem:[#allocation28_spill] sm:$0xff] }
 0x1c7   :  { %4554 = vmatprep.mubr.msk.bf16.mxu0 %vm289_vm0, %v5936_v33  ;;  %v2209_v59 = vsel %vm2201_vm7, %v2144_v28, %v5858_v9 }
 0x1c8   :  { %1912 = vrot.lane.b32.xlu0 %v7370_v53, %s4789_s0  ;;  %v5966_v9 = vsel %vm1137_vm4, %v1300_v42, %v1304_v27 }
 0x1c9   :  { %1850 = vrot.lane.b32.xlu1 %v5357_v23, %s4790_s1 }
 0x1ca   :  { %v5942_v47 = vpop.permute.xlu0 %2048  ;;  %v5944_v58 = vpop.permute.xlu1 %1798 }
 0x1cb   :  { %7372 = vst [vmem:[#allocation26_spill] sm:$0xff] %v5942_v47  ;;  %7373 = vst [vmem:[#allocation9_spill] sm:$0xff] %v5944_v58  ;;  %v661_v47 = vadd.f32 %v5556_v40, %v660_v63  ;;  %v4493_v58 = vpop.f32.mrb[30].mxu1 }
 0x1cc   :  { %2038 = vrot.lane.b32.xlu0 %v5948_v45, %s4790_s1  ;;  %v672_v2 = vadd.f32 %v5556_v40, %v4493_v58  ;;  %v663_v49 = vpop.f32.mrb[31].mxu1 }
 0x1cd   :  { %1848 = vrot.lane.b32.xlu1 %v7364_v30, %s4790_s1  ;;  %2845 = vmatmul.mubr.bf16.gmra.mrb[40].mxu1 %v2209_v59  ;;  %v735_v14 = vmax.f32 %v661_v47, 0.0  ;;  %v664_v55 = vadd.f32 %v5556_v40, %v663_v49 }
 0x1ce   :  { %v5960_v41 = vpop.permute.xlu0 %1958  ;;  %v5962_v44 = vpop.permute.xlu1 %1708  ;;  %v738_v20 = vmax.f32 %v672_v2, 0.0 }
 0x1cf   :  { %v736_v28 = vmax.f32 %v664_v55, 0.0 }
 0x1d0   :  { %2036 = vrot.lane.b32.xlu0 %v5966_v9, %s4790_s1  ;;  %v770_v58 = vpack.c.bf16 %v738_v20, %v737_v61 }
 0x1d1   :  { %1790 = vrot.lane.b32.xlu1 %v7366_v7, %s4786_s11  ;;  %v769_v59 = vpack.c.bf16 %v736_v28, %v735_v14  ;;  %v1669_v7 = vshll.u32 %v5409_v36, 16  ;;  %v7376_v14 = vld [vmem:[#allocation30_spill] sm:$0xff] }
 0x1d2   :  { %v5972_v43 = vpop.permute.xlu0 %1990  ;;  %v1707_v63 = vpop.permute.xlu1 %1706  ;;  %v996_v23 = vshrl.u32 %v770_v58, 16  ;;  %v999_v27 = vshll.u32 %v770_v58, 16  ;;  %v1667_v58 = vshrl.u32 %v5409_v36, 16  ;;  %v1319_v26 = vshrl.u32 %v7376_v14, 16 }
 0x1d3   :  { %7375 = vst [vmem:[#allocation64_spill] sm:$0xff] %v5972_v43  ;;  %v989_v40 = vshrl.u32 %v769_v59, 16  ;;  %v992_v47 = vshll.u32 %v769_v59, 16  ;;  %v1671_v59 = vrot.slane %v1669_v7, 1 }
 0x1d4   :  { %1980 = vrot.lane.b32.xlu0 %v5409_v36, %s4786_s11  ;;  %v998_v42 = vrot.slane %v996_v23, 7 }
 0x1d5   :  { %1788 = vrot.lane.b32.xlu1 %v7370_v53, %s4786_s11  ;;  %v991_v61 = vrot.slane %v989_v40, 7  ;;  %v1674_v40 = vshll.u32 %v5402_v37, 16  ;;  %v1381_v37 = vshll.u32 %v5498_v50, 16  ;;  %v1672_v30 = vor.u32 %v1671_v59, %v1667_v58 }
 0x1d6   :  { %v5978_v2 = vpop.permute.xlu0 %1898  ;;  %v5980_v49 = vpop.permute.xlu1 %1834  ;;  %v1001_v23 = vor.u32 %v999_v27, %v998_v42 }
 0x1d7   :  { %v994_v55 = vor.u32 %v992_v47, %v991_v61  ;;  %v5987_v20 = vsel %vm4878_vm3, %v991_v61, 0  ;;  %v1321_v47 = vshll.u32 %v7376_v14, 16  ;;  %v6002_v61 = vsel %vm4878_vm3, %v998_v42, 0 }
 0x1d8   :  { %1978 = vrot.lane.b32.xlu0 %v7376_v14, %s4786_s11  ;;  %7377 = vst [vmem:[#allocation30_spill] sm:$0xff] %v5987_v20  ;;  %v1664_v33 = vrot.slane %v5987_v20, 1  ;;  %v6013_v7 = vsel %vm4878_vm3, 0, %v1001_v23  ;;  %v2083_v42 = vsel %vm289_vm0, %v5065_v54, %v1707_v63 }
 0x1d9   :  { %1728 = vrot.lane.b32.xlu1 %v5948_v45, %s4789_s0  ;;  %v5997_v43 = vsel %vm4878_vm3, 0, %v994_v55  ;;  %v1676_v45 = vrot.slane %v1674_v40, 1  ;;  %v1323_v23 = vrot.slane %v1321_v47, 1  ;;  %v2309_v40 = vsel %vm289_vm0, %v5452_v57, %v5791_v13 }
 0x1da   :  { %v1897_v53 = vpop.permute.xlu0 %1896  ;;  %v5991_v28 = vpop.permute.xlu1 %1736  ;;  %7379 = vst [vmem:[#allocation66_spill] sm:$0xff] %v5997_v43  ;;  %v1663_v27 = vrot.slane %v5997_v43, 1  ;;  %v1698_v43 = vrot.slane %v6002_v61, 1  ;;  %v1379_v57 = vshrl.u32 %v5498_v50, 16  ;;  %v1386_v13 = vshll.u32 %v5490_v11, 16 }
 0x1db   :  { %7378 = vst [vmem:[#allocation65_spill] sm:$0xff] %v5991_v28  ;;  %v2312_v58 = vsel %vm289_vm0, %v5578_v0, %v1897_v53  ;;  %v1383_v0 = vrot.slane %v1381_v37, 1  ;;  %v1324_v53 = vor.u32 %v1323_v23, %v1319_v26 }
 0x1dc   :  { %1918 = vrot.lane.b32.xlu0 %v5457_v1, %s4789_s0  ;;  %v6016_v55 = vsel %vm1572_vm5, %v1663_v27, %v1664_v33  ;;  %v1697_v1 = vrot.slane %v6013_v7, 1  ;;  %v1326_v33 = vshll.u32 %v7380_v51, 16  ;;  %v2146_v51 = vsel %vm2138_vm6, %v2083_v42, %v5922_v62 }
 0x1dd   :  { %1726 = vrot.lane.b32.xlu1 %v5966_v9, %s4789_s0  ;;  %4555 = vmatmul.mubr.msk.bf16.gmra.mrb[88].mxu0 %vm289_vm0, %v6016_v55  ;;  %v2403_v37 = vsel %vm2138_vm6, %v2312_v58, %v5920_v21  ;;  %v1384_v23 = vor.u32 %v1383_v0, %v1379_v57  ;;  %v1398_v0 = vshll.u32 %v5502_v6, 16 }
 0x1de   :  { %v2023_v28 = vpop.permute.xlu0 %2022  ;;  %v1833_v20 = vpop.permute.xlu1 %1832  ;;  %v6033_v63 = vsel %vm1572_vm5, %v1697_v1, %v1698_v43  ;;  %v2401_v43 = vsel %vm2138_vm6, %v2309_v40, %v5960_v41  ;;  %v1328_v42 = vrot.slane %v1326_v33, 1  ;;  %v2212_v41 = vsel %vm2201_vm7, %v2146_v51, %v5834_v60  ;;  %v7382_v33 = vld [vmem:[#allocation12_spill] sm:$0xff] }
 0x1df   :  { %v6026_v27 = vpop.f32.mrb[32].mxu0  ;;  %4558 = vmatprep.mubr.msk.bf16.mxu0 %vm289_vm0, %v6033_v63  ;;  %v2470_v11 = vsel %vm2201_vm7, %v2403_v37, %v2023_v28  ;;  %v1388_v60 = vrot.slane %v1386_v13, 1  ;;  %v2085_v21 = vsel %vm289_vm0, %v7382_v33, %v5962_v44  ;;  %v1393_v51 = vshll.u32 %v5508_v31, 16 }
 0x1e0   :  { %1916 = vrot.lane.b32.xlu0 %v5435_v52, %s4789_s0  ;;  %v6030_v54 = vpop.f32.mrb[33].mxu0  ;;  %v6072_v26 = vsel %vm1137_vm4, %v1324_v53, %v1328_v42  ;;  %v1400_v42 = vrot.slane %v1398_v0, 1  ;;  %v1405_v33 = vshll.u32 %v5605_v18, 16 }
 0x1e1   :  { %1854 = vrot.lane.b32.xlu1 %v5409_v36, %s4790_s1  ;;  %v6044_v59 = vpop.f32.mrb[34].mxu0  ;;  %v6055_v36 = vsel %vm1137_vm4, %v1672_v30, %v1676_v45  ;;  %v6082_v58 = vsel %vm1137_vm4, %v1384_v23, %v1388_v60  ;;  %v1395_v57 = vrot.slane %v1393_v51, 1 }
 0x1e2   :  { %7381 = vst [vmem:[#allocation28_spill] sm:$0xff] %v6044_v59  ;;  %v2021_v47 = vpop.permute.xlu0 %2020  ;;  %v6050_v1 = vpop.permute.xlu1 %1774 }
 0x1e3   :  { %v2467_v62 = vsel %vm2201_vm7, %v2401_v43, %v2021_v47  ;;  %v6058_v59 = vpop.f32.mrb[35].mxu0  ;;  %v1391_v47 = vshrl.u32 %v5508_v31, 16 }
 0x1e4   :  { %2042 = vrot.lane.b32.xlu0 %v6055_v36, %s4790_s1  ;;  %2852 = vmatprep.mubr.bf16.mxu1 %v2467_v62 }
 0x1e5   :  { %1852 = vrot.lane.b32.xlu1 %v7376_v14, %s4790_s1  ;;  %2853 = vmatmul.mubr.bf16.gmra.mrb[44].mxu1 %v2212_v41  ;;  %v1396_v53 = vor.u32 %v1395_v57, %v1391_v47  ;;  %v1403_v57 = vshrl.u32 %v5605_v18, 16 }
 0x1e6   :  { %v1965_v30 = vpop.permute.xlu0 %1964  ;;  %2860 = vmatprep.mubr.bf16.mxu1 %v2470_v11  ;;  %v1773_v45 = vpop.permute.xlu1 %1772  ;;  %4559 = vmatmul.mubr.msk.bf16.gmra.mrb[92].mxu0 %vm289_vm0, %v4896_v38  ;;  %v2148_v38 = vsel %vm2138_vm6, %v2085_v21, %v5890_v34  ;;  %v2315_v21 = vsel %vm289_vm0, %v5566_v32, %v5978_v2  ;;  %v1407_v32 = vrot.slane %v1405_v33, 1  ;;  %v1410_v2 = vshll.u32 %v5597_v46, 16 }
 0x1e7   :  { %v2215_v44 = vsel %vm2201_vm7, %v2148_v38, %v1833_v20  ;;  %v6117_v60 = vsel %vm1137_vm4, %v1396_v53, %v1400_v42 }
 0x1e8   :  { %2040 = vrot.lane.b32.xlu0 %v6072_v26, %s4790_s1  ;;  %v1412_v33 = vrot.slane %v1410_v2, 1 }
 0x1e9   :  { %1792 = vrot.lane.b32.xlu1 %v5435_v52, %s4786_s11 }
 0x1ea   :  { %v1963_v28 = vpop.permute.xlu0 %1962  ;;  %v1713_v40 = vpop.permute.xlu1 %1712 }
 0x1eb   :  { %v2405_v51 = vsel %vm2138_vm6, %v2315_v21, %v1963_v28 }
 0x1ec   :  { %2052 = vrot.lane.b32.xlu0 %v6082_v58, %s4790_s1 }
 0x1ed   :  { %1862 = vrot.lane.b32.xlu1 %v5274_v48, %s4790_s1  ;;  %2861 = vmatmul.mubr.bf16.gmra.mrb[48].mxu1 %v2215_v44 }
 0x1ee   :  { %v6092_v52 = vpop.permute.xlu0 %1902  ;;  %v1711_v43 = vpop.permute.xlu1 %1710 }
 0x1ef   :  { %v2087_v37 = vsel %vm289_vm0, %v5144_v19, %v1711_v43 }
 0x1f0   :  { %1928 = vrot.lane.b32.xlu0 %v5524_v4, %s4789_s0  ;;  %v6098_v34 = vpop.f32.mrb[36].mxu0  ;;  %v2150_v19 = vsel %vm2138_vm6, %v2087_v37, %v1773_v45  ;;  %v1408_v37 = vor.u32 %v1407_v32, %v1403_v57  ;;  %v1415_v32 = vshrl.u32 %v5629_v10, 16 }
 0x1f1   :  { %1738 = vrot.lane.b32.xlu1 %v5468_v22, %s4789_s0  ;;  %v6102_v20 = vpop.f32.mrb[37].mxu0  ;;  %v2218_v45 = vsel %vm2201_vm7, %v2150_v19, %v5980_v49  ;;  %v2089_v49 = vsel %vm289_vm0, %v5111_v39, %v1713_v40 }
 0x1f2   :  { %v1901_v13 = vpop.permute.xlu0 %1900  ;;  %v6104_v62 = vpop.permute.xlu1 %1838  ;;  %v2152_v19 = vsel %vm2138_vm6, %v2089_v49, %v6050_v1 }
 0x1f3   :  { %v6106_v41 = vpop.f32.mrb[38].mxu0 }
 0x1f4   :  { %1992 = vrot.lane.b32.xlu0 %v5508_v31, %s4786_s11  ;;  %v6110_v6 = vpop.f32.mrb[39].mxu0 }
 0x1f5   :  { %1800 = vrot.lane.b32.xlu1 %v5362_v3, %s4786_s11  ;;  %v2318_v3 = vsel %vm289_vm0, %v5662_v16, %v1901_v13 }
 0x1f6   :  { %v2027_v11 = vpop.permute.xlu0 %2026  ;;  %v1837_v23 = vpop.permute.xlu1 %1836  ;;  %v2407_v28 = vsel %vm2138_vm6, %v2318_v3, %v1965_v30  ;;  %v6161_v3 = vsel %vm1137_vm4, %v1408_v37, %v1412_v33 }
 0x1f7   :  { %v2476_v13 = vsel %vm2201_vm7, %v2407_v28, %v2027_v11  ;;  %v2221_v39 = vsel %vm2201_vm7, %v2152_v19, %v1837_v23  ;;  %v7390_v28 = vld [vmem:[#allocation37_spill] sm:$0xff] }
 0x1f8   :  { %2054 = vrot.lane.b32.xlu0 %v6117_v60, %s4790_s1 }
 0x1f9   :  { %1730 = vrot.lane.b32.xlu1 %v6072_v26, %s4789_s0  ;;  %v6130_v38 = vpop.f32.mrb[40].mxu0 }
 0x1fa   :  { %7383 = vst [vmem:[#allocation12_spill] sm:$0xff] %v6130_v38  ;;  %v2025_v44 = vpop.permute.xlu0 %2024  ;;  %v6133_v43 = vpop.permute.xlu1 %1778 }
 0x1fb   :  { %v2473_v47 = vsel %vm2201_vm7, %v2405_v51, %v2025_v44  ;;  %v6138_v16 = vpop.f32.mrb[41].mxu0  ;;  %v1417_v51 = vshll.u32 %v5629_v10, 16 }
 0x1fc   :  { %1930 = vrot.lane.b32.xlu0 %v5531_v12, %s4789_s0  ;;  %2868 = vmatprep.mubr.bf16.mxu1 %v2473_v47  ;;  %v6145_v0 = vpop.f32.mrb[42].mxu0 }
 0x1fd   :  { %7384 = vst [vmem:[#allocation67_spill] sm:$0xff] %v6145_v0  ;;  %1864 = vrot.lane.b32.xlu1 %v5498_v50, %s4790_s1  ;;  %2869 = vmatmul.mubr.bf16.gmra.mrb[52].mxu1 %v2218_v45  ;;  %v6150_v46 = vpop.f32.mrb[43].mxu0  ;;  %v1419_v2 = vrot.slane %v1417_v51, 1  ;;  %v1422_v45 = vshll.u32 %v5618_v24, 16  ;;  %v7395_v51 = vld [vmem:[#allocation14_spill] sm:$0xff] }
 0x1fe   :  { %7385 = vst [vmem:[#allocation68_spill] sm:$0xff] %v6150_v46  ;;  %v1969_v53 = vpop.permute.xlu0 %1968  ;;  %2876 = vmatprep.mubr.bf16.mxu1 %v2476_v13  ;;  %v1777_v42 = vpop.permute.xlu1 %1776 }
 0x1ff   :  { %v1420_v33 = vor.u32 %v1419_v2, %v1415_v32  ;;  %v1424_v49 = vrot.slane %v1422_v45, 1  ;;  %v1429_v32 = vshll.u32 %v5715_v29, 16  ;;  %v2321_v2 = vsel %vm289_vm0, %v5651_v8, %v6092_v52  ;;  %v7396_v45 = vld [vmem:[#allocation54_spill] sm:$0xff] }
 0x200   :  { %1994 = vrot.lane.b32.xlu0 %v5605_v18, %s4786_s11  ;;  %v1427_v8 = vshrl.u32 %v5715_v29, 16 }
 0x201   :  { %1740 = vrot.lane.b32.xlu1 %v6082_v58, %s4789_s0  ;;  %v6158_v30 = vpop.f32.mrb[44].mxu0  ;;  %v1431_v52 = vrot.slane %v1429_v32, 1 }
 0x202   :  { %7386 = vst [vmem:[#allocation69_spill] sm:$0xff] %v6158_v30  ;;  %v1967_v21 = vpop.permute.xlu0 %1966  ;;  %v1717_v11 = vpop.permute.xlu1 %1716 }
 0x203   :  { %v6166_v44 = vpop.f32.mrb[45].mxu0 }
 0x204   :  { %7387 = vst [vmem:[#allocation70_spill] sm:$0xff] %v6166_v44  ;;  %2056 = vrot.lane.b32.xlu0 %v6161_v3, %s4790_s1  ;;  %v6171_v40 = vpop.f32.mrb[46].mxu0 }
 0x205   :  { %7388 = vst [vmem:[#allocation71_spill] sm:$0xff] %v6171_v40  ;;  %1802 = vrot.lane.b32.xlu1 %v5524_v4, %s4786_s11  ;;  %2877 = vmatmul.mubr.bf16.gmra.mrb[56].mxu1 %v2221_v39  ;;  %v6175_v47 = vpop.f32.mrb[47].mxu0 }
 0x206   :  { %7389 = vst [vmem:[#allocation72_spill] sm:$0xff] %v6175_v47  ;;  %v6177_v57 = vpop.permute.xlu0 %1906 }
 0x207   :  { %v1715_v1 = vpop.permute.xlu1 %1714 }
 0x208   :  { %1932 = vrot.lane.b32.xlu0 %v7390_v28, %s4789_s0  ;;  %v2091_v39 = vsel %vm289_vm0, %v7395_v51, %v1715_v1 }
 0x209   :  { %1866 = vrot.lane.b32.xlu1 %v5508_v31, %s4790_s1  ;;  %v6185_v23 = vpop.f32.mrb[48].mxu0  ;;  %v2154_v1 = vsel %vm2138_vm6, %v2091_v39, %v1777_v42 }
 0x20a   :  { %7391 = vst [vmem:[#allocation37_spill] sm:$0xff] %v6185_v23  ;;  %v1905_v4 = vpop.permute.xlu0 %1904  ;;  %v6187_v13 = vpop.f32.mrb[49].mxu0  ;;  %v2224_v42 = vsel %vm2201_vm7, %v2154_v1, %v6104_v62 }
 0x20b   :  { %7392 = vst [vmem:[#allocation73_spill] sm:$0xff] %v6187_v13  ;;  %v6189_v37 = vpop.permute.xlu1 %1842  ;;  %v6191_v19 = vpop.f32.mrb[50].mxu0  ;;  %v6202_v13 = vsel %vm1137_vm4, %v1420_v33, %v1424_v49  ;;  %v2409_v33 = vsel %vm2138_vm6, %v2321_v2, %v1967_v21 }
 0x20c   :  { %7393 = vst [vmem:[#allocation74_spill] sm:$0xff] %v6191_v19  ;;  %1996 = vrot.lane.b32.xlu0 %v5629_v10, %s4786_s11  ;;  %v6195_v24 = vpop.f32.mrb[51].mxu0  ;;  %v2324_v19 = vsel %vm289_vm0, %v7396_v45, %v1905_v4  ;;  %v7399_v4 = vld [vmem:[#allocation45_spill] sm:$0xff] }
 0x20d   :  { %7394 = vst [vmem:[#allocation75_spill] sm:$0xff] %v6195_v24  ;;  %1742 = vrot.lane.b32.xlu1 %v6117_v60, %s4789_s0  ;;  %v1434_v45 = vshll.u32 %v7399_v4, 16  ;;  %v2411_v21 = vsel %vm2138_vm6, %v2324_v19, %v1969_v53 }
 0x20e   :  { %v2031_v23 = vpop.permute.xlu0 %2030 }
 0x20f   :  { %v1841_v40 = vpop.permute.xlu1 %1840  ;;  %v2482_v32 = vsel %vm2201_vm7, %v2411_v21, %v2031_v23  ;;  %v1436_v4 = vrot.slane %v1434_v45, 1 }
 0x210   :  { %2058 = vrot.lane.b32.xlu0 %v6202_v13, %s4790_s1 }
 0x211   :  { %1804 = vrot.lane.b32.xlu1 %v5531_v12, %s4786_s11  ;;  %v6215_v51 = vpop.f32.mrb[52].mxu0  ;;  %v7401_v12 = vld [vmem:[#allocation40_spill] sm:$0xff] }
 0x212   :  { %7397 = vst [vmem:[#allocation14_spill] sm:$0xff] %v6215_v51  ;;  %v2029_v49 = vpop.permute.xlu0 %2028  ;;  %v6218_v24 = vpop.f32.mrb[53].mxu0 }
 0x213   :  { %7398 = vst [vmem:[#allocation54_spill] sm:$0xff] %v6218_v24  ;;  %v6220_v30 = vpop.permute.xlu1 %1782  ;;  %v2479_v47 = vsel %vm2201_vm7, %v2409_v33, %v2029_v49  ;;  %v6225_v44 = vpop.f32.mrb[54].mxu0  ;;  %v1432_v49 = vor.u32 %v1431_v52, %v1427_v8 }
 0x214   :  { %7400 = vst [vmem:[#allocation45_spill] sm:$0xff] %v6225_v44  ;;  %1934 = vrot.lane.b32.xlu0 %v7401_v12, %s4789_s0  ;;  %2884 = vmatprep.mubr.bf16.mxu1 %v2479_v47  ;;  %v6232_v39 = vpop.f32.mrb[55].mxu0  ;;  %v7403_v44 = vld [vmem:[#allocation13_spill] sm:$0xff] }
 0x215   :  { %7402 = vst [vmem:[#allocation40_spill] sm:$0xff] %v6232_v39  ;;  %1868 = vrot.lane.b32.xlu1 %v5605_v18, %s4790_s1  ;;  %2885 = vmatmul.mubr.bf16.gmra.mrb[60].mxu1 %v2224_v42  ;;  %v2093_v47 = vsel %vm289_vm0, %v7403_v44, %v1717_v11  ;;  %v6248_v1 = vsel %vm1137_vm4, %v1432_v49, %v1436_v4  ;;  %v7407_v11 = vld [vmem:[#allocation47_spill] sm:$0xff]  ;;  %v7409_v4 = vld [vmem:[#allocation46_spill] sm:$0xff] }
 0x216   :  { %v1973_v2 = vpop.permute.xlu0 %1972  ;;  %2892 = vmatprep.mubr.bf16.mxu1 %v2482_v32  ;;  %v2156_v8 = vsel %vm2138_vm6, %v2093_v47, %v6133_v43  ;;  %v1441_v44 = vshll.u32 %v7407_v11, 16  ;;  %v1439_v43 = vshrl.u32 %v7407_v11, 16  ;;  %v1446_v47 = vshll.u32 %v7409_v4, 16  ;;  %v7415_v4 = vld [vmem:[#allocation17_spill] sm:$0xff] }
 0x217   :  { %v1781_v33 = vpop.permute.xlu1 %1780  ;;  %v2227_v45 = vsel %vm2201_vm7, %v2156_v8, %v1841_v40 }
 0x218   :  { %1998 = vrot.lane.b32.xlu0 %v5715_v29, %s4786_s11  ;;  %v1443_v49 = vrot.slane %v1441_v44, 1 }
 0x219   :  { %1744 = vrot.lane.b32.xlu1 %v6161_v3, %s4789_s0  ;;  %v6243_v62 = vpop.f32.mrb[56].mxu0 }
 0x21a   :  { %7404 = vst [vmem:[#allocation13_spill] sm:$0xff] %v6243_v62  ;;  %v1971_v53 = vpop.permute.xlu0 %1970  ;;  %v6245_v19 = vpop.f32.mrb[57].mxu0 }
 0x21b   :  { %7405 = vst [vmem:[#allocation76_spill] sm:$0xff] %v6245_v19  ;;  %v1721_v23 = vpop.permute.xlu1 %1720  ;;  %v6252_v52 = vpop.f32.mrb[58].mxu0 }
 0x21c   :  { %7406 = vst [vmem:[#allocation77_spill] sm:$0xff] %v6252_v52  ;;  %2060 = vrot.lane.b32.xlu0 %v6248_v1, %s4790_s1  ;;  %v6258_v42 = vpop.f32.mrb[59].mxu0  ;;  %v7410_v52 = vld [vmem:[#allocation49_spill] sm:$0xff] }
 0x21d   :  { %7408 = vst [vmem:[#allocation47_spill] sm:$0xff] %v6258_v42  ;;  %1806 = vrot.lane.b32.xlu1 %v7390_v28, %s4786_s11  ;;  %2893 = vmatmul.mubr.bf16.gmra.mrb[64].mxu1 %v2227_v45  ;;  %v1444_v45 = vor.u32 %v1443_v49, %v1439_v43  ;;  %v1448_v42 = vrot.slane %v1446_v47, 1  ;;  %v7416_v43 = vld [vmem:[#allocation20_spill] sm:$0xff]  ;;  %v7417_v47 = vld [vmem:[#allocation51_spill] sm:$0xff] }
 0x21e   :  { %v6262_v21 = vpop.permute.xlu0 %1910  ;;  %v1453_v49 = vshll.u32 %v7416_v43, 16 }
 0x21f   :  { %v1719_v32 = vpop.permute.xlu1 %1718 }
 0x220   :  { %1936 = vrot.lane.b32.xlu0 %v7410_v52, %s4789_s0 }
 0x221   :  { %1870 = vrot.lane.b32.xlu1 %v5629_v10, %s4790_s1  ;;  %v6270_v40 = vpop.f32.mrb[60].mxu0 }
 0x222   :  { %7411 = vst [vmem:[#allocation46_spill] sm:$0xff] %v6270_v40  ;;  %v1909_v8 = vpop.permute.xlu0 %1908  ;;  %v6272_v62 = vpop.f32.mrb[61].mxu0  ;;  %v2095_v40 = vsel %vm289_vm0, %v7415_v4, %v1719_v32 }
 0x223   :  { %7412 = vst [vmem:[#allocation49_spill] sm:$0xff] %v6272_v62  ;;  %v6274_v28 = vpop.permute.xlu1 %1846  ;;  %v6276_v19 = vpop.f32.mrb[62].mxu0  ;;  %v6287_v62 = vsel %vm1137_vm4, %v1444_v45, %v1448_v42  ;;  %v2158_v42 = vsel %vm2138_vm6, %v2095_v40, %v1781_v33 }
 0x224   :  { %7413 = vst [vmem:[#allocation78_spill] sm:$0xff] %v6276_v19  ;;  %2000 = vrot.lane.b32.xlu0 %v7407_v11, %s4786_s11  ;;  %v6280_v44 = vpop.f32.mrb[63].mxu0  ;;  %v2327_v19 = vsel %vm289_vm0, %v7417_v47, %v6177_v57  ;;  %v7421_v47 = vld [vmem:[#allocation57_spill] sm:$0xff]  ;;  %v2230_v33 = vsel %vm2201_vm7, %v2158_v42, %v6189_v37 }
 0x225   :  { %7414 = vst [vmem:[#allocation79_spill] sm:$0xff] %v6280_v44  ;;  %1746 = vrot.lane.b32.xlu1 %v6202_v13, %s4789_s0  ;;  %v2330_v44 = vsel %vm289_vm0, %v5852_v5, %v1909_v8  ;;  %v2413_v45 = vsel %vm2138_vm6, %v2327_v19, %v1971_v53  ;;  %v1451_v5 = vshrl.u32 %v7416_v43, 16  ;;  %v1455_v8 = vrot.slane %v1453_v49, 1 }
 0x226   :  { %v2035_v51 = vpop.permute.xlu0 %2034  ;;  %v2415_v53 = vsel %vm2138_vm6, %v2330_v44, %v1973_v2 }
 0x227   :  { %v1845_v39 = vpop.permute.xlu1 %1844  ;;  %v2488_v40 = vsel %vm2201_vm7, %v2415_v53, %v2035_v51 }
 0x228   :  { %2062 = vrot.lane.b32.xlu0 %v6287_v62, %s4790_s1 }
 0x229   :  { %1808 = vrot.lane.b32.xlu1 %v7401_v12, %s4786_s11  ;;  %v6299_v32 = vpop.f32.mrb[64].mxu0  ;;  %v1458_v12 = vshll.u32 %v7421_v47, 16 }
 0x22a   :  { %7418 = vst [vmem:[#allocation17_spill] sm:$0xff] %v6299_v32  ;;  %v2033_v4 = vpop.permute.xlu0 %2032  ;;  %v6303_v24 = vpop.f32.mrb[65].mxu0  ;;  %v7422_v32 = vld [vmem:[#allocation50_spill] sm:$0xff] }
 0x22b   :  { %7419 = vst [vmem:[#allocation20_spill] sm:$0xff] %v6303_v24  ;;  %v6305_v0 = vpop.permute.xlu1 %1786  ;;  %v2485_v38 = vsel %vm2201_vm7, %v2413_v45, %v2033_v4  ;;  %v6308_v57 = vpop.f32.mrb[66].mxu0  ;;  %v1456_v4 = vor.u32 %v1455_v8, %v1451_v5  ;;  %v1460_v47 = vrot.slane %v1458_v12, 1  ;;  %v1475_v24 = vshrl.u32 %v5895_v17, 16 }
 0x22c   :  { %7420 = vst [vmem:[#allocation51_spill] sm:$0xff] %v6308_v57  ;;  %1938 = vrot.lane.b32.xlu0 %v7422_v32, %s4789_s0  ;;  %2900 = vmatprep.mubr.bf16.mxu1 %v2485_v38  ;;  %v6317_v19 = vpop.f32.mrb[67].mxu0  ;;  %v7424_v57 = vld [vmem:[#allocation18_spill] sm:$0xff] }
 0x22d   :  { %7423 = vst [vmem:[#allocation57_spill] sm:$0xff] %v6317_v19  ;;  %1872 = vrot.lane.b32.xlu1 %v5715_v29, %s4790_s1  ;;  %2901 = vmatmul.mubr.bf16.gmra.mrb[68].mxu1 %v2230_v33  ;;  %v2097_v38 = vsel %vm289_vm0, %v7424_v57, %v1721_v23  ;;  %v6333_v42 = vsel %vm1137_vm4, %v1456_v4, %v1460_v47  ;;  %v7428_v23 = vld [vmem:[#allocation59_spill] sm:$0xff]  ;;  %v7430_v47 = vld [vmem:[#allocation58_spill] sm:$0xff]  ;;  %v1477_v19 = vshll.u32 %v5895_v17, 16 }
 0x22e   :  { %v1977_v49 = vpop.permute.xlu0 %1976  ;;  %2908 = vmatprep.mubr.bf16.mxu1 %v2488_v40  ;;  %v2160_v5 = vsel %vm2138_vm6, %v2097_v38, %v6220_v30  ;;  %v1465_v57 = vshll.u32 %v7428_v23, 16  ;;  %v1463_v30 = vshrl.u32 %v7428_v23, 16  ;;  %v1470_v38 = vshll.u32 %v7430_v47, 16 }
 0x22f   :  { %v1785_v45 = vpop.permute.xlu1 %1784  ;;  %v2233_v12 = vsel %vm2201_vm7, %v2160_v5, %v1845_v39  ;;  %v1479_v46 = vrot.slane %v1477_v19, 1 }
 0x230   :  { %2002 = vrot.lane.b32.xlu0 %v7416_v43, %s4786_s11  ;;  %v1467_v4 = vrot.slane %v1465_v57, 1  ;;  %v7432_v57 = vld [vmem:[#allocation23_spill] sm:$0xff] }
 0x231   :  { %1748 = vrot.lane.b32.xlu1 %v6248_v1, %s4789_s0  ;;  %v6328_v37 = vpop.f32.mrb[68].mxu0 }
 0x232   :  { %7425 = vst [vmem:[#allocation50_spill] sm:$0xff] %v6328_v37  ;;  %v1975_v2 = vpop.permute.xlu0 %1974  ;;  %v6330_v44 = vpop.f32.mrb[69].mxu0  ;;  %v1468_v37 = vor.u32 %v1467_v4, %v1463_v30  ;;  %v2333_v30 = vsel %vm289_vm0, %v5838_v56, %v6262_v21  ;;  %v1482_v56 = vshll.u32 %v5877_v25, 16  ;;  %v7433_v21 = vld [vmem:[#allocation21_spill] sm:$0xff] }
 0x233   :  { %7426 = vst [vmem:[#allocation18_spill] sm:$0xff] %v6330_v44  ;;  %v1725_v51 = vpop.permute.xlu1 %1724  ;;  %v6337_v8 = vpop.f32.mrb[70].mxu0 }
 0x234   :  { %7427 = vst [vmem:[#allocation80_spill] sm:$0xff] %v6337_v8  ;;  %2064 = vrot.lane.b32.xlu0 %v6333_v42, %s4790_s1  ;;  %v6343_v33 = vpop.f32.mrb[71].mxu0  ;;  %v7431_v8 = vld [vmem:[#allocation60_spill] sm:$0xff]  ;;  %v1484_v25 = vrot.slane %v1482_v56, 1 }
 0x235   :  { %7429 = vst [vmem:[#allocation59_spill] sm:$0xff] %v6343_v33  ;;  %1810 = vrot.lane.b32.xlu1 %v7410_v52, %s4786_s11  ;;  %2909 = vmatmul.mubr.bf16.gmra.mrb[72].mxu1 %v2233_v12  ;;  %v1472_v52 = vrot.slane %v1470_v38, 1 }
 0x236   :  { %v6347_v53 = vpop.permute.xlu0 %1914 }
 0x237   :  { %v1723_v40 = vpop.permute.xlu1 %1722  ;;  %v6364_v44 = vsel %vm1137_vm4, %v1468_v37, %v1472_v52  ;;  %v2417_v37 = vsel %vm2138_vm6, %v2333_v30, %v1975_v2 }
 0x238   :  { %1940 = vrot.lane.b32.xlu0 %v7431_v8, %s4789_s0  ;;  %v2099_v12 = vsel %vm289_vm0, %v7432_v57, %v1723_v40 }
 0x239   :  { %1874 = vrot.lane.b32.xlu1 %v7407_v11, %s4790_s1  ;;  %v2162_v40 = vsel %vm2138_vm6, %v2099_v12, %v1785_v45  ;;  %v7434_v12 = vld [vmem:[#allocation22_spill] sm:$0xff] }
 0x23a   :  { %v1913_v39 = vpop.permute.xlu0 %1912  ;;  %v2101_v30 = vsel %vm289_vm0, %v7434_v12, %v1725_v51 }
 0x23b   :  { %v6355_v5 = vpop.permute.xlu1 %1850  ;;  %v2336_v4 = vsel %vm289_vm0, %v5966_v9, %v1913_v39  ;;  %v2236_v9 = vsel %vm2201_vm7, %v2162_v40, %v6274_v28  ;;  %v1480_v39 = vor.u32 %v1479_v46, %v1475_v24  ;;  %v1489_v46 = vshll.u32 %v5915_v15, 16 }
 0x23c   :  { %2004 = vrot.lane.b32.xlu0 %v7428_v23, %s4786_s11 }
 0x23d   :  { %1750 = vrot.lane.b32.xlu1 %v6287_v62, %s4789_s0 }
 0x23e   :  { %v2039_v47 = vpop.permute.xlu0 %2038 }
 0x23f   :  { %v1849_v33 = vpop.permute.xlu1 %1848 }
 0x240   :  { %2066 = vrot.lane.b32.xlu0 %v6364_v44, %s4790_s1 }
 0x241   :  { %1812 = vrot.lane.b32.xlu1 %v7422_v32, %s4786_s11  ;;  %v2419_v32 = vsel %vm2138_vm6, %v2336_v4, %v1977_v49  ;;  %v6398_v4 = vsel %vm1137_vm4, %v1480_v39, %v1484_v25  ;;  %v7439_v39 = vld [vmem:[#allocation24_spill] sm:$0xff] }
 0x242   :  { %v2037_v38 = vpop.permute.xlu0 %2036  ;;  %v2494_v45 = vsel %vm2201_vm7, %v2419_v32, %v2039_v47  ;;  %v2164_v47 = vsel %vm2138_vm6, %v2101_v30, %v6305_v0  ;;  %v7435_v0 = vld [vmem:[#allocation15_spill] sm:$0xff] }
 0x243   :  { %v6378_v52 = vpop.permute.xlu1 %1790  ;;  %v2491_v57 = vsel %vm2201_vm7, %v2417_v37, %v2037_v38  ;;  %v2239_v24 = vsel %vm2201_vm7, %v2164_v47, %v1849_v33  ;;  %v1487_v37 = vshrl.u32 %v5915_v15, 16  ;;  %v1491_v38 = vrot.slane %v1489_v46, 1 }
 0x244   :  { %1942 = vrot.lane.b32.xlu0 %v7433_v21, %s4789_s0  ;;  %2916 = vmatprep.mubr.bf16.mxu1 %v2491_v57  ;;  %v1494_v57 = vshll.u32 %v5900_v35, 16 }
 0x245   :  { %1876 = vrot.lane.b32.xlu1 %v7416_v43, %s4790_s1  ;;  %2917 = vmatmul.mubr.bf16.gmra.mrb[76].mxu1 %v2236_v9  ;;  %v1492_v32 = vor.u32 %v1491_v38, %v1487_v37  ;;  %v7442_v38 = vld [vmem:[#allocation29_spill] sm:$0xff] }
 0x246   :  { %v1981_v2 = vpop.permute.xlu0 %1980  ;;  %2924 = vmatprep.mubr.bf16.mxu1 %v2494_v45  ;;  %v1496_v45 = vrot.slane %v1494_v57, 1  ;;  %v2339_v57 = vsel %vm289_vm0, %v7442_v38, %v6347_v53 }
 0x247   :  { %v1789_v19 = vpop.permute.xlu1 %1788 }
 0x248   :  { %2006 = vrot.lane.b32.xlu0 %v5895_v17, %s4786_s11  ;;  %v6431_v46 = vsel %vm1137_vm4, %v1492_v32, %v1496_v45  ;;  %v4699_v32 = vld [vmem:[%s7224_s5] sm:$0xff]  }
 0x249   :  { %1752 = vrot.lane.b32.xlu1 %v6333_v42, %s4789_s0  ;;  %4562 = vmatprep.subr.bf16.mxu0 %v4699_v32 }
 0x24a   :  { %v1979_v28 = vpop.permute.xlu0 %1978  ;;  %4563 = vmatpush3.bf16.msra.mxu0 %v4699_v32 }
 0x24b   :  { %v1729_v49 = vpop.permute.xlu1 %1728  ;;  %v2421_v45 = vsel %vm2138_vm6, %v2339_v57, %v1979_v28 }
 0x24c   :  { %2068 = vrot.lane.b32.xlu0 %v6398_v4, %s4790_s1  ;;  %v6412_v56 = vpop.f32.mrb[72].mxu0 }
 0x24d   :  { %1814 = vrot.lane.b32.xlu1 %v7431_v8, %s4786_s11  ;;  %2925 = vmatmul.mubr.bf16.gmra.mrb[80].mxu1 %v2239_v24  ;;  %7436 = vst [vmem:[#allocation58_spill] sm:$0xff] %v6412_v56  ;;  %v6416_v33 = vpop.f32.mrb[73].mxu0  ;;  %v7441_v24 = vld [vmem:[#allocation66_spill] sm:$0xff] }
 0x24e   :  { %v1919_v51 = vpop.permute.xlu0 %1918  ;;  %7437 = vst [vmem:[#allocation60_spill] sm:$0xff] %v6416_v33  ;;  %v6424_v35 = vpop.f32.mrb[74].mxu0  ;;  %v1501_v37 = vshll.u32 %v7441_v24, 16  ;;  %v1499_v53 = vshrl.u32 %v7441_v24, 16  ;;  %v7443_v33 = vld [vmem:[#allocation30_spill] sm:$0xff] }
 0x24f   :  { %v1727_v40 = vpop.permute.xlu1 %1726  ;;  %7438 = vst [vmem:[#allocation23_spill] sm:$0xff] %v6424_v35  ;;  %v6428_v30 = vpop.f32.mrb[75].mxu0 }
 0x250   :  { %1944 = vrot.lane.b32.xlu0 %v7435_v0, %s4789_s0  ;;  %v2103_v25 = vsel %vm289_vm0, %v7439_v39, %v1727_v40  ;;  %7440 = vst [vmem:[#allocation21_spill] sm:$0xff] %v6428_v30  ;;  %v1503_v38 = vrot.slane %v1501_v37, 1 }
 0x251   :  { %1878 = vrot.lane.b32.xlu1 %v7428_v23, %s4790_s1  ;;  %v2166_v40 = vsel %vm2138_vm6, %v2103_v25, %v1789_v19 }
 0x252   :  { %v1917_v9 = vpop.permute.xlu0 %1916  ;;  %v2242_v19 = vsel %vm2201_vm7, %v2166_v40, %v6355_v5  ;;  %v7445_v5 = vld [vmem:[#allocation27_spill] sm:$0xff] }
 0x253   :  { %v6418_v8 = vpop.permute.xlu1 %1854  ;;  %v2342_v35 = vsel %vm289_vm0, %v6072_v26, %v1917_v9  ;;  %v1506_v26 = vshll.u32 %v7443_v33, 16  ;;  %v2345_v33 = vsel %vm289_vm0, %v6055_v36, %v1919_v51 }
 0x254   :  { %2008 = vrot.lane.b32.xlu0 %v5915_v15, %s4786_s11  ;;  %v2423_v9 = vsel %vm2138_vm6, %v2342_v35, %v1981_v2  ;;  %v2105_v2 = vsel %vm289_vm0, %v7445_v5, %v1729_v49  ;;  %v1681_v49 = vshll.u32 %v6013_v7, 16 }
 0x255   :  { %1754 = vrot.lane.b32.xlu1 %v6364_v44, %s4789_s0  ;;  %v1508_v57 = vrot.slane %v1506_v26, 1  ;;  %v2168_v51 = vsel %vm2138_vm6, %v2105_v2, %v6378_v52  ;;  %v6495_v52 = vld [vmem:[%s7223_s4] ss:$0 sm:$0xff] }
 0x256   :  { %v2043_v12 = vpop.permute.xlu0 %2042 }
 0x257   :  { %v1853_v47 = vpop.permute.xlu1 %1852  ;;  %v2500_v28 = vsel %vm2201_vm7, %v2423_v9, %v2043_v12  ;;  %v7446_v12 = vld [vmem:[#allocation34_spill] sm:$0xff]  ;;  %v1686_v9 = vshll.u32 %v6002_v61, 16 }
 0x258   :  { %2070 = vrot.lane.b32.xlu0 %v6431_v46, %s4790_s1  ;;  %v2425_v40 = vsel %vm2138_vm6, %v2345_v33, %v7446_v12 }
 0x259   :  { %1816 = vrot.lane.b32.xlu1 %v7433_v21, %s4786_s11  ;;  %v7444_v21 = vld [vmem:[#allocation31_spill] sm:$0xff] }
 0x25a   :  { %v2041_v39 = vpop.permute.xlu0 %2040 }
 0x25b   :  { %v1793_v56 = vpop.permute.xlu1 %1792  ;;  %v2497_v30 = vsel %vm2201_vm7, %v2421_v45, %v2041_v39  ;;  %v2245_v45 = vsel %vm2201_vm7, %v2168_v51, %v1853_v47  ;;  %v7447_v39 = vld [vmem:[#allocation35_spill] sm:$0xff]  ;;  %v1683_v47 = vrot.slane %v1681_v49, 1 }
 0x25c   :  { %1946 = vrot.lane.b32.xlu0 %v7444_v21, %s4789_s0  ;;  %2932 = vmatprep.mubr.bf16.mxu1 %v2497_v30  ;;  %v1504_v30 = vor.u32 %v1503_v38, %v1499_v53  ;;  %v2503_v53 = vsel %vm2201_vm7, %v2425_v40, %v7447_v39  ;;  %v1688_v39 = vrot.slane %v1686_v9, 1  ;;  %v7452_v9 = vld [vmem:[#allocation36_spill] sm:$0xff] }
 0x25d   :  { %1880 = vrot.lane.b32.xlu1 %v5895_v17, %s4790_s1  ;;  %2933 = vmatmul.mubr.bf16.gmra.mrb[84].mxu1 %v2242_v19  ;;  %v1679_v19 = vshrl.u32 %v6013_v7, 16 }
 0x25e   :  { %v6459_v25 = vpop.permute.xlu0 %2052  ;;  %2940 = vmatprep.mubr.bf16.mxu1 %v2500_v28  ;;  %v6478_v36 = vsel %vm1137_vm4, %v1504_v30, %v1508_v57  ;;  %v7448_v30 = vld [vmem:[#allocation42_spill] sm:$0xff]  ;;  %v7449_v57 = vld [vmem:[#allocation32_spill] sm:$0xff] }
 0x25f   :  { %v6463_v37 = vpop.permute.xlu1 %1862  ;;  %v2348_v5 = vsel %vm289_vm0, %v7449_v57, %v7448_v30 }
 0x260   :  { %2010 = vrot.lane.b32.xlu0 %v7441_v24, %s4786_s11  ;;  %v2427_v57 = vsel %vm2138_vm6, %v2348_v5, %v7452_v9 }
 0x261   :  { %1756 = vrot.lane.b32.xlu1 %v6398_v4, %s4789_s0 }
 0x262   :  { %v6471_v35 = vpop.permute.xlu0 %1928 }
 0x263   :  { %v6475_v32 = vpop.permute.xlu1 %1738 }
 0x264   :  { %2072 = vrot.lane.b32.xlu0 %v6478_v36, %s4790_s1 }
 0x265   :  { %1818 = vrot.lane.b32.xlu1 %v7435_v0, %s4786_s11  ;;  %2941 = vmatmul.mubr.bf16.gmra.mrb[88].mxu1 %v2245_v45 }
 0x266   :  { %v6490_v38 = vpop.permute.xlu0 %1992  ;;  %2948 = vmatprep.mubr.bf16.mxu1 %v2503_v53  ;;  %v1684_v53 = vor.u32 %v1683_v47, %v1679_v19  ;;  %v4700_v19 = vld [vmem:[%s7224_s5 + $0x8] sm:$0xff]  }
 0x267   :  { %v6497_v26 = vpop.permute.xlu1 %1800  ;;  %4564 = vmatprep.subr.bf16.mxu0 %v4700_v19 }
 0x268   :  { %1948 = vrot.lane.b32.xlu0 %v6016_v55, %s4789_s0  ;;  %v2830_v0 = vpop.f32.mrb[32].mxu1  ;;  %4565 = vmatpush3.bf16.msra.mxu0 %v4700_v19  ;;  %v7459_v19 = vld [vmem:[#allocation55_spill] sm:$0xff] }
 0x269   :  { %v2831_v28 = vadd.f32 %v6495_v52, %v2830_v0  ;;  %1882 = vrot.lane.b32.xlu1 %v5915_v15, %s4790_s1  ;;  %v2832_v33 = vpop.f32.mrb[33].mxu1 }
 0x26a   :  { %v6509_v2 = vpop.permute.xlu0 %2054  ;;  %v2833_v40 = vpop.f32.mrb[34].mxu1 }
 0x26b   :  { %v3120_v51 = vadd.f32 %v6030_v54, %v2831_v28  ;;  %v2834_v61 = vadd.f32 %v6495_v52, %v2833_v40  ;;  %v1731_v49 = vpop.permute.xlu1 %1730  ;;  %v2835_v45 = vpop.f32.mrb[35].mxu1 }
 0x26c   :  { %v2107_v0 = vsel %vm289_vm0, %v7376_v14, %v1731_v49  ;;  %2012 = vrot.lane.b32.xlu0 %v6013_v7, %s4786_s11  ;;  %v6517_v33 = vpop.f32.mrb[76].mxu0  ;;  %v7454_v45 = vld [vmem:[#allocation48_spill] sm:$0xff] }
 0x26d   :  { %7450 = vst [vmem:[#allocation22_spill] sm:$0xff] %v6517_v33  ;;  %v3123_v30 = vadd.f32 %v6058_v59, %v2834_v61  ;;  %1758 = vrot.lane.b32.xlu1 %v6431_v46, %s4789_s0  ;;  %v2170_v54 = vsel %vm2138_vm6, %v2107_v0, %v1793_v56  ;;  %v6523_v28 = vpop.f32.mrb[77].mxu0  ;;  %v3374_v40 = vmax.f32 %v3120_v51, 0.0  ;;  %v6539_v56 = vsel %vm1137_vm4, %v1684_v53, %v1688_v39  ;;  %v4701_v39 = vld [vmem:[%s7224_s5 + $0x10] sm:$0xff]   ;;  %v7457_v53 = vld [vmem:[#allocation39_spill] sm:$0xff] }
 0x26e   :  { %7451 = vst [vmem:[#allocation15_spill] sm:$0xff] %v6523_v28  ;;  %v6528_v47 = vpop.permute.xlu0 %1930  ;;  %v2248_v14 = vsel %vm2201_vm7, %v2170_v54, %v6418_v8  ;;  %v6534_v59 = vpop.f32.mrb[78].mxu0  ;;  %v2506_v0 = vsel %vm2201_vm7, %v2427_v57, %v7454_v45  ;;  %4566 = vmatprep.subr.bf16.mxu0 %v4701_v39  ;;  %v7460_v57 = vld [vmem:[#allocation41_spill] sm:$0xff]  ;;  %v7462_v45 = vld [vmem:[#allocation26_spill] sm:$0xff] }
 0x26f   :  { %7453 = vst [vmem:[#allocation24_spill] sm:$0xff] %v6534_v59  ;;  %v3375_v61 = vmax.f32 %v3123_v30, 0.0  ;;  %v6536_v49 = vpop.permute.xlu1 %1864  ;;  %2949 = vmatmul.mubr.bf16.gmra.mrb[92].mxu1 %v2248_v14  ;;  %v6543_v33 = vpop.f32.mrb[79].mxu0  ;;  %v7458_v30 = vld [vmem:[#allocation16_spill] sm:$0xff]  ;;  %4567 = vmatpush3.bf16.msra.mxu0 %v4701_v39  ;;  %v7463_v39 = vld [vmem:[#allocation62_spill] sm:$0xff] }
 0x270   :  { %7455 = vst [vmem:[#allocation29_spill] sm:$0xff] %v6543_v33  ;;  %2074 = vrot.lane.b32.xlu0 %v6539_v56, %s4790_s1  ;;  %2956 = vmatprep.mubr.bf16.mxu1 %v2506_v0  ;;  %v2351_v54 = vsel %vm289_vm0, %v7458_v30, %v7457_v53  ;;  %v7464_v53 = vld [vmem:[#allocation11_spill] sm:$0xff]  ;;  %v7472_v33 = vld [vmem:[#allocation56_spill] sm:$0xff] }
 0x271   :  { %v6547_v8 = vpack.c.bf16 %v3375_v61, %v3374_v40  ;;  %1820 = vrot.lane.b32.xlu1 %v7444_v21, %s4786_s11  ;;  %v4702_v21 = vld [vmem:[%s7224_s5 + $0x18] sm:$0xff]   ;;  %v2429_v14 = vsel %vm2138_vm6, %v2351_v54, %v7459_v19  ;;  %v2109_v30 = vsel %vm289_vm0, %v7464_v53, %v7463_v39  ;;  %v7465_v19 = vld [vmem:[#allocation25_spill] sm:$0xff]  ;;  %v4704_v39 = vld [vmem:[#allocation2] sm:$0xff]  }
 0x272   :  { %v6554_v5 = vpop.permute.xlu0 %1994  ;;  %v7461_v40 = vld [vmem:[#allocation43_spill] sm:$0xff]  ;;  %v2509_v0 = vsel %vm2201_vm7, %v2429_v14, %v7462_v45  ;;  %4568 = vmatprep.subr.bf16.mxu0 %v4702_v21  ;;  %v7469_v53 = vld [vmem:[#allocation53_spill] sm:$0xff] }
 0x273   :  { %7456 = vst [vmem:[#allocation30_spill] sm:$0xff] %v6547_v8  ;;  %v6556_v51 = vpop.permute.xlu1 %1740  ;;  %4569 = vmatpush3.bf16.msra.mxu0 %v4702_v21  ;;  %v7468_v21 = vld [vmem:[#allocation38_spill] sm:$0xff]  ;;  %v7477_v8 = vld [vmem:[#allocation63_spill] sm:$0xff] }
 0x274   :  { %1950 = vrot.lane.b32.xlu0 %v6033_v63, %s4789_s0  ;;  %v2251_v63 = vsel %vm2201_vm7, %v7461_v40, %v7460_v57  ;;  %v7466_v57 = vld [vmem:[#allocation33_spill] sm:$0xff] }
 0x275   :  { %1884 = vrot.lane.b32.xlu1 %v7441_v24, %s4790_s1  ;;  %v2354_v40 = vsel %vm289_vm0, %v7466_v57, %v7465_v19  ;;  %v7470_v57 = vld [vmem:[#allocation10_spill] sm:$0xff] }
 0x276   :  { %v6570_v9 = vpop.permute.xlu0 %2056  ;;  %v2431_v59 = vsel %vm2138_vm6, %v2354_v40, %v7469_v53 }
 0x277   :  { %v6575_v61 = vpop.permute.xlu1 %1802  ;;  %2957 = vmatmul.mubr.bf16.gmra.mrb[96].mxu1 %v2251_v63  ;;  %v7467_v63 = vld [vmem:[#allocation52_spill] sm:$0xff] }
 0x278   :  { %1822 = vrot.lane.b32.xlu0 %v6016_v55, %s4786_s11  ;;  %2964 = vmatprep.mubr.bf16.mxu1 %v2509_v0  ;;  %v2172_v45 = vsel %vm2138_vm6, %v2109_v30, %v7467_v63  ;;  %v2512_v30 = vsel %vm2201_vm7, %v2431_v59, %v7470_v57  ;;  %v4705_v63 = vld [vmem:[#allocation2 + $0x10] sm:$0xff]   ;;  %v7474_v59 = vld [vmem:[#allocation61_spill] sm:$0xff] }
 0x279   :  { %1760 = vrot.lane.b32.xlu1 %v6478_v36, %s4789_s0  ;;  %v2254_v0 = vsel %vm2201_vm7, %v2172_v45, %v7468_v21  ;;  %v7473_v45 = vld [vmem:[#allocation8_spill] sm:$0xff]  ;;  %v2357_v57 = vsel %vm289_vm0, %v5468_v22, %v7474_v59 }
 0x27a   :  { %v6586_v54 = vpop.permute.xlu0 %1932  ;;  %v2111_v21 = vsel %vm289_vm0, %v7473_v45, %v7472_v33  ;;  %v7476_v33 = vld [vmem:[#allocation64_spill] sm:$0xff] }
 0x27b   :  { %v6591_v14 = vpop.permute.xlu1 %1866  ;;  %v2433_v45 = vsel %vm2138_vm6, %v2357_v57, %v7476_v33  ;;  %v4710_v57 = vld [vmem:[#allocation2 + $0x28] sm:$0xff]  }
 0x27c   :  { %3470 = vrot.lane.b32.xlu0 %v4704_v39, %s4789_s0  ;;  %v4706_v39 = vld [vmem:[#allocation2 + $0x8] sm:$0xff]   ;;  %v2515_v22 = vsel %vm2201_vm7, %v2433_v45, %v6459_v25  ;;  %v2360_v25 = vsel %vm289_vm0, %v6082_v58, %v6471_v35  ;;  %v4712_v45 = vld [vmem:[#allocation2 + $0x38] sm:$0xff]   ;;  %v4713_v35 = vld [vmem:[#allocation2 + $0x50] sm:$0xff]  }
 0x27d   :  { %1886 = vrot.lane.b32.xlu1 %v6013_v7, %s4790_s1 }
 0x27e   :  { %v6598_v55 = vpop.permute.xlu0 %1996  ;;  %v6610_v7 = vpop.f32.mrb[80].mxu0 }
 0x27f   :  { %v6604_v19 = vpop.permute.xlu1 %1742  ;;  %2965 = vmatmul.mubr.bf16.gmra.mrb[100].mxu1 %v2254_v0  ;;  %7471 = vst [vmem:[#allocation31_spill] sm:$0xff] %v6610_v7  ;;  %v4707_v0 = vld [vmem:[#allocation2 + $0x20] sm:$0xff]   ;;  %v6626_v7 = vpop.f32.mrb[81].mxu0 }
 0x280   :  { %3474 = vrot.lane.b32.xlu0 %v4705_v63, %s4789_s0  ;;  %2972 = vmatprep.mubr.bf16.mxu1 %v2512_v30  ;;  %v4708_v30 = vld [vmem:[#allocation2 + $0x18] sm:$0xff]   ;;  %v7475_v63 = vld [vmem:[#allocation44_spill] sm:$0xff]  ;;  %v6634_v24 = vpop.f32.mrb[82].mxu0 }
 0x281   :  { %3472 = vrot.lane.b32.xlu1 %v4706_v39, %s4789_s0  ;;  %v2174_v39 = vsel %vm2138_vm6, %v2111_v21, %v7475_v63  ;;  %7478 = vst [vmem:[#allocation27_spill] sm:$0xff] %v6634_v24  ;;  %v6640_v59 = vpop.f32.mrb[83].mxu0  ;;  %v4709_v21 = vld [vmem:[#allocation2 + $0x30] sm:$0xff]   ;;  %v7480_v63 = vld [vmem:[#allocation19_spill] sm:$0xff] }
 0x282   :  { %v6615_v40 = vpop.permute.xlu0 %2058 }
 0x283   :  { %v6617_v53 = vpop.permute.xlu1 %1804 }
 0x284   :  { %3478 = vrot.lane.b32.xlu0 %v4707_v0, %s4789_s0  ;;  %v2257_v0 = vsel %vm2201_vm7, %v2174_v39, %v7477_v8 }
 0x285   :  { %3476 = vrot.lane.b32.xlu1 %v4708_v30, %s4789_s0  ;;  %v7479_v30 = vld [vmem:[#allocation65_spill] sm:$0xff] }
 0x286   :  { %v6630_v28 = vpop.permute.xlu0 %1934  ;;  %v2113_v8 = vsel %vm289_vm0, %v7480_v63, %v7479_v30 }
 0x287   :  { %v6636_v12 = vpop.permute.xlu1 %1868  ;;  %2973 = vmatmul.mubr.bf16.gmra.mrb[104].mxu1 %v2257_v0  ;;  %v4711_v0 = vld [vmem:[#allocation2 + $0x40] sm:$0xff]  }
 0x288   :  { %3482 = vrot.lane.b32.xlu0 %v4709_v21, %s4789_s0  ;;  %2980 = vmatprep.mubr.bf16.mxu1 %v2515_v22  ;;  %v7481_v22 = vld [vmem:[#allocation9_spill] sm:$0xff] }
 0x289   :  { %3480 = vrot.lane.b32.xlu1 %v4710_v57, %s4789_s0  ;;  %v2176_v21 = vsel %vm2138_vm6, %v2113_v8, %v7481_v22  ;;  %v2435_v57 = vsel %vm2138_vm6, %v2360_v25, %v6490_v38  ;;  %v4715_v25 = vld [vmem:[#allocation2 + $0x60] sm:$0xff]   ;;  %v4716_v22 = vld [vmem:[#allocation2 + $0x58] sm:$0xff]  }
 0x28a   :  { %v6647_v39 = vpop.permute.xlu0 %1998  ;;  %v2260_v63 = vsel %vm2201_vm7, %v2176_v21, %v6463_v37  ;;  %v2518_v58 = vsel %vm2201_vm7, %v2435_v57, %v6509_v2  ;;  %v2115_v37 = vsel %vm289_vm0, %v5274_v48, %v6475_v32 }
 0x28b   :  { %v6649_v33 = vpop.permute.xlu1 %1744  ;;  %v2178_v2 = vsel %vm2138_vm6, %v2115_v37, %v6497_v26 }
 0x28c   :  { %3486 = vrot.lane.b32.xlu0 %v4711_v0, %s4789_s0  ;;  %v4714_v0 = vld [vmem:[#allocation2 + $0x48] sm:$0xff]   ;;  %v2263_v48 = vsel %vm2201_vm7, %v2178_v2, %v6536_v49 }
 0x28d   :  { %3484 = vrot.lane.b32.xlu1 %v4712_v45, %s4789_s0  ;;  %v2363_v45 = vsel %vm289_vm0, %v6117_v60, %v6528_v47  ;;  %v4717_v60 = vld [vmem:[#allocation2 + $0x70] sm:$0xff]  }
 0x28e   :  { %v6660_v30 = vpop.permute.xlu0 %2060  ;;  %v2437_v21 = vsel %vm2138_vm6, %v2363_v45, %v6554_v5  ;;  %v4718_v5 = vld [vmem:[#allocation2 + $0x68] sm:$0xff]   ;;  %v2117_v45 = vsel %vm289_vm0, %v5498_v50, %v6556_v51 }
 0x28f   :  { %v6664_v24 = vpop.permute.xlu1 %1806  ;;  %2981 = vmatmul.mubr.bf16.gmra.mrb[108].mxu1 %v2260_v63  ;;  %v2521_v26 = vsel %vm2201_vm7, %v2437_v21, %v6570_v9  ;;  %v2180_v21 = vsel %vm2138_vm6, %v2117_v45, %v6575_v61 }
 0x290   :  { %2988 = vmatprep.mubr.bf16.mxu1 %v2518_v58  ;;  %3490 = vrot.lane.b32.xlu0 %v4713_v35, %s4789_s0 }
 0x291   :  { %3488 = vrot.lane.b32.xlu1 %v4714_v0, %s4789_s0 }
 0x292   :  { %v6670_v8 = vpop.permute.xlu0 %1936 }
 0x293   :  { %v6672_v38 = vpop.permute.xlu1 %1870 }
 0x294   :  { %3494 = vrot.lane.b32.xlu0 %v4715_v25, %s4789_s0 }
 0x295   :  { %3492 = vrot.lane.b32.xlu1 %v4716_v22, %s4789_s0  ;;  %v4719_v22 = vld [vmem:[#allocation2 + $0x80] sm:$0xff]  }
 0x296   :  { %v6686_v57 = vpop.permute.xlu0 %2000 }
 0x297   :  { %v6690_v32 = vpop.permute.xlu1 %1746  ;;  %2989 = vmatmul.mubr.bf16.gmra.mrb[112].mxu1 %v2263_v48  ;;  %v2366_v48 = vsel %vm289_vm0, %v6161_v3, %v6586_v54 }
 0x298   :  { %v2838_v63 = vpop.f32.mrb[36].mxu1  ;;  %2996 = vmatprep.mubr.bf16.mxu1 %v2521_v26  ;;  %3498 = vrot.lane.b32.xlu0 %v4717_v60, %s4789_s0  ;;  %v2439_v50 = vsel %vm2138_vm6, %v2366_v48, %v6598_v55  ;;  %v4721_v55 = vld [vmem:[#allocation2 + $0x90] sm:$0xff]  }
 0x299   :  { %v2839_v47 = vadd.f32 %v6495_v52, %v2838_v63  ;;  %v2840_v58 = vpop.f32.mrb[37].mxu1  ;;  %3496 = vrot.lane.b32.xlu1 %v4718_v5, %s4789_s0  ;;  %v6697_v35 = vpop.f32.mrb[84].mxu0  ;;  %v4720_v63 = vld [vmem:[#allocation2 + $0x78] sm:$0xff]   ;;  %v2524_v54 = vsel %vm2201_vm7, %v2439_v50, %v6615_v40  ;;  %v4723_v50 = vld [vmem:[#allocation2 + $0xa0] sm:$0xff]  }
 0x29a   :  { %v6699_v49 = vpop.permute.xlu0 %2062  ;;  %v2841_v0 = vpop.f32.mrb[38].mxu1 }
 0x29b   :  { %v3128_v37 = vadd.f32 %v6026_v27, %v2839_v47  ;;  %v2842_v9 = vadd.f32 %v6495_v52, %v2841_v0  ;;  %v6703_v25 = vpop.permute.xlu1 %1808  ;;  %v2843_v2 = vpop.f32.mrb[39].mxu1  ;;  %v7482_v27 = vld [vmem:[#allocation28_spill] sm:$0xff]  ;;  %v2266_v47 = vsel %vm2201_vm7, %v2180_v21, %v6591_v14 }
 0x29c   :  { %3502 = vrot.lane.b32.xlu0 %v4719_v22, %s4789_s0  ;;  %v6716_v60 = vpop.f32.mrb[85].mxu0 }
 0x29d   :  { %v3131_v26 = vadd.f32 %v7482_v27, %v2842_v9  ;;  %3500 = vrot.lane.b32.xlu1 %v4720_v63, %s4789_s0  ;;  %v6724_v61 = vpop.f32.mrb[86].mxu0  ;;  %v3376_v58 = vmax.f32 %v3128_v37, 0.0  ;;  %v4722_v37 = vld [vmem:[#allocation2 + $0x88] sm:$0xff]   ;;  %v2119_v63 = vsel %vm289_vm0, %v5508_v31, %v6604_v19 }
 0x29e   :  { %v6720_v51 = vpop.permute.xlu0 %1938  ;;  %v6730_v0 = vpop.f32.mrb[87].mxu0 }
 0x29f   :  { %v3377_v5 = vmax.f32 %v3131_v26, 0.0  ;;  %v6726_v3 = vpop.permute.xlu1 %1872  ;;  %2997 = vmatmul.mubr.bf16.gmra.mrb[116].mxu1 %v2266_v47  ;;  %v2182_v47 = vsel %vm2138_vm6, %v2119_v63, %v6617_v53  ;;  %v4726_v53 = vld [vmem:[#allocation2 + $0xa8] sm:$0xff]   ;;  %v4729_v63 = vld [vmem:[#allocation2 + $0xd0] sm:$0xff]  }
 0x2a0   :  { %v2846_v9 = vpop.f32.mrb[40].mxu1  ;;  %3004 = vmatprep.mubr.bf16.mxu1 %v2524_v54  ;;  %3506 = vrot.lane.b32.xlu0 %v4721_v55, %s4789_s0  ;;  %v2269_v31 = vsel %vm2201_vm7, %v2182_v47, %v6636_v12  ;;  %v2121_v12 = vsel %vm289_vm0, %v5605_v18, %v6649_v33  ;;  %v4731_v47 = vld [vmem:[#allocation2 + $0xe0] sm:$0xff]  }
 0x2a1   :  { %v6733_v2 = vpack.c.bf16 %v3377_v5, %v3376_v58  ;;  %v2847_v14 = vadd.f32 %v6495_v52, %v2846_v9  ;;  %v2848_v45 = vpop.f32.mrb[41].mxu1  ;;  %3504 = vrot.lane.b32.xlu1 %v4722_v37, %s4789_s0  ;;  %v2369_v58 = vsel %vm289_vm0, %v6202_v13, %v6630_v28  ;;  %v4724_v5 = vld [vmem:[#allocation2 + $0x98] sm:$0xff]   ;;  %v4727_v37 = vld [vmem:[#allocation2 + $0xc0] sm:$0xff]  }
 0x2a2   :  { %v2003_v22 = vpop.permute.xlu0 %2002  ;;  %v2849_v21 = vpop.f32.mrb[42].mxu1  ;;  %v2441_v54 = vsel %vm2138_vm6, %v2369_v58, %v6647_v39  ;;  %v2375_v58 = vsel %vm289_vm0, %v6287_v62, %v6720_v51  ;;  %v4733_v51 = vld [vmem:[#allocation2 + $0xf0] sm:$0xff]  }
 0x2a3   :  { %v3136_v48 = vadd.f32 %v6102_v20, %v2847_v14  ;;  %v2850_v40 = vadd.f32 %v6495_v52, %v2849_v21  ;;  %v6739_v27 = vpop.permute.xlu1 %1748  ;;  %v2851_v26 = vpop.f32.mrb[43].mxu1  ;;  %v2527_v13 = vsel %vm2201_vm7, %v2441_v54, %v6660_v30  ;;  %v2184_v30 = vsel %vm2138_vm6, %v2121_v12, %v6664_v24 }
 0x2a4   :  { %3510 = vrot.lane.b32.xlu0 %v4723_v50, %s4789_s0  ;;  %v2372_v21 = vsel %vm289_vm0, %v6248_v1, %v6670_v8  ;;  %v2272_v18 = vsel %vm2201_vm7, %v2184_v30, %v6672_v38  ;;  %v4730_v1 = vld [vmem:[#allocation2 + $0xc8] sm:$0xff]   ;;  %v2123_v38 = vsel %vm289_vm0, %v5629_v10, %v6690_v32  ;;  %v2445_v54 = vsel %vm2138_vm6, %v2375_v58, %v2003_v22 }
 0x2a5   :  { %v3139_v20 = vadd.f32 %v6110_v6, %v2850_v40  ;;  %3508 = vrot.lane.b32.xlu1 %v4724_v5, %s4789_s0  ;;  %v3378_v19 = vmax.f32 %v3136_v48, 0.0  ;;  %v4725_v6 = vld [vmem:[#allocation2 + $0xb0] sm:$0xff]   ;;  %v4728_v48 = vld [vmem:[#allocation2 + $0xb8] sm:$0xff]   ;;  %v2443_v40 = vsel %vm2138_vm6, %v2372_v21, %v6686_v57  ;;  %v2125_v21 = vsel %vm289_vm0, %v5715_v29, %v6739_v27 }
 0x2a6   :  { %v2065_v9 = vpop.permute.xlu0 %2064  ;;  %v2530_v24 = vsel %vm2201_vm7, %v2443_v40, %v6699_v49  ;;  %v2186_v49 = vsel %vm2138_vm6, %v2123_v38, %v6703_v25  ;;  %v4732_v5 = vld [vmem:[#allocation2 + $0xd8] sm:$0xff]  }
 0x2a7   :  { %v3379_v55 = vmax.f32 %v3139_v20, 0.0  ;;  %v6756_v14 = vpop.permute.xlu1 %1810  ;;  %3005 = vmatmul.mubr.bf16.gmra.mrb[120].mxu1 %v2269_v31  ;;  %v2275_v10 = vsel %vm2201_vm7, %v2186_v49, %v6726_v3  ;;  %v2533_v25 = vsel %vm2201_vm7, %v2445_v54, %v2065_v9 }
 0x2a8   :  { %3012 = vmatprep.mubr.bf16.mxu1 %v2527_v13  ;;  %3514 = vrot.lane.b32.xlu0 %v4725_v6, %s4789_s0  ;;  %v4734_v6 = vld [vmem:[#allocation2 + $0xe8] sm:$0xff]  }
 0x2a9   :  { %v6761_v28 = vpack.c.bf16 %v3379_v55, %v3378_v19  ;;  %3512 = vrot.lane.b32.xlu1 %v4726_v53, %s4789_s0 }
 0x2aa   :  { %v1941_v39 = vpop.permute.xlu0 %1940 }
 0x2ab   :  { %v1875_v45 = vpop.permute.xlu1 %1874  ;;  %v2378_v40 = vsel %vm289_vm0, %v6333_v42, %v1941_v39 }
 0x2ac   :  { %3518 = vrot.lane.b32.xlu0 %v4727_v37, %s4789_s0 }
 0x2ad   :  { %3516 = vrot.lane.b32.xlu1 %v4728_v48, %s4789_s0  ;;  %v2188_v48 = vsel %vm2138_vm6, %v2125_v21, %v6756_v14 }
 0x2ae   :  { %v2005_v26 = vpop.permute.xlu0 %2004 }
 0x2af   :  { %v6778_v33 = vpop.permute.xlu1 %1750  ;;  %3013 = vmatmul.mubr.bf16.gmra.mrb[124].mxu1 %v2272_v18 }
 0x2b0   :  { %3020 = vmatprep.mubr.bf16.mxu1 %v2530_v24  ;;  %3522 = vrot.lane.b32.xlu0 %v4729_v63, %s4789_s0  ;;  %v6784_v8 = vpop.f32.mrb[88].mxu0  ;;  %v4735_v24 = vld [vmem:[#allocation2 + $0xf8] sm:$0xff]  }
 0x2b1   :  { %3520 = vrot.lane.b32.xlu1 %v4730_v1, %s4789_s0  ;;  %v6795_v20 = vpop.f32.mrb[89].mxu0  ;;  %v2278_v1 = vsel %vm2201_vm7, %v2188_v48, %v1875_v45 }
 0x2b2   :  { %v2067_v57 = vpop.permute.xlu0 %2066  ;;  %v6801_v32 = vpop.f32.mrb[90].mxu0 }
 0x2b3   :  { %v1813_v50 = vpop.permute.xlu1 %1812  ;;  %v6804_v55 = vpop.f32.mrb[91].mxu0 }
 0x2b4   :  { %3526 = vrot.lane.b32.xlu0 %v4731_v47, %s4789_s0 }
 0x2b5   :  { %3524 = vrot.lane.b32.xlu1 %v4732_v5, %s4789_s0 }
 0x2b6   :  { %v1943_v31 = vpop.permute.xlu0 %1942 }
 0x2b7   :  { %v1877_v19 = vpop.permute.xlu1 %1876  ;;  %3021 = vmatmul.mubr.bf16.gmra.mrb[128].mxu1 %v2275_v10  ;;  %v2127_v10 = vsel %vm289_vm0, %v7407_v11, %v6778_v33 }
 0x2b8   :  { %v2854_v62 = vpop.f32.mrb[44].mxu1  ;;  %3028 = vmatprep.mubr.bf16.mxu1 %v2533_v25  ;;  %3530 = vrot.lane.b32.xlu0 %v4733_v51, %s4789_s0  ;;  %v2381_v25 = vsel %vm289_vm0, %v6364_v44, %v1943_v31 }
 0x2b9   :  { %v2855_v13 = vadd.f32 %v6495_v52, %v2854_v62  ;;  %v2856_v22 = vpop.f32.mrb[45].mxu1  ;;  %3528 = vrot.lane.b32.xlu1 %v4734_v6, %s4789_s0  ;;  %v7483_v62 = vld [vmem:[#allocation68_spill] sm:$0xff] }
 0x2ba   :  { %v2007_v3 = vpop.permute.xlu0 %2006  ;;  %v2857_v53 = vpop.f32.mrb[46].mxu1 }
 0x2bb   :  { %v3144_v12 = vadd.f32 %v6098_v34, %v2855_v13  ;;  %v2858_v37 = vadd.f32 %v6495_v52, %v2857_v53  ;;  %v1753_v9 = vpop.permute.xlu1 %1752  ;;  %v2859_v30 = vpop.f32.mrb[47].mxu1  ;;  %v2447_v34 = vsel %vm2138_vm6, %v2378_v40, %v2005_v26  ;;  %v2449_v13 = vsel %vm2138_vm6, %v2381_v25, %v2007_v3 }
 0x2bc   :  { %v2536_v29 = vsel %vm2201_vm7, %v2447_v34, %v2067_v57  ;;  %v2190_v57 = vsel %vm2138_vm6, %v2127_v10, %v1813_v50  ;;  %v2129_v44 = vsel %vm289_vm0, %v7416_v43, %v1753_v9 }
 0x2bd   :  { %v3147_v18 = vadd.f32 %v6106_v41, %v2858_v37  ;;  %3532 = vrot.lane.b32.xlu1 %v4735_v24, %s4789_s0  ;;  %v3380_v38 = vmax.f32 %v3144_v12, 0.0 }
 0x2be   :  { %v2069_v63 = vpop.permute.xlu0 %2068 }
 0x2bf   :  { %v3381_v47 = vmax.f32 %v3147_v18, 0.0  ;;  %v1815_v49 = vpop.permute.xlu1 %1814  ;;  %3029 = vmatmul.mubr.bf16.gmra.mrb[132].mxu1 %v2278_v1  ;;  %v2539_v37 = vsel %vm2201_vm7, %v2449_v13, %v2069_v63  ;;  %v7484_v63 = vld [vmem:[#allocation12_spill] sm:$0xff]  ;;  %v7486_v13 = vld [vmem:[#allocation70_spill] sm:$0xff] }
 0x2c0   :  { %v2862_v27 = vpop.f32.mrb[48].mxu1  ;;  %3036 = vmatprep.mubr.bf16.mxu1 %v2536_v29  ;;  %v2192_v31 = vsel %vm2138_vm6, %v2129_v44, %v1815_v49 }
 0x2c1   :  { %v6823_v14 = vpack.c.bf16 %v3381_v47, %v3380_v38  ;;  %v2863_v41 = vadd.f32 %v6495_v52, %v2862_v27  ;;  %v2864_v42 = vpop.f32.mrb[49].mxu1 }
 0x2c2   :  { %v1945_v39 = vpop.permute.xlu0 %1944  ;;  %v2865_v58 = vpop.f32.mrb[50].mxu1 }
 0x2c3   :  { %v3152_v26 = vadd.f32 %v6138_v16, %v2863_v41  ;;  %v2866_v5 = vadd.f32 %v6495_v52, %v2865_v58  ;;  %v1879_v45 = vpop.permute.xlu1 %1878  ;;  %v2867_v54 = vpop.f32.mrb[51].mxu1  ;;  %v2281_v16 = vsel %vm2201_vm7, %v2190_v57, %v1877_v19  ;;  %v2384_v3 = vsel %vm289_vm0, %v6398_v4, %v1945_v39  ;;  %v7485_v41 = vld [vmem:[#allocation67_spill] sm:$0xff] }
 0x2c4   :  { %v2284_v21 = vsel %vm2201_vm7, %v2192_v31, %v1879_v45 }
 0x2c5   :  { %v3155_v51 = vadd.f32 %v7483_v62, %v2866_v5  ;;  %v3382_v6 = vmax.f32 %v3152_v26, 0.0 }
 0x2c6   :  { %v2009_v22 = vpop.permute.xlu0 %2008 }
 0x2c7   :  { %v3383_v53 = vmax.f32 %v3155_v51, 0.0  ;;  %v1755_v12 = vpop.permute.xlu1 %1754  ;;  %3037 = vmatmul.mubr.bf16.gmra.mrb[136].mxu1 %v2281_v16  ;;  %v2451_v19 = vsel %vm2138_vm6, %v2384_v3, %v2009_v22 }
 0x2c8   :  { %3044 = vmatprep.mubr.bf16.mxu1 %v2539_v37  ;;  %v2131_v49 = vsel %vm289_vm0, %v7428_v23, %v1755_v12 }
 0x2c9   :  { %v6838_v11 = vpack.c.bf16 %v3383_v53, %v3382_v6 }
 0x2ca   :  { %v2071_v33 = vpop.permute.xlu0 %2070 }
 0x2cb   :  { %v1817_v50 = vpop.permute.xlu1 %1816  ;;  %v2542_v40 = vsel %vm2201_vm7, %v2451_v19, %v2071_v33  ;;  %v7487_v33 = vld [vmem:[#allocation72_spill] sm:$0xff] }
 0x2cc   :  { %v2194_v29 = vsel %vm2138_vm6, %v2131_v49, %v1817_v50 }
 0x2ce   :  { %v1947_v30 = vpop.permute.xlu0 %1946 }
 0x2cf   :  { %v1881_v48 = vpop.permute.xlu1 %1880  ;;  %3045 = vmatmul.mubr.bf16.gmra.mrb[140].mxu1 %v2284_v21  ;;  %v2387_v27 = vsel %vm289_vm0, %v6431_v46, %v1947_v30 }
 0x2d0   :  { %v2870_v18 = vpop.f32.mrb[52].mxu1  ;;  %3052 = vmatprep.mubr.bf16.mxu1 %v2542_v40  ;;  %v2287_v26 = vsel %vm2201_vm7, %v2194_v29, %v1881_v48 }
 0x2d1   :  { %v2871_v24 = vadd.f32 %v6495_v52, %v2870_v18  ;;  %v2872_v34 = vpop.f32.mrb[53].mxu1 }
 0x2d2   :  { %v2011_v43 = vpop.permute.xlu0 %2010  ;;  %v2873_v9 = vpop.f32.mrb[54].mxu1 }
 0x2d3   :  { %v3160_v1 = vadd.f32 %v7484_v63, %v2871_v24  ;;  %v2874_v4 = vadd.f32 %v6495_v52, %v2873_v9  ;;  %v1757_v38 = vpop.permute.xlu1 %1756  ;;  %v2875_v47 = vpop.f32.mrb[55].mxu1  ;;  %v2453_v39 = vsel %vm2138_vm6, %v2387_v27, %v2011_v43  ;;  %v7489_v27 = vld [vmem:[#allocation35_spill] sm:$0xff] }
 0x2d4   :  { %v2133_v12 = vsel %vm289_vm0, %v5895_v17, %v1757_v38  ;;  %v7488_v38 = vld [vmem:[#allocation34_spill] sm:$0xff] }
 0x2d5   :  { %v3163_v42 = vadd.f32 %v7485_v41, %v2874_v4  ;;  %v3384_v5 = vmax.f32 %v3160_v1, 0.0 }
 0x2d6   :  { %v2073_v58 = vpop.permute.xlu0 %2072 }
 0x2d7   :  { %v3385_v45 = vmax.f32 %v3163_v42, 0.0  ;;  %v1819_v54 = vpop.permute.xlu1 %1818  ;;  %3053 = vmatmul.mubr.bf16.gmra.mrb[144].mxu1 %v2287_v26  ;;  %v2545_v10 = vsel %vm2201_vm7, %v2453_v39, %v2073_v58  ;;  %v7490_v39 = vld [vmem:[#allocation69_spill] sm:$0xff] }
 0x2d8   :  { %v2878_v57 = vpop.f32.mrb[56].mxu1  ;;  %3060 = vmatprep.mubr.bf16.mxu1 %v2545_v10  ;;  %v2196_v37 = vsel %vm2138_vm6, %v2133_v12, %v1819_v54  ;;  %v7492_v10 = vld [vmem:[#allocation71_spill] sm:$0xff] }
 0x2d9   :  { %v6860_v23 = vpack.c.bf16 %v3385_v45, %v3384_v5  ;;  %v2879_v25 = vadd.f32 %v6495_v52, %v2878_v57  ;;  %v2880_v46 = vpop.f32.mrb[57].mxu1  ;;  %v7491_v45 = vld [vmem:[#allocation66_spill] sm:$0xff] }
 0x2da   :  { %v1949_v62 = vpop.permute.xlu0 %1948  ;;  %v2881_v51 = vpop.f32.mrb[58].mxu1 }
 0x2db   :  { %v3168_v22 = vadd.f32 %v7486_v13, %v2879_v25  ;;  %v2882_v16 = vadd.f32 %v6495_v52, %v2881_v51  ;;  %v1883_v6 = vpop.permute.xlu1 %1882  ;;  %v2883_v53 = vpop.f32.mrb[59].mxu1  ;;  %v2390_v21 = vsel %vm289_vm0, %v6478_v36, %v1949_v62  ;;  %v7493_v51 = vld [vmem:[#allocation30_spill] sm:$0xff] }
 0x2dc   :  { %v2290_v31 = vsel %vm2201_vm7, %v2196_v37, %v1883_v6 }
 0x2dd   :  { %v3171_v50 = vadd.f32 %v7487_v33, %v2882_v16  ;;  %v3386_v3 = vmax.f32 %v3168_v22, 0.0 }
 0x2de   :  { %v2013_v44 = vpop.permute.xlu0 %2012 }
 0x2df   :  { %v3387_v19 = vmax.f32 %v3171_v50, 0.0  ;;  %v1759_v30 = vpop.permute.xlu1 %1758  ;;  %3061 = vmatmul.mubr.bf16.gmra.mrb[148].mxu1 %v2290_v31  ;;  %v2455_v40 = vsel %vm2138_vm6, %v2390_v21, %v2013_v44  ;;  %v7494_v31 = vld [vmem:[#allocation73_spill] sm:$0xff] }
 0x2e0   :  { %v2135_v34 = vsel %vm289_vm0, %v5915_v15, %v1759_v30 }
 0x2e1   :  { %v6872_v48 = vpack.c.bf16 %v3387_v19, %v3386_v3 }
 0x2e2   :  { %v2075_v18 = vpop.permute.xlu0 %2074 }
 0x2e3   :  { %v1821_v17 = vpop.permute.xlu1 %1820  ;;  %v2548_v24 = vsel %vm2201_vm7, %v2455_v40, %v2075_v18 }
 0x2e4   :  { %3068 = vmatprep.mubr.bf16.mxu1 %v2548_v24  ;;  %v2198_v9 = vsel %vm2138_vm6, %v2135_v34, %v1821_v17  ;;  %v7495_v17 = vld [vmem:[#allocation75_spill] sm:$0xff] }
 0x2e6   :  { %v1951_v43 = vpop.permute.xlu0 %1950 }
 0x2e7   :  { %v2393_v63 = vsel %vm289_vm0, %v6539_v56, %v1951_v43  ;;  %v1885_v1 = vpop.permute.xlu1 %1884 }
 0x2e8   :  { %v2886_v36 = vpop.f32.mrb[60].mxu1  ;;  %v2293_v4 = vsel %vm2201_vm7, %v2198_v9, %v1885_v1  ;;  %v2456_v47 = vsel %vm2138_vm6, %v2393_v63, %v7488_v38 }
 0x2e9   :  { %v2887_v49 = vadd.f32 %v6495_v52, %v2886_v36  ;;  %v2888_v29 = vpop.f32.mrb[61].mxu1  ;;  %3069 = vmatmul.mubr.bf16.gmra.mrb[152].mxu1 %v2293_v4  ;;  %v2550_v15 = vsel %vm2201_vm7, %v2456_v47, %v7489_v27  ;;  %v7496_v27 = vld [vmem:[#allocation37_spill] sm:$0xff] }
 0x2ea   :  { %v1823_v41 = vpop.permute.xlu0 %1822  ;;  %v2889_v42 = vpop.f32.mrb[62].mxu1  ;;  %3076 = vmatprep.mubr.bf16.mxu1 %v2550_v15 }
 0x2eb   :  { %v3176_v58 = vadd.f32 %v7490_v39, %v2887_v49  ;;  %v2890_v56 = vadd.f32 %v6495_v52, %v2889_v42  ;;  %v1761_v26 = vpop.permute.xlu1 %1760  ;;  %v2891_v5 = vpop.f32.mrb[63].mxu1  ;;  %v7497_v39 = vld [vmem:[#allocation74_spill] sm:$0xff] }
 0x2ec   :  { %v2137_v54 = vsel %vm289_vm0, %v7491_v45, %v1761_v26 }
 0x2ed   :  { %v3179_v57 = vadd.f32 %v7492_v10, %v2890_v56  ;;  %v3388_v46 = vmax.f32 %v3176_v58, 0.0  ;;  %v2200_v16 = vsel %vm2138_vm6, %v2137_v54, %v1823_v41 }
 0x2ee   :  { %v3471_v25 = vpop.permute.xlu0 %3470 }
 0x2ef   :  { %v3389_v62 = vmax.f32 %v3179_v57, 0.0  ;;  %v3536_v13 = vsel %vm289_vm0, %v7493_v51, %v3471_v25  ;;  %v1887_v22 = vpop.permute.xlu1 %1886 }
 0x2f0   :  { %v2894_v6 = vpop.f32.mrb[64].mxu1  ;;  %4570 = vmatprep.mubr.msk.bf16.mxu0 %vm2138_vm6, %v3536_v13  ;;  %v2296_v53 = vsel %vm2201_vm7, %v2200_v16, %v1887_v22  ;;  %v7499_v16 = vld [vmem:[#allocation40_spill] sm:$0xff] }
 0x2f1   :  { %v3445_v12 = vpack.c.bf16 %v3389_v62, %v3388_v46  ;;  %v2895_v37 = vadd.f32 %v6495_v52, %v2894_v6  ;;  %v2896_v33 = vpop.f32.mrb[65].mxu1  ;;  %3077 = vmatmul.mubr.bf16.gmra.mrb[156].mxu1 %v2296_v53 }
 0x2f2   :  { %v3475_v50 = vpop.permute.xlu0 %3474  ;;  %v2897_v44 = vpop.f32.mrb[66].mxu1 }
 0x2f3   :  { %v3184_v3 = vadd.f32 %v7494_v31, %v2895_v37  ;;  %v2898_v19 = vadd.f32 %v6495_v52, %v2897_v44  ;;  %v3473_v30 = vpop.permute.xlu1 %3472  ;;  %v2899_v21 = vpop.f32.mrb[67].mxu1  ;;  %v3542_v18 = vsel %vm289_vm0, %v6761_v28, %v3475_v50 }
 0x2f4   :  { %v3539_v40 = vsel %vm289_vm0, %v6733_v2, %v3473_v30 }
 0x2f5   :  { %v3187_v24 = vadd.f32 %v7495_v17, %v2898_v19  ;;  %4571 = vmatmul.mubr.msk.bf16.vlgmr.msra.gmra.mrb[96].mxu0 %vm2138_vm6, %v3539_v40  ;;  %v3390_v34 = vmax.f32 %v3184_v3, 0.0  ;;  %v7500_v40 = vld [vmem:[#allocation14_spill] sm:$0xff] }
 0x2f6   :  { %4574 = vmatprep.mubr.msk.bf16.mxu0 %vm2138_vm6, %v3542_v18  ;;  %v3479_v1 = vpop.permute.xlu0 %3478 }
 0x2f7   :  { %v3391_v43 = vmax.f32 %v3187_v24, 0.0  ;;  %v3477_v63 = vpop.permute.xlu1 %3476  ;;  %v3548_v2 = vsel %vm289_vm0, %v6838_v11, %v3479_v1 }
 0x2f8   :  { %v3545_v36 = vsel %vm289_vm0, %v6823_v14, %v3477_v63 }
 0x2f9   :  { %v3446_v9 = vpack.c.bf16 %v3391_v43, %v3390_v34  ;;  %v7501_v34 = vld [vmem:[#allocation45_spill] sm:$0xff] }
 0x2fa   :  { %v3483_v49 = vpop.permute.xlu0 %3482 }
 0x2fb   :  { %v3481_v4 = vpop.permute.xlu1 %3480  ;;  %v3554_v11 = vsel %vm289_vm0, %v6872_v48, %v3483_v49 }
 0x2fc   :  { %v3551_v14 = vsel %vm289_vm0, %v6860_v23, %v3481_v4  ;;  %v7498_v23 = vld [vmem:[#allocation54_spill] sm:$0xff] }
 0x2fd   :  { %4575 = vmatmul.mubr.msk.bf16.gmra.mrb[100].mxu0 %vm2138_vm6, %v3545_v36 }
 0x2fe   :  { %4578 = vmatprep.mubr.msk.bf16.mxu0 %vm2138_vm6, %v3548_v2  ;;  %v3487_v25 = vpop.permute.xlu0 %3486 }
 0x2ff   :  { %v3485_v45 = vpop.permute.xlu1 %3484  ;;  %v3560_v22 = vsel %vm289_vm0, %v3446_v9, %v3487_v25 }
 0x300   :  { %v2902_v28 = vpop.f32.mrb[68].mxu1  ;;  %v3557_v13 = vsel %vm289_vm0, %v3445_v12, %v3485_v45 }
 0x301   :  { %v2903_v38 = vadd.f32 %v6495_v52, %v2902_v28  ;;  %v2904_v47 = vpop.f32.mrb[69].mxu1 }
 0x302   :  { %v2905_v29 = vpop.f32.mrb[70].mxu1  ;;  %v3491_v44 = vpop.permute.xlu0 %3490  ;;  %v7502_v47 = vld [vmem:[#allocation76_spill] sm:$0xff] }
 0x303   :  { %v3192_v15 = vadd.f32 %v7496_v27, %v2903_v38  ;;  %v2906_v41 = vadd.f32 %v6495_v52, %v2905_v29  ;;  %v2907_v42 = vpop.f32.mrb[71].mxu1  ;;  %v3489_v33 = vpop.permute.xlu1 %3488 }
 0x305   :  { %v3195_v58 = vadd.f32 %v7497_v39, %v2906_v41  ;;  %4579 = vmatmul.mubr.msk.bf16.gmra.mrb[104].mxu0 %vm2138_vm6, %v3551_v14  ;;  %v3392_v56 = vmax.f32 %v3192_v15, 0.0  ;;  %v7503_v41 = vld [vmem:[#allocation47_spill] sm:$0xff] }
 0x306   :  { %4582 = vmatprep.mubr.msk.bf16.mxu0 %vm2138_vm6, %v3554_v11  ;;  %v3495_v39 = vpop.permute.xlu0 %3494 }
 0x307   :  { %v3393_v26 = vmax.f32 %v3195_v58, 0.0  ;;  %v3493_v36 = vpop.permute.xlu1 %3492 }
 0x308   :  { %v2910_v5 = vpop.f32.mrb[72].mxu1 }
 0x309   :  { %v3447_v54 = vpack.c.bf16 %v3393_v26, %v3392_v56  ;;  %v2911_v10 = vadd.f32 %v6495_v52, %v2910_v5  ;;  %v2912_v57 = vpop.f32.mrb[73].mxu1 }
 0x30a   :  { %v2913_v46 = vpop.f32.mrb[74].mxu1 }
 0x30b   :  { %v3200_v62 = vadd.f32 %v7498_v23, %v2911_v10  ;;  %v2914_v48 = vadd.f32 %v6495_v52, %v2913_v46  ;;  %v2915_v51 = vpop.f32.mrb[75].mxu1  ;;  %v3563_v31 = vsel %vm289_vm0, %v3447_v54, %v3489_v33  ;;  %v7504_v10 = vld [vmem:[#allocation13_spill] sm:$0xff] }
 0x30c   :  { %v7505_v23 = vld [vmem:[#allocation77_spill] sm:$0xff] }
 0x30d   :  { %v3203_v6 = vadd.f32 %v7499_v16, %v2914_v48  ;;  %4583 = vmatmul.mubr.msk.bf16.gmra.mrb[108].mxu0 %vm2138_vm6, %v3557_v13  ;;  %v3394_v53 = vmax.f32 %v3200_v62, 0.0  ;;  %v7506_v33 = vld [vmem:[#allocation49_spill] sm:$0xff] }
 0x30e   :  { %4586 = vmatprep.mubr.msk.bf16.mxu0 %vm2138_vm6, %v3560_v22  ;;  %v3497_v22 = vpop.permute.xlu1 %3496 }
 0x30f   :  { %v3395_v37 = vmax.f32 %v3203_v6, 0.0 }
 0x311   :  { %v3448_v50 = vpack.c.bf16 %v3395_v37, %v3394_v53 }
 0x313   :  { %v3566_v3 = vsel %vm289_vm0, %v3448_v50, %v3491_v44 }
 0x315   :  { %4587 = vmatmul.mubr.msk.bf16.gmra.mrb[112].mxu0 %vm2138_vm6, %v3563_v31 }
 0x316   :  { %4590 = vmatprep.mubr.msk.bf16.mxu0 %vm2138_vm6, %v3566_v3 }
 0x318   :  { %v2918_v12 = vpop.f32.mrb[76].mxu1 }
 0x319   :  { %v2919_v19 = vadd.f32 %v6495_v52, %v2918_v12  ;;  %v2920_v30 = vpop.f32.mrb[77].mxu1  ;;  %v7507_v12 = vld [vmem:[#allocation79_spill] sm:$0xff] }
 0x31a   :  { %v2921_v21 = vpop.f32.mrb[78].mxu1  ;;  %v6957_v30 = vpop.f32.mrb[92].mxu0 }
 0x31b   :  { %v3208_v18 = vadd.f32 %v7500_v40, %v2919_v19  ;;  %v2922_v17 = vadd.f32 %v6495_v52, %v2921_v21  ;;  %v2923_v24 = vpop.f32.mrb[79].mxu1 }
 0x31d   :  { %v3211_v43 = vadd.f32 %v7501_v34, %v2922_v17  ;;  %v3396_v9 = vmax.f32 %v3208_v18, 0.0  ;;  %v6959_v18 = vpop.f32.mrb[93].mxu0  ;;  %v3499_v17 = vpop.permute.xlu0 %3498 }
 0x31e   :  { %v6961_v34 = vpop.f32.mrb[94].mxu0 }
 0x31f   :  { %v3397_v63 = vmax.f32 %v3211_v43, 0.0 }
 0x320   :  { %v2926_v1 = vpop.f32.mrb[80].mxu1 }
 0x321   :  { %v3449_v2 = vpack.c.bf16 %v3397_v63, %v3396_v9  ;;  %v2927_v28 = vadd.f32 %v6495_v52, %v2926_v1  ;;  %v2928_v4 = vpop.f32.mrb[81].mxu1  ;;  %v6963_v9 = vpop.f32.mrb[95].mxu0 }
 0x322   :  { %v2929_v38 = vpop.f32.mrb[82].mxu1 }
 0x323   :  { %v3216_v49 = vadd.f32 %v7502_v47, %v2927_v28  ;;  %v3569_v29 = vsel %vm289_vm0, %v3449_v2, %v3493_v36  ;;  %v2930_v27 = vadd.f32 %v6495_v52, %v2929_v38  ;;  %v2931_v15 = vpop.f32.mrb[83].mxu1  ;;  %v7508_v28 = vld [vmem:[#allocation46_spill] sm:$0xff] }
 0x324   :  { %4591 = vmatmul.mubr.msk.bf16.gmra.mrb[116].mxu0 %vm2138_vm6, %v3569_v29 }
 0x325   :  { %v3219_v42 = vadd.f32 %v7503_v41, %v2930_v27  ;;  %v3398_v14 = vmax.f32 %v3216_v49, 0.0  ;;  %v7509_v49 = vld [vmem:[#allocation78_spill] sm:$0xff] }
 0x327   :  { %v3399_v11 = vmax.f32 %v3219_v42, 0.0  ;;  %v3501_v42 = vpop.permute.xlu1 %3500 }
 0x329   :  { %v3450_v58 = vpack.c.bf16 %v3399_v11, %v3398_v14 }
 0x32b   :  { %v3572_v56 = vsel %vm289_vm0, %v3450_v58, %v3495_v39 }
 0x32c   :  { %4594 = vmatprep.mubr.msk.bf16.mxu0 %vm2138_vm6, %v3572_v56  ;;  %v7510_v56 = vld [vmem:[#allocation20_spill] sm:$0xff] }
 0x330   :  { %v2934_v26 = vpop.f32.mrb[84].mxu1 }
 0x331   :  { %v2935_v5 = vadd.f32 %v6495_v52, %v2934_v26  ;;  %v2936_v45 = vpop.f32.mrb[85].mxu1 }
 0x332   :  { %v2937_v54 = vpop.f32.mrb[86].mxu1 }
 0x333   :  { %v3224_v57 = vadd.f32 %v7504_v10, %v2935_v5  ;;  %v2938_v25 = vadd.f32 %v6495_v52, %v2937_v54  ;;  %v2939_v46 = vpop.f32.mrb[87].mxu1  ;;  %v7511_v10 = vld [vmem:[#allocation57_spill] sm:$0xff] }
 0x335   :  { %v3227_v62 = vadd.f32 %v7505_v23, %v2938_v25  ;;  %v3400_v48 = vmax.f32 %v3224_v57, 0.0 }
 0x337   :  { %v3401_v51 = vmax.f32 %v3227_v62, 0.0  ;;  %v3503_v62 = vpop.permute.xlu0 %3502 }
 0x338   :  { %v2942_v13 = vpop.f32.mrb[88].mxu1 }
 0x339   :  { %v3451_v16 = vpack.c.bf16 %v3401_v51, %v3400_v48  ;;  %v2943_v6 = vadd.f32 %v6495_v52, %v2942_v13  ;;  %v2944_v53 = vpop.f32.mrb[89].mxu1  ;;  %v6980_v51 = vld [vmem:[%s7223_s4] ss:$0 sm:$0xff] }
 0x33a   :  { %v2945_v37 = vpop.f32.mrb[90].mxu1 }
 0x33b   :  { %v3232_v50 = vadd.f32 %v7506_v33, %v2943_v6  ;;  %v3575_v44 = vsel %vm289_vm0, %v3451_v16, %v3497_v22  ;;  %v2946_v31 = vadd.f32 %v6495_v52, %v2945_v37  ;;  %v2947_v3 = vpop.f32.mrb[91].mxu1 }
 0x33c   :  { %4595 = vmatmul.mubr.msk.bf16.gmra.mrb[120].mxu0 %vm2138_vm6, %v3575_v44 }
 0x33d   :  { %v3235_v19 = vadd.f32 %v7507_v12, %v2946_v31  ;;  %v3402_v21 = vmax.f32 %v3232_v50, 0.0  ;;  %v7513_v50 = vld [vmem:[#allocation51_spill] sm:$0xff] }
 0x33f   :  { %v3403_v40 = vmax.f32 %v3235_v19, 0.0  ;;  %v3505_v19 = vpop.permute.xlu1 %3504 }
 0x341   :  { %v3452_v24 = vpack.c.bf16 %v3403_v40, %v3402_v21 }
 0x342   :  { %v2950_v43 = vpop.f32.mrb[92].mxu1 }
 0x343   :  { %v3578_v63 = vsel %vm289_vm0, %v3452_v24, %v3499_v17  ;;  %v2951_v1 = vadd.f32 %v6495_v52, %v2950_v43  ;;  %v2952_v36 = vpop.f32.mrb[93].mxu1  ;;  %v7514_v43 = vld [vmem:[#allocation18_spill] sm:$0xff] }
 0x344   :  { %v2953_v2 = vpop.f32.mrb[94].mxu1  ;;  %4598 = vmatprep.mubr.msk.bf16.mxu0 %vm2138_vm6, %v3578_v63 }
 0x345   :  { %v3240_v4 = vadd.f32 %v7508_v28, %v2951_v1  ;;  %v2954_v38 = vadd.f32 %v6495_v52, %v2953_v2  ;;  %v2955_v47 = vpop.f32.mrb[95].mxu1  ;;  %v7515_v28 = vld [vmem:[#allocation59_spill] sm:$0xff] }
 0x347   :  { %v3243_v29 = vadd.f32 %v7509_v49, %v2954_v38  ;;  %v3404_v27 = vmax.f32 %v3240_v4, 0.0 }
 0x349   :  { %v3405_v15 = vmax.f32 %v3243_v29, 0.0  ;;  %v3507_v29 = vpop.permute.xlu0 %3506 }
 0x34a   :  { %v2958_v41 = vpop.f32.mrb[96].mxu1 }
 0x34b   :  { %v3453_v14 = vpack.c.bf16 %v3405_v15, %v3404_v27  ;;  %v2959_v11 = vadd.f32 %v6495_v52, %v2958_v41  ;;  %v2960_v39 = vpop.f32.mrb[97].mxu1 }
 0x34c   :  { %v2961_v58 = vpop.f32.mrb[98].mxu1 }
 0x34d   :  { %v3248_v26 = vadd.f32 %v7510_v56, %v2959_v11  ;;  %v3581_v5 = vsel %vm289_vm0, %v3453_v14, %v3501_v42  ;;  %v2962_v45 = vadd.f32 %v6495_v52, %v2961_v58  ;;  %v2963_v54 = vpop.f32.mrb[99].mxu1  ;;  %v7512_v52 = vld [vmem:[#allocation17_spill] sm:$0xff]  ;;  %v7516_v14 = vld [vmem:[#allocation50_spill] sm:$0xff] }
 0x34e   :  { %4599 = vmatmul.mubr.msk.bf16.gmra.mrb[124].mxu0 %vm2138_vm6, %v3581_v5 }
 0x34f   :  { %v3251_v57 = vadd.f32 %v7511_v10, %v2962_v45  ;;  %v3406_v25 = vmax.f32 %v3248_v26, 0.0  ;;  %v7517_v26 = vld [vmem:[#allocation80_spill] sm:$0xff] }
 0x351   :  { %v3407_v46 = vmax.f32 %v3251_v57, 0.0  ;;  %v3509_v57 = vpop.permute.xlu1 %3508 }
 0x352   :  { %v2966_v23 = vpop.f32.mrb[100].mxu1 }
 0x353   :  { %v3454_v48 = vpack.c.bf16 %v3407_v46, %v3406_v25  ;;  %v2967_v13 = vadd.f32 %v6980_v51, %v2966_v23  ;;  %v2968_v22 = vpop.f32.mrb[101].mxu1 }
 0x354   :  { %v2969_v16 = vpop.f32.mrb[102].mxu1 }
 0x355   :  { %v3256_v6 = vadd.f32 %v7512_v52, %v2967_v13  ;;  %v3584_v53 = vsel %vm289_vm0, %v3454_v48, %v3503_v62  ;;  %v2970_v37 = vadd.f32 %v6980_v51, %v2969_v16  ;;  %v2971_v33 = vpop.f32.mrb[103].mxu1  ;;  %v7518_v48 = vld [vmem:[#allocation60_spill] sm:$0xff] }
 0x356   :  { %4602 = vmatprep.mubr.msk.bf16.mxu0 %vm2138_vm6, %v3584_v53 }
 0x357   :  { %v3259_v44 = vadd.f32 %v7513_v50, %v2970_v37  ;;  %v3408_v31 = vmax.f32 %v3256_v6, 0.0  ;;  %v7519_v6 = vld [vmem:[#allocation21_spill] sm:$0xff] }
 0x359   :  { %v3409_v3 = vmax.f32 %v3259_v44, 0.0  ;;  %v3511_v44 = vpop.permute.xlu0 %3510 }
 0x35a   :  { %v2974_v12 = vpop.f32.mrb[104].mxu1 }
 0x35b   :  { %v3455_v21 = vpack.c.bf16 %v3409_v3, %v3408_v31  ;;  %v2975_v40 = vadd.f32 %v6980_v51, %v2974_v12  ;;  %v2976_v17 = vpop.f32.mrb[105].mxu1 }
 0x35c   :  { %v2977_v24 = vpop.f32.mrb[106].mxu1 }
 0x35d   :  { %v3264_v63 = vadd.f32 %v7514_v43, %v2975_v40  ;;  %v3587_v1 = vsel %vm289_vm0, %v3455_v21, %v3505_v19  ;;  %v2978_v36 = vadd.f32 %v6980_v51, %v2977_v24  ;;  %v2979_v2 = vpop.f32.mrb[107].mxu1  ;;  %v7520_v21 = vld [vmem:[#allocation58_spill] sm:$0xff] }
 0x35e   :  { %4603 = vmatmul.mubr.msk.bf16.gmra.mrb[128].mxu0 %vm2138_vm6, %v3587_v1 }
 0x35f   :  { %v3267_v4 = vadd.f32 %v7515_v28, %v2978_v36  ;;  %v3410_v38 = vmax.f32 %v3264_v63, 0.0  ;;  %v7521_v63 = vld [vmem:[#allocation23_spill] sm:$0xff] }
 0x361   :  { %v3411_v47 = vmax.f32 %v3267_v4, 0.0  ;;  %v3513_v4 = vpop.permute.xlu1 %3512 }
 0x362   :  { %v2982_v49 = vpop.f32.mrb[108].mxu1 }
 0x363   :  { %v3456_v27 = vpack.c.bf16 %v3411_v47, %v3410_v38  ;;  %v2983_v15 = vadd.f32 %v6980_v51, %v2982_v49  ;;  %v2984_v41 = vpop.f32.mrb[109].mxu1 }
 0x364   :  { %v2985_v42 = vpop.f32.mrb[110].mxu1 }
 0x365   :  { %v3272_v11 = vadd.f32 %v7516_v14, %v2983_v15  ;;  %v3590_v39 = vsel %vm289_vm0, %v3456_v27, %v3507_v29  ;;  %v2986_v58 = vadd.f32 %v6980_v51, %v2985_v42  ;;  %v2987_v56 = vpop.f32.mrb[111].mxu1  ;;  %v7522_v27 = vld [vmem:[#allocation15_spill] sm:$0xff] }
 0x366   :  { %4606 = vmatprep.mubr.msk.bf16.mxu0 %vm2138_vm6, %v3590_v39 }
 0x367   :  { %v3275_v5 = vadd.f32 %v7517_v26, %v2986_v58  ;;  %v3412_v45 = vmax.f32 %v3272_v11, 0.0  ;;  %v7523_v11 = vld [vmem:[#allocation29_spill] sm:$0xff] }
 0x369   :  { %v3413_v54 = vmax.f32 %v3275_v5, 0.0  ;;  %v3515_v5 = vpop.permute.xlu0 %3514 }
 0x36a   :  { %v2990_v10 = vpop.f32.mrb[112].mxu1 }
 0x36b   :  { %v3457_v25 = vpack.c.bf16 %v3413_v54, %v3412_v45  ;;  %v2991_v46 = vadd.f32 %v6980_v51, %v2990_v10  ;;  %v2992_v23 = vpop.f32.mrb[113].mxu1 }
 0x36c   :  { %v2993_v62 = vpop.f32.mrb[114].mxu1 }
 0x36d   :  { %v3280_v13 = vadd.f32 %v7518_v48, %v2991_v46  ;;  %v3593_v22 = vsel %vm289_vm0, %v3457_v25, %v3509_v57  ;;  %v2994_v16 = vadd.f32 %v6980_v51, %v2993_v62  ;;  %v2995_v52 = vpop.f32.mrb[115].mxu1  ;;  %v7524_v25 = vld [vmem:[#allocation22_spill] sm:$0xff] }
 0x36e   :  { %4607 = vmatmul.mubr.msk.bf16.gmra.mrb[132].mxu0 %vm2138_vm6, %v3593_v22 }
 0x36f   :  { %v3283_v53 = vadd.f32 %v7519_v6, %v2994_v16  ;;  %v3414_v37 = vmax.f32 %v3280_v13, 0.0  ;;  %v7525_v13 = vld [vmem:[#allocation24_spill] sm:$0xff] }
 0x371   :  { %v3415_v33 = vmax.f32 %v3283_v53, 0.0  ;;  %v3517_v53 = vpop.permute.xlu1 %3516 }
 0x372   :  { %v2998_v50 = vpop.f32.mrb[116].mxu1 }
 0x373   :  { %v3458_v31 = vpack.c.bf16 %v3415_v33, %v3414_v37  ;;  %v2999_v3 = vadd.f32 %v6980_v51, %v2998_v50  ;;  %v3000_v12 = vpop.f32.mrb[117].mxu1 }
 0x374   :  { %v3001_v19 = vpop.f32.mrb[118].mxu1 }
 0x375   :  { %v3288_v40 = vadd.f32 %v7520_v21, %v2999_v3  ;;  %v3596_v17 = vsel %vm289_vm0, %v3458_v31, %v3511_v44  ;;  %v3002_v24 = vadd.f32 %v6980_v51, %v3001_v19  ;;  %v3003_v43 = vpop.f32.mrb[119].mxu1 }
 0x376   :  { %4610 = vmatprep.mubr.msk.bf16.mxu0 %vm2138_vm6, %v3596_v17  ;;  %v3519_v43 = vpop.permute.xlu0 %3518 }
 0x377   :  { %v3291_v1 = vadd.f32 %v7521_v63, %v3002_v24  ;;  %v3416_v36 = vmax.f32 %v3288_v40, 0.0 }
 0x379   :  { %v3417_v2 = vmax.f32 %v3291_v1, 0.0 }
 0x37a   :  { %v3006_v28 = vpop.f32.mrb[120].mxu1 }
 0x37b   :  { %v3459_v38 = vpack.c.bf16 %v3417_v2, %v3416_v36  ;;  %v3007_v47 = vadd.f32 %v6980_v51, %v3006_v28  ;;  %v3008_v49 = vpop.f32.mrb[121].mxu1  ;;  %v7526_v28 = vld [vmem:[#allocation31_spill] sm:$0xff] }
 0x37c   :  { %v3009_v29 = vpop.f32.mrb[122].mxu1  ;;  %v7527_v49 = vld [vmem:[#allocation27_spill] sm:$0xff] }
 0x37d   :  { %v3296_v15 = vadd.f32 %v7522_v27, %v3007_v47  ;;  %v3599_v41 = vsel %vm289_vm0, %v3459_v38, %v3513_v4  ;;  %v3010_v42 = vadd.f32 %v6980_v51, %v3009_v29  ;;  %v3011_v14 = vpop.f32.mrb[123].mxu1 }
 0x37e   :  { %4611 = vmatmul.mubr.msk.bf16.gmra.mrb[136].mxu0 %vm2138_vm6, %v3599_v41  ;;  %v3521_v41 = vpop.permute.xlu1 %3520 }
 0x37f   :  { %v3299_v39 = vadd.f32 %v7523_v11, %v3010_v42  ;;  %v3418_v58 = vmax.f32 %v3296_v15, 0.0 }
 0x381   :  { %v3419_v56 = vmax.f32 %v3299_v39, 0.0 }
 0x382   :  { %v3014_v26 = vpop.f32.mrb[124].mxu1 }
 0x383   :  { %v3460_v45 = vpack.c.bf16 %v3419_v56, %v3418_v58  ;;  %v3015_v54 = vadd.f32 %v6980_v51, %v3014_v26  ;;  %v3016_v10 = vpop.f32.mrb[125].mxu1 }
 0x384   :  { %v3017_v57 = vpop.f32.mrb[126].mxu1 }
 0x385   :  { %v3304_v46 = vadd.f32 %v7524_v25, %v3015_v54  ;;  %v3602_v23 = vsel %vm289_vm0, %v3460_v45, %v3515_v5  ;;  %v3018_v62 = vadd.f32 %v6980_v51, %v3017_v57  ;;  %v3019_v48 = vpop.f32.mrb[127].mxu1  ;;  %v3523_v25 = vpop.permute.xlu0 %3522 }
 0x386   :  { %4614 = vmatprep.mubr.msk.bf16.mxu0 %vm2138_vm6, %v3602_v23 }
 0x387   :  { %v3307_v22 = vadd.f32 %v7525_v13, %v3018_v62  ;;  %v3420_v16 = vmax.f32 %v3304_v46, 0.0 }
 0x389   :  { %v3421_v52 = vmax.f32 %v3307_v22, 0.0 }
 0x38a   :  { %v3022_v6 = vpop.f32.mrb[128].mxu1 }
 0x38b   :  { %v3461_v37 = vpack.c.bf16 %v3421_v52, %v3420_v16  ;;  %v3023_v33 = vadd.f32 %v6980_v51, %v3022_v6  ;;  %v3024_v50 = vpop.f32.mrb[129].mxu1 }
 0x38c   :  { %v3025_v44 = vpop.f32.mrb[130].mxu1 }
 0x38d   :  { %v3312_v31 = vadd.f32 %v6626_v7, %v3023_v33  ;;  %v3605_v3 = vsel %vm289_vm0, %v3461_v37, %v3517_v53  ;;  %v3026_v12 = vadd.f32 %v6980_v51, %v3025_v44  ;;  %v3027_v19 = vpop.f32.mrb[131].mxu1  ;;  %v3525_v37 = vpop.permute.xlu1 %3524 }
 0x38e   :  { %4615 = vmatmul.mubr.msk.bf16.gmra.mrb[140].mxu0 %vm2138_vm6, %v3605_v3 }
 0x38f   :  { %v3315_v21 = vadd.f32 %v6640_v59, %v3026_v12  ;;  %v3422_v40 = vmax.f32 %v3312_v31, 0.0 }
 0x391   :  { %v3423_v17 = vmax.f32 %v3315_v21, 0.0 }
 0x392   :  { %v3030_v24 = vpop.f32.mrb[132].mxu1 }
 0x393   :  { %v3462_v63 = vpack.c.bf16 %v3423_v17, %v3422_v40  ;;  %v3031_v1 = vadd.f32 %v6980_v51, %v3030_v24  ;;  %v3032_v36 = vpop.f32.mrb[133].mxu1  ;;  %v3527_v24 = vpop.permute.xlu0 %3526 }
 0x394   :  { %v3033_v2 = vpop.f32.mrb[134].mxu1 }
 0x395   :  { %v3320_v7 = vadd.f32 %v7526_v28, %v3031_v1  ;;  %v3608_v4 = vsel %vm289_vm0, %v3462_v63, %v3519_v43  ;;  %v3034_v38 = vadd.f32 %v6980_v51, %v3033_v2  ;;  %v3035_v47 = vpop.f32.mrb[135].mxu1 }
 0x396   :  { %4618 = vmatprep.mubr.msk.bf16.mxu0 %vm2138_vm6, %v3608_v4  ;;  %v3529_v47 = vpop.permute.xlu1 %3528 }
 0x397   :  { %v3323_v59 = vadd.f32 %v7527_v49, %v3034_v38  ;;  %v3424_v29 = vmax.f32 %v3320_v7, 0.0 }
 0x399   :  { %v3425_v27 = vmax.f32 %v3323_v59, 0.0 }
 0x39a   :  { %v3038_v15 = vpop.f32.mrb[136].mxu1 }
 0x39b   :  { %v3463_v42 = vpack.c.bf16 %v3425_v27, %v3424_v29  ;;  %v3039_v14 = vadd.f32 %v6980_v51, %v3038_v15  ;;  %v3040_v11 = vpop.f32.mrb[137].mxu1 }
 0x39c   :  { %v3041_v39 = vpop.f32.mrb[138].mxu1 }
 0x39d   :  { %v3328_v58 = vadd.f32 %v6716_v60, %v3039_v14  ;;  %v3611_v56 = vsel %vm289_vm0, %v3463_v42, %v3521_v41  ;;  %v3042_v26 = vadd.f32 %v6980_v51, %v3041_v39  ;;  %v3043_v5 = vpop.f32.mrb[139].mxu1 }
 0x39e   :  { %4619 = vmatmul.mubr.msk.bf16.gmra.mrb[144].mxu0 %vm2138_vm6, %v3611_v56  ;;  %v3531_v56 = vpop.permute.xlu0 %3530 }
 0x39f   :  { %v3331_v45 = vadd.f32 %v6730_v0, %v3042_v26  ;;  %v3426_v54 = vmax.f32 %v3328_v58, 0.0 }
 0x3a1   :  { %v3427_v10 = vmax.f32 %v3331_v45, 0.0 }
 0x3a2   :  { %v3046_v57 = vpop.f32.mrb[140].mxu1 }
 0x3a3   :  { %v3464_v46 = vpack.c.bf16 %v3427_v10, %v3426_v54  ;;  %v3047_v23 = vadd.f32 %v6980_v51, %v3046_v57  ;;  %v3048_v62 = vpop.f32.mrb[141].mxu1  ;;  %v7070_v10 = vld [vmem:[%s7225_s6] ss:$0 sm:$0xff]  ;;  %s4791_s6 = smov [#allocation5]  }
 0x3a4   :  { %v3049_v48 = vpop.f32.mrb[142].mxu1  ;;  %s4155_s1 = sshll.u32 %s4791_s6, 4  ;;  %s4156_s1 = int_to_ptr.vmem [resolvable:$true] %s4155_s1 }
 0x3a5   :  { %v3336_v60 = vadd.f32 %v6697_v35, %v3047_v23  ;;  %v3614_v13 = vsel %vm289_vm0, %v3464_v46, %v3523_v25  ;;  %v3050_v22 = vadd.f32 %v6980_v51, %v3049_v48  ;;  %v3051_v16 = vpop.f32.mrb[143].mxu1  ;;  %s4759_s23 = scalar_lea.vmem %s4156_s1, 8192  ;;  %p4764_p9 = scmp.lt.s32.totalorder %s4156_s1, %s4156_s1 }
 0x3a6   :  { %4622 = vmatprep.mubr.msk.bf16.mxu0 %vm2138_vm6, %v3614_v13  ;;  %p4760_p8 = scmp.ne.s32.totalorder %s4156_s1, %s4759_s23  ;;  %p4765_p10 = scmp.lt.s32.totalorder %s4759_s23, %s4759_s23 }
 0x3a7   :  { %v3339_v0 = vadd.f32 %v6724_v61, %v3050_v22  ;;  %v3428_v52 = vmax.f32 %v3336_v60, 0.0 }
 0x3a8   :  { %p4766_p11 = por %p4765_p10, %p4764_p9 }
 0x3a9   :  { %v3429_v6 = vmax.f32 %v3339_v0, 0.0 }
 0x3aa   :  { %v3054_v53 = vpop.f32.mrb[144].mxu1  ;;  %p4767_p12 = pnand %p4766_p11, %p4760_p8 }
 0x3ab   :  { %v3465_v33 = vpack.c.bf16 %v3429_v6, %v3428_v52  ;;  %v3055_v50 = vadd.f32 %v6980_v51, %v3054_v53  ;;  %v3056_v44 = vpop.f32.mrb[145].mxu1  ;;  %v3533_v53 = vpop.permute.xlu1 %3532 }
 0x3ac   :  { %v3057_v31 = vpop.f32.mrb[146].mxu1 }
 0x3ad   :  { %v3344_v35 = vadd.f32 %v6795_v20, %v3055_v50  ;;  %v3617_v3 = vsel %vm289_vm0, %v3465_v33, %v3525_v37  ;;  %v3058_v12 = vadd.f32 %v6980_v51, %v3057_v31  ;;  %v3059_v19 = vpop.f32.mrb[147].mxu1 }
 0x3ae   :  { %4623 = vmatmul.mubr.msk.bf16.gmra.mrb[148].mxu0 %vm2138_vm6, %v3617_v3 }
 0x3af   :  { %v3347_v61 = vadd.f32 %v6804_v55, %v3058_v12  ;;  %v3430_v21 = vmax.f32 %v3344_v35, 0.0 }
 0x3b1   :  { %v3431_v40 = vmax.f32 %v3347_v61, 0.0 }
 0x3b2   :  { %v3062_v17 = vpop.f32.mrb[148].mxu1 }
 0x3b3   :  { %v3466_v43 = vpack.c.bf16 %v3431_v40, %v3430_v21  ;;  %v3063_v63 = vadd.f32 %v6980_v51, %v3062_v17  ;;  %v3064_v1 = vpop.f32.mrb[149].mxu1 }
 0x3b4   :  { %v3065_v36 = vpop.f32.mrb[150].mxu1 }
 0x3b5   :  { %v3352_v20 = vadd.f32 %v6784_v8, %v3063_v63  ;;  %v3620_v2 = vsel %vm289_vm0, %v3466_v43, %v3527_v24  ;;  %v3066_v28 = vadd.f32 %v6980_v51, %v3065_v36  ;;  %v3067_v7 = vpop.f32.mrb[151].mxu1 }
 0x3b6   :  { %4626 = vmatprep.mubr.msk.bf16.mxu0 %vm2138_vm6, %v3620_v2 }
 0x3b7   :  { %v3355_v55 = vadd.f32 %v6801_v32, %v3066_v28  ;;  %v3432_v4 = vmax.f32 %v3352_v20, 0.0 }
 0x3b9   :  { %v3433_v38 = vmax.f32 %v3355_v55, 0.0 }
 0x3bb   :  { %v3467_v49 = vpack.c.bf16 %v3433_v38, %v3432_v4 }
 0x3bc   :  { %v3070_v59 = vpop.f32.mrb[152].mxu1 }
 0x3bd   :  { %v3623_v29 = vsel %vm289_vm0, %v3467_v49, %v3529_v47  ;;  %v3071_v27 = vadd.f32 %v6980_v51, %v3070_v59  ;;  %v3072_v15 = vpop.f32.mrb[153].mxu1 }
 0x3be   :  { %v3073_v8 = vpop.f32.mrb[154].mxu1  ;;  %4627 = vmatmul.mubr.msk.bf16.gmra.mrb[152].mxu0 %vm2138_vm6, %v3623_v29 }
 0x3bf   :  { %v3074_v41 = vadd.f32 %v6980_v51, %v3073_v8  ;;  %v3360_v42 = vadd.f32 %v6959_v18, %v3071_v27  ;;  %v3075_v14 = vpop.f32.mrb[155].mxu1 }
 0x3c1   :  { %v3363_v32 = vadd.f32 %v6963_v9, %v3074_v41  ;;  %v3434_v11 = vmax.f32 %v3360_v42, 0.0 }
 0x3c3   :  { %v3435_v39 = vmax.f32 %v3363_v32, 0.0 }
 0x3c4   :  { %v3078_v58 = vpop.f32.mrb[156].mxu1 }
 0x3c5   :  { %v3468_v26 = vpack.c.bf16 %v3435_v39, %v3434_v11  ;;  %v3079_v5 = vadd.f32 %v6980_v51, %v3078_v58  ;;  %v3080_v45 = vpop.f32.mrb[157].mxu1 }
 0x3c6   :  { %v3081_v54 = vpop.f32.mrb[158].mxu1 }
 0x3c7   :  { %v3368_v57 = vadd.f32 %v6957_v30, %v3079_v5  ;;  %v3626_v18 = vsel %vm289_vm0, %v3468_v26, %v3531_v56  ;;  %v3082_v9 = vadd.f32 %v6980_v51, %v3081_v54  ;;  %v3083_v25 = vpop.f32.mrb[159].mxu1 }
 0x3c8   :  { %v4572_v46 = vpop.f32.mrb[96].mxu0  ;;  %4630 = vmatprep.mubr.msk.bf16.mxu0 %vm2138_vm6, %v3626_v18 }
 0x3c9   :  { %v3371_v23 = vadd.f32 %v6961_v34, %v3082_v9  ;;  %v3776_v62 = vadd.f32 %v4572_v46, %v7070_v10  ;;  %v3767_v48 = vpop.f32.mrb[97].mxu0  ;;  %v3436_v22 = vmax.f32 %v3368_v57, 0.0 }
 0x3ca   :  { %v3768_v60 = vadd.f32 %v7070_v10, %v3767_v48  ;;  %v4573_v13 = vpop.f32.mrb[98].mxu0 }
 0x3cb   :  { %v3437_v16 = vmax.f32 %v3371_v23, 0.0  ;;  %v4024_v0 = vmax.f32 %v3776_v62, 0.0  ;;  %v3779_v30 = vadd.f32 %v4573_v13, %v7070_v10  ;;  %v3770_v52 = vpop.f32.mrb[99].mxu0 }
 0x3cc   :  { %v4022_v6 = vmax.f32 %v3768_v60, 0.0  ;;  %v3771_v51 = vadd.f32 %v7070_v10, %v3770_v52 }
 0x3cd   :  { %v3469_v37 = vpack.c.bf16 %v3437_v16, %v3436_v22  ;;  %4088 = vst.msk [vmem:[#allocation5 + $0x10] sm:$0xff] %vm2138_vm6, %v4024_v0  ;;  %v4025_v34 = vmax.f32 %v3779_v30, 0.0 }
 0x3ce   :  { %4086 = vst.msk [vmem:[#allocation5] sm:$0xff] %vm2138_vm6, %v4022_v6  ;;  %v4023_v33 = vmax.f32 %v3771_v51, 0.0 }
 0x3cf   :  { %4089 = vst.msk [vmem:[#allocation5 + $0x18] sm:$0xff] %vm2138_vm6, %v4025_v34  ;;  %v3629_v50 = vsel %vm289_vm0, %v3469_v37, %v3533_v53 }
 0x3d0   :  { %4087 = vst.msk [vmem:[#allocation5 + $0x8] sm:$0xff] %vm2138_vm6, %v4023_v33  ;;  %v4576_v44 = vpop.f32.mrb[100].mxu0  ;;  %4631 = vmatmul.mubr.msk.bf16.gmra.mrb[156].mxu0 %vm2138_vm6, %v3629_v50 }
 0x3d1   :  { %v3792_v31 = vadd.f32 %v4576_v44, %v7070_v10  ;;  %v3783_v35 = vpop.f32.mrb[101].mxu0 }
 0x3d2   :  { %v3784_v3 = vadd.f32 %v7070_v10, %v3783_v35  ;;  %v4577_v12 = vpop.f32.mrb[102].mxu0 }
 0x3d3   :  { %v4028_v19 = vmax.f32 %v3792_v31, 0.0  ;;  %v3795_v61 = vadd.f32 %v4577_v12, %v7070_v10  ;;  %v3786_v21 = vpop.f32.mrb[103].mxu0 }
 0x3d4   :  { %v4026_v40 = vmax.f32 %v3784_v3, 0.0  ;;  %v3787_v17 = vadd.f32 %v7070_v10, %v3786_v21 }
 0x3d5   :  { %4092 = vst.msk [vmem:[#allocation5 + $0x30] sm:$0xff] %vm2138_vm6, %v4028_v19  ;;  %v4029_v24 = vmax.f32 %v3795_v61, 0.0 }
 0x3d6   :  { %4090 = vst.msk [vmem:[#allocation5 + $0x20] sm:$0xff] %vm2138_vm6, %v4026_v40  ;;  %v4027_v43 = vmax.f32 %v3787_v17, 0.0 }
 0x3d7   :  { %4093 = vst.msk [vmem:[#allocation5 + $0x38] sm:$0xff] %vm2138_vm6, %v4029_v24 }
 0x3d8   :  { %4091 = vst.msk [vmem:[#allocation5 + $0x28] sm:$0xff] %vm2138_vm6, %v4027_v43  ;;  %v4580_v63 = vpop.f32.mrb[104].mxu0 }
 0x3d9   :  { %v3808_v1 = vadd.f32 %v4580_v63, %v7070_v10  ;;  %v3799_v36 = vpop.f32.mrb[105].mxu0 }
 0x3da   :  { %v3800_v20 = vadd.f32 %v7070_v10, %v3799_v36  ;;  %v4581_v2 = vpop.f32.mrb[106].mxu0 }
 0x3db   :  { %v4032_v28 = vmax.f32 %v3808_v1, 0.0  ;;  %v3811_v7 = vadd.f32 %v4581_v2, %v7070_v10  ;;  %v3802_v55 = vpop.f32.mrb[107].mxu0 }
 0x3dc   :  { %v4030_v4 = vmax.f32 %v3800_v20, 0.0  ;;  %v3803_v38 = vadd.f32 %v7070_v10, %v3802_v55 }
 0x3dd   :  { %4096 = vst.msk [vmem:[#allocation5 + $0x50] sm:$0xff] %vm2138_vm6, %v4032_v28  ;;  %v4033_v47 = vmax.f32 %v3811_v7, 0.0 }
 0x3de   :  { %4094 = vst.msk [vmem:[#allocation5 + $0x40] sm:$0xff] %vm2138_vm6, %v4030_v4  ;;  %v4031_v49 = vmax.f32 %v3803_v38, 0.0 }
 0x3df   :  { %4097 = vst.msk [vmem:[#allocation5 + $0x58] sm:$0xff] %vm2138_vm6, %v4033_v47 }
 0x3e0   :  { %4095 = vst.msk [vmem:[#allocation5 + $0x48] sm:$0xff] %vm2138_vm6, %v4031_v49  ;;  %v4584_v59 = vpop.f32.mrb[108].mxu0 }
 0x3e1   :  { %v3824_v29 = vadd.f32 %v4584_v59, %v7070_v10  ;;  %v3815_v27 = vpop.f32.mrb[109].mxu0 }
 0x3e2   :  { %v3816_v15 = vadd.f32 %v7070_v10, %v3815_v27  ;;  %v4585_v8 = vpop.f32.mrb[110].mxu0 }
 0x3e3   :  { %v4036_v41 = vmax.f32 %v3824_v29, 0.0  ;;  %v3827_v42 = vadd.f32 %v4585_v8, %v7070_v10  ;;  %v3818_v14 = vpop.f32.mrb[111].mxu0 }
 0x3e4   :  { %v4034_v32 = vmax.f32 %v3816_v15, 0.0  ;;  %v3819_v11 = vadd.f32 %v7070_v10, %v3818_v14 }
 0x3e5   :  { %4100 = vst.msk [vmem:[#allocation5 + $0x70] sm:$0xff] %vm2138_vm6, %v4036_v41  ;;  %v4037_v39 = vmax.f32 %v3827_v42, 0.0 }
 0x3e6   :  { %4098 = vst.msk [vmem:[#allocation5 + $0x60] sm:$0xff] %vm2138_vm6, %v4034_v32  ;;  %v4035_v58 = vmax.f32 %v3819_v11, 0.0 }
 0x3e7   :  { %4101 = vst.msk [vmem:[#allocation5 + $0x78] sm:$0xff] %vm2138_vm6, %v4037_v39 }
 0x3e8   :  { %4099 = vst.msk [vmem:[#allocation5 + $0x68] sm:$0xff] %vm2138_vm6, %v4035_v58  ;;  %v4588_v56 = vpop.f32.mrb[112].mxu0 }
 0x3e9   :  { %v3840_v26 = vadd.f32 %v4588_v56, %v7070_v10  ;;  %v3831_v5 = vpop.f32.mrb[113].mxu0 }
 0x3ea   :  { %v3832_v45 = vadd.f32 %v7070_v10, %v3831_v5  ;;  %v4589_v54 = vpop.f32.mrb[114].mxu0 }
 0x3eb   :  { %v4040_v57 = vmax.f32 %v3840_v26, 0.0  ;;  %v3843_v18 = vadd.f32 %v4589_v54, %v7070_v10  ;;  %v3834_v9 = vpop.f32.mrb[115].mxu0 }
 0x3ec   :  { %v4038_v25 = vmax.f32 %v3832_v45, 0.0  ;;  %v3835_v46 = vadd.f32 %v7070_v10, %v3834_v9 }
 0x3ed   :  { %4104 = vst.msk [vmem:[#allocation5 + $0x90] sm:$0xff] %vm2138_vm6, %v4040_v57  ;;  %v4041_v23 = vmax.f32 %v3843_v18, 0.0 }
 0x3ee   :  { %4102 = vst.msk [vmem:[#allocation5 + $0x80] sm:$0xff] %vm2138_vm6, %v4038_v25  ;;  %v4039_v62 = vmax.f32 %v3835_v46, 0.0 }
 0x3ef   :  { %4105 = vst.msk [vmem:[#allocation5 + $0x98] sm:$0xff] %vm2138_vm6, %v4041_v23 }
 0x3f0   :  { %4103 = vst.msk [vmem:[#allocation5 + $0x88] sm:$0xff] %vm2138_vm6, %v4039_v62 }
 0x3f7   :  { %v4592_v48 = vpop.f32.mrb[116].mxu0 }
 0x3f8   :  { %v3856_v60 = vadd.f32 %v4592_v48, %v7070_v10  ;;  %v3847_v13 = vpop.f32.mrb[117].mxu0 }
 0x3f9   :  { %v3848_v22 = vadd.f32 %v7070_v10, %v3847_v13  ;;  %v4593_v16 = vpop.f32.mrb[118].mxu0 }
 0x3fa   :  { %v4044_v0 = vmax.f32 %v3856_v60, 0.0  ;;  %v3859_v30 = vadd.f32 %v4593_v16, %v7070_v10  ;;  %v3850_v52 = vpop.f32.mrb[119].mxu0 }
 0x3fb   :  { %v4042_v6 = vmax.f32 %v3848_v22, 0.0  ;;  %v3851_v51 = vadd.f32 %v7070_v10, %v3850_v52 }
 0x3fc   :  { %4108 = vst.msk [vmem:[#allocation5 + $0xb0] sm:$0xff] %vm2138_vm6, %v4044_v0  ;;  %v4045_v53 = vmax.f32 %v3859_v30, 0.0 }
 0x3fd   :  { %4106 = vst.msk [vmem:[#allocation5 + $0xa0] sm:$0xff] %vm2138_vm6, %v4042_v6  ;;  %v4043_v37 = vmax.f32 %v3851_v51, 0.0 }
 0x3fe   :  { %4109 = vst.msk [vmem:[#allocation5 + $0xb8] sm:$0xff] %vm2138_vm6, %v4045_v53 }
 0x3ff   :  { %4107 = vst.msk [vmem:[#allocation5 + $0xa8] sm:$0xff] %vm2138_vm6, %v4043_v37 }
 0x40f   :  { %v4596_v34 = vpop.f32.mrb[120].mxu0 }
 0x410   :  { %v3872_v33 = vadd.f32 %v4596_v34, %v7070_v10  ;;  %v3863_v50 = vpop.f32.mrb[121].mxu0 }
 0x411   :  { %v3864_v44 = vadd.f32 %v7070_v10, %v3863_v50  ;;  %v4597_v31 = vpop.f32.mrb[122].mxu0 }
 0x412   :  { %v4048_v35 = vmax.f32 %v3872_v33, 0.0  ;;  %v3875_v3 = vadd.f32 %v4597_v31, %v7070_v10  ;;  %v3866_v12 = vpop.f32.mrb[123].mxu0 }
 0x413   :  { %v4046_v19 = vmax.f32 %v3864_v44, 0.0  ;;  %v3867_v61 = vadd.f32 %v7070_v10, %v3866_v12 }
 0x414   :  { %4112 = vst.msk [vmem:[#allocation5 + $0xd0] sm:$0xff] %vm2138_vm6, %v4048_v35  ;;  %v4049_v21 = vmax.f32 %v3875_v3, 0.0 }
 0x415   :  { %4110 = vst.msk [vmem:[#allocation5 + $0xc0] sm:$0xff] %vm2138_vm6, %v4046_v19  ;;  %v4047_v40 = vmax.f32 %v3867_v61, 0.0 }
 0x416   :  { %4113 = vst.msk [vmem:[#allocation5 + $0xd8] sm:$0xff] %vm2138_vm6, %v4049_v21 }
 0x417   :  { %4111 = vst.msk [vmem:[#allocation5 + $0xc8] sm:$0xff] %vm2138_vm6, %v4047_v40 }
 0x421   :  { %v4600_v17 = vpop.f32.mrb[124].mxu0 }
 0x422   :  { %v3888_v24 = vadd.f32 %v4600_v17, %v7070_v10  ;;  %v3879_v43 = vpop.f32.mrb[125].mxu0 }
 0x423   :  { %v3880_v63 = vadd.f32 %v7070_v10, %v3879_v43  ;;  %v4601_v1 = vpop.f32.mrb[126].mxu0 }
 0x424   :  { %v4052_v36 = vmax.f32 %v3888_v24, 0.0  ;;  %v3891_v20 = vadd.f32 %v4601_v1, %v7070_v10  ;;  %v3882_v2 = vpop.f32.mrb[127].mxu0 }
 0x425   :  { %v4050_v28 = vmax.f32 %v3880_v63, 0.0  ;;  %v3883_v7 = vadd.f32 %v7070_v10, %v3882_v2 }
 0x426   :  { %4116 = vst.msk [vmem:[#allocation5 + $0xf0] sm:$0xff] %vm2138_vm6, %v4052_v36  ;;  %v4053_v55 = vmax.f32 %v3891_v20, 0.0 }
 0x427   :  { %4114 = vst.msk [vmem:[#allocation5 + $0xe0] sm:$0xff] %vm2138_vm6, %v4050_v28  ;;  %v4051_v4 = vmax.f32 %v3883_v7, 0.0 }
 0x428   :  { %4117 = vst.msk [vmem:[#allocation5 + $0xf8] sm:$0xff] %vm2138_vm6, %v4053_v55 }
 0x429   :  { %4115 = vst.msk [vmem:[#allocation5 + $0xe8] sm:$0xff] %vm2138_vm6, %v4051_v4 }
 0x431   :  { %v4604_v38 = vpop.f32.mrb[128].mxu0 }
 0x432   :  { %v3904_v47 = vadd.f32 %v4604_v38, %v7070_v10  ;;  %v3895_v49 = vpop.f32.mrb[129].mxu0 }
 0x433   :  { %v3896_v59 = vadd.f32 %v7070_v10, %v3895_v49  ;;  %v4605_v29 = vpop.f32.mrb[130].mxu0 }
 0x434   :  { %v4056_v27 = vmax.f32 %v3904_v47, 0.0  ;;  %v3907_v15 = vadd.f32 %v4605_v29, %v7070_v10  ;;  %v3898_v8 = vpop.f32.mrb[131].mxu0 }
 0x435   :  { %v4054_v41 = vmax.f32 %v3896_v59, 0.0  ;;  %v3899_v42 = vadd.f32 %v7070_v10, %v3898_v8 }
 0x436   :  { %4120 = vst.msk [vmem:[#allocation5 + $0x110] sm:$0xff] %vm2138_vm6, %v4056_v27  ;;  %v4057_v14 = vmax.f32 %v3907_v15, 0.0 }
 0x437   :  { %4118 = vst.msk [vmem:[#allocation5 + $0x100] sm:$0xff] %vm2138_vm6, %v4054_v41  ;;  %v4055_v32 = vmax.f32 %v3899_v42, 0.0 }
 0x438   :  { %4121 = vst.msk [vmem:[#allocation5 + $0x118] sm:$0xff] %vm2138_vm6, %v4057_v14 }
 0x439   :  { %4119 = vst.msk [vmem:[#allocation5 + $0x108] sm:$0xff] %vm2138_vm6, %v4055_v32 }
 0x441   :  { %v4608_v11 = vpop.f32.mrb[132].mxu0 }
 0x442   :  { %v3920_v39 = vadd.f32 %v4608_v11, %v7070_v10  ;;  %v3911_v58 = vpop.f32.mrb[133].mxu0 }
 0x443   :  { %v3912_v56 = vadd.f32 %v7070_v10, %v3911_v58  ;;  %v4609_v26 = vpop.f32.mrb[134].mxu0 }
 0x444   :  { %v4060_v5 = vmax.f32 %v3920_v39, 0.0  ;;  %v3923_v45 = vadd.f32 %v4609_v26, %v7070_v10  ;;  %v3914_v54 = vpop.f32.mrb[135].mxu0 }
 0x445   :  { %v4058_v57 = vmax.f32 %v3912_v56, 0.0  ;;  %v3915_v18 = vadd.f32 %v7070_v10, %v3914_v54 }
 0x446   :  { %4124 = vst.msk [vmem:[#allocation5 + $0x130] sm:$0xff] %vm2138_vm6, %v4060_v5  ;;  %v4061_v9 = vmax.f32 %v3923_v45, 0.0 }
 0x447   :  { %4122 = vst.msk [vmem:[#allocation5 + $0x120] sm:$0xff] %vm2138_vm6, %v4058_v57  ;;  %v4059_v25 = vmax.f32 %v3915_v18, 0.0 }
 0x448   :  { %4125 = vst.msk [vmem:[#allocation5 + $0x138] sm:$0xff] %vm2138_vm6, %v4061_v9 }
 0x449   :  { %4123 = vst.msk [vmem:[#allocation5 + $0x128] sm:$0xff] %vm2138_vm6, %v4059_v25 }
 0x451   :  { %v4612_v46 = vpop.f32.mrb[136].mxu0 }
 0x452   :  { %v3936_v23 = vadd.f32 %v4612_v46, %v7070_v10  ;;  %v3927_v62 = vpop.f32.mrb[137].mxu0 }
 0x453   :  { %v3928_v48 = vadd.f32 %v7070_v10, %v3927_v62  ;;  %v4613_v60 = vpop.f32.mrb[138].mxu0 }
 0x454   :  { %v4064_v13 = vmax.f32 %v3936_v23, 0.0  ;;  %v3939_v22 = vadd.f32 %v4613_v60, %v7070_v10  ;;  %v3930_v16 = vpop.f32.mrb[139].mxu0 }
 0x455   :  { %v4062_v0 = vmax.f32 %v3928_v48, 0.0  ;;  %v3931_v30 = vadd.f32 %v7070_v10, %v3930_v16 }
 0x456   :  { %4128 = vst.msk [vmem:[#allocation5 + $0x150] sm:$0xff] %vm2138_vm6, %v4064_v13  ;;  %v4065_v52 = vmax.f32 %v3939_v22, 0.0 }
 0x457   :  { %4126 = vst.msk [vmem:[#allocation5 + $0x140] sm:$0xff] %vm2138_vm6, %v4062_v0  ;;  %v4063_v6 = vmax.f32 %v3931_v30, 0.0 }
 0x458   :  { %4129 = vst.msk [vmem:[#allocation5 + $0x158] sm:$0xff] %vm2138_vm6, %v4065_v52 }
 0x459   :  { %4127 = vst.msk [vmem:[#allocation5 + $0x148] sm:$0xff] %vm2138_vm6, %v4063_v6 }
 0x461   :  { %v4616_v51 = vpop.f32.mrb[140].mxu0 }
 0x462   :  { %v3952_v53 = vadd.f32 %v4616_v51, %v7070_v10  ;;  %v3943_v37 = vpop.f32.mrb[141].mxu0 }
 0x463   :  { %v3944_v34 = vadd.f32 %v7070_v10, %v3943_v37  ;;  %v4617_v33 = vpop.f32.mrb[142].mxu0 }
 0x464   :  { %v4068_v50 = vmax.f32 %v3952_v53, 0.0  ;;  %v3955_v44 = vadd.f32 %v4617_v33, %v7070_v10  ;;  %v3946_v31 = vpop.f32.mrb[143].mxu0 }
 0x465   :  { %v4066_v35 = vmax.f32 %v3944_v34, 0.0  ;;  %v3947_v3 = vadd.f32 %v7070_v10, %v3946_v31 }
 0x466   :  { %4132 = vst.msk [vmem:[#allocation5 + $0x170] sm:$0xff] %vm2138_vm6, %v4068_v50  ;;  %v4069_v12 = vmax.f32 %v3955_v44, 0.0 }
 0x467   :  { %4130 = vst.msk [vmem:[#allocation5 + $0x160] sm:$0xff] %vm2138_vm6, %v4066_v35  ;;  %v4067_v19 = vmax.f32 %v3947_v3, 0.0 }
 0x468   :  { %4133 = vst.msk [vmem:[#allocation5 + $0x178] sm:$0xff] %vm2138_vm6, %v4069_v12 }
 0x469   :  { %4131 = vst.msk [vmem:[#allocation5 + $0x168] sm:$0xff] %vm2138_vm6, %v4067_v19 }
 0x471   :  { %v4620_v61 = vpop.f32.mrb[144].mxu0 }
 0x472   :  { %v3968_v21 = vadd.f32 %v4620_v61, %v7070_v10  ;;  %v3959_v40 = vpop.f32.mrb[145].mxu0 }
 0x473   :  { %v3960_v17 = vadd.f32 %v7070_v10, %v3959_v40  ;;  %v4621_v24 = vpop.f32.mrb[146].mxu0 }
 0x474   :  { %v4072_v43 = vmax.f32 %v3968_v21, 0.0  ;;  %v3971_v63 = vadd.f32 %v4621_v24, %v7070_v10  ;;  %v3962_v1 = vpop.f32.mrb[147].mxu0 }
 0x475   :  { %v4070_v36 = vmax.f32 %v3960_v17, 0.0  ;;  %v3963_v20 = vadd.f32 %v7070_v10, %v3962_v1 }
 0x476   :  { %4136 = vst.msk [vmem:[#allocation5 + $0x190] sm:$0xff] %vm2138_vm6, %v4072_v43  ;;  %v4073_v2 = vmax.f32 %v3971_v63, 0.0 }
 0x477   :  { %4134 = vst.msk [vmem:[#allocation5 + $0x180] sm:$0xff] %vm2138_vm6, %v4070_v36  ;;  %v4071_v28 = vmax.f32 %v3963_v20, 0.0 }
 0x478   :  { %4137 = vst.msk [vmem:[#allocation5 + $0x198] sm:$0xff] %vm2138_vm6, %v4073_v2 }
 0x479   :  { %4135 = vst.msk [vmem:[#allocation5 + $0x188] sm:$0xff] %vm2138_vm6, %v4071_v28 }
 0x481   :  { %v4624_v7 = vpop.f32.mrb[148].mxu0 }
 0x482   :  { %v3984_v55 = vadd.f32 %v4624_v7, %v7070_v10  ;;  %v3975_v4 = vpop.f32.mrb[149].mxu0 }
 0x483   :  { %v3976_v38 = vadd.f32 %v7070_v10, %v3975_v4  ;;  %v4625_v47 = vpop.f32.mrb[150].mxu0 }
 0x484   :  { %v4076_v49 = vmax.f32 %v3984_v55, 0.0  ;;  %v3987_v59 = vadd.f32 %v4625_v47, %v7070_v10  ;;  %v3978_v29 = vpop.f32.mrb[151].mxu0 }
 0x485   :  { %v4074_v27 = vmax.f32 %v3976_v38, 0.0  ;;  %v3979_v15 = vadd.f32 %v7070_v10, %v3978_v29 }
 0x486   :  { %4140 = vst.msk [vmem:[#allocation5 + $0x1b0] sm:$0xff] %vm2138_vm6, %v4076_v49  ;;  %v4077_v8 = vmax.f32 %v3987_v59, 0.0 }
 0x487   :  { %4138 = vst.msk [vmem:[#allocation5 + $0x1a0] sm:$0xff] %vm2138_vm6, %v4074_v27  ;;  %v4075_v41 = vmax.f32 %v3979_v15, 0.0 }
 0x488   :  { %4141 = vst.msk [vmem:[#allocation5 + $0x1b8] sm:$0xff] %vm2138_vm6, %v4077_v8 }
 0x489   :  { %4139 = vst.msk [vmem:[#allocation5 + $0x1a8] sm:$0xff] %vm2138_vm6, %v4075_v41 }
 0x491   :  { %v4628_v42 = vpop.f32.mrb[152].mxu0 }
 0x492   :  { %v4000_v14 = vadd.f32 %v4628_v42, %v7070_v10  ;;  %v3991_v32 = vpop.f32.mrb[153].mxu0 }
 0x493   :  { %v3992_v11 = vadd.f32 %v7070_v10, %v3991_v32  ;;  %v4629_v39 = vpop.f32.mrb[154].mxu0 }
 0x494   :  { %v4080_v58 = vmax.f32 %v4000_v14, 0.0  ;;  %v4003_v56 = vadd.f32 %v4629_v39, %v7070_v10  ;;  %v3994_v26 = vpop.f32.mrb[155].mxu0 }
 0x495   :  { %v4078_v5 = vmax.f32 %v3992_v11, 0.0  ;;  %v3995_v45 = vadd.f32 %v7070_v10, %v3994_v26 }
 0x496   :  { %4144 = vst.msk [vmem:[#allocation5 + $0x1d0] sm:$0xff] %vm2138_vm6, %v4080_v58  ;;  %v4081_v54 = vmax.f32 %v4003_v56, 0.0 }
 0x497   :  { %4142 = vst.msk [vmem:[#allocation5 + $0x1c0] sm:$0xff] %vm2138_vm6, %v4078_v5  ;;  %v4079_v57 = vmax.f32 %v3995_v45, 0.0 }
 0x498   :  { %4145 = vst.msk [vmem:[#allocation5 + $0x1d8] sm:$0xff] %vm2138_vm6, %v4081_v54 }
 0x499   :  { %4143 = vst.msk [vmem:[#allocation5 + $0x1c8] sm:$0xff] %vm2138_vm6, %v4079_v57 }
 0x4a3   :  { %v4632_v18 = vpop.f32.mrb[156].mxu0 }
 0x4a4   :  { %v4016_v9 = vadd.f32 %v4632_v18, %v7070_v10  ;;  %v4007_v25 = vpop.f32.mrb[157].mxu0 }
 0x4a5   :  { %v4008_v46 = vadd.f32 %v7070_v10, %v4007_v25  ;;  %v4633_v23 = vpop.f32.mrb[158].mxu0 }
 0x4a6   :  { %v4084_v62 = vmax.f32 %v4016_v9, 0.0  ;;  %v4019_v48 = vadd.f32 %v4633_v23, %v7070_v10  ;;  %v4010_v60 = vpop.f32.mrb[159].mxu0 }
 0x4a7   :  { %v4082_v13 = vmax.f32 %v4008_v46, 0.0  ;;  %v4011_v22 = vadd.f32 %v7070_v10, %v4010_v60 }
 0x4a8   :  { %4148 = vst.msk [vmem:[#allocation5 + $0x1f0] sm:$0xff] %vm2138_vm6, %v4084_v62  ;;  %v4085_v16 = vmax.f32 %v4019_v48, 0.0 }
 0x4a9   :  { %4146 = vst.msk [vmem:[#allocation5 + $0x1e0] sm:$0xff] %vm2138_vm6, %v4082_v13  ;;  %v4083_v0 = vmax.f32 %v4011_v22, 0.0 }
 0x4aa   :  { %4149 = vst.msk [vmem:[#allocation5 + $0x1f8] sm:$0xff] %vm2138_vm6, %v4085_v16 }
 0x4ab   :  { %4147 = vst.msk [vmem:[#allocation5 + $0x1e8] sm:$0xff] %vm2138_vm6, %v4083_v0 }
 0x4ac   :  { %4770 = shalt.err (!%p4767_p12)
}
 0x4ad   :  { %s4771_s26 = scalar_lea.hbm %s7226_s7, 8192 }
 0x4ae   :  { %p4772_p13 = scmp.ne.s32.totalorder %s7226_s7, %s4771_s26  ;;  %p4775_p0 = scmp.lt.u32.totalorder %s4771_s26, %s7226_s7 }
 0x4b0   :  { %p4777_p1 = pnand %p4775_p0, %p4772_p13 }
 0x4b2   :  { %4780 = shalt.err (!%p4777_p1)
}
 0x4b3   :  { %s4792_s8 = smov 128   ;;  %s4793_s9 = smov 8  }
 0x4b4   :  { %4161 = dma.vmem_to_hbm [thread:$0]  %s4156_s1, 8192, %s7226_s7, [#allocation4], %s4792_s8, %s4792_s8, %s4793_s9  }
 0x4b5   :  { %4783 = dma.done.wait [#allocation4], 8192  }
 0x4b6   :  { %4784 = vsyncadd [#allocation4], 4294959104 }
 0x4b7   :  { %4165 = vsyncpa [#allocation3], 1 }
 0x4b8   :  { %4166 = vsyncpa [#allocation4], 1 }

</bundles_post_ra>
